<compile_context>
chip_gen: v7x
topology: tpu7x:2x2x1
jax: 0.10.0
libtpu: 0.0.40
codegen_flags: <defaults>
</compile_context>

<pallas_src>
import jax
import jax.numpy as jnp
from jax import lax
from jax.experimental import pallas as pl
from jax.experimental.pallas import tpu as pltpu

# ----------------------------- model config ---------------------------------
B          = 2      # batch
FEAT_DIM   = 4      # conv output channels
RNN_DIM    = 16     # GRU hidden size
RNN_LAYERS = 2
N_CLASS    = 5
INPUT_LEN  = 8      # W  (sequence length)
INPUT_H    = 8      # H  (frequency / height)
SQRT1_2    = 0.7071067811865476
USE_TANH_GELU = False   # True -> jax.nn.gelu(approximate=True): EUP-routed, ~1e-3 off torch


# --------------------- packed-weight slab layout (static rows) ---------------
def _align8(n):
    return (n + 7) // 8 * 8

ROW_WCOMB = 0                              # (72, 16)  conv(+view/transpose)+fc pre-composed
ROW_BIAS  = ROW_WCOMB + INPUT_H * 9        # 72: one bias/vector per row
(BIAS_BCOMB, BIAS_LN0G, BIAS_LN0B, BIAS_BIH0, BIAS_BHH0,
 BIAS_LN1G, BIAS_LN1B, BIAS_BIH1, BIAS_BHH1, BIAS_CLSB,
 BIAS_F2B) = range(ROW_BIAS, ROW_BIAS + 11)
ROW_WIH0  = _align8(ROW_BIAS + 11)         # 88:  (16, 96) layer-0 input gates  [fwd|bwd merged]
ROW_WHH0  = ROW_WIH0 + RNN_DIM             # 104: (32, 96) layer-0 recurrence (block-diagonal)
ROW_WIH1  = ROW_WHH0 + 2 * RNN_DIM         # 136: (32, 96) layer-1 input gates
ROW_WHH1  = ROW_WIH1 + 2 * RNN_DIM         # 168: (32, 96) layer-1 recurrence
ROW_CLSW  = ROW_WHH1 + 2 * RNN_DIM         # 200: (32, 16) classifier weight^T
ROW_F2W   = ROW_CLSW + 2 * RNN_DIM         # 232: (128, 5) fc2 weight^T
N_ROWS    = _align8(ROW_F2W + INPUT_LEN * RNN_DIM)   # 360


def _vmem_spec():
    return pl.BlockSpec(memory_space=pltpu.MemorySpace.VMEM)


# ----------------------------- elementwise helpers ---------------------------
def _erf(x):
    # Abramowitz & Stegun 7.1.26 polynomial, |err| <= 1.5e-7 (odd extension).
    # Lowers to exp + basic VPU ops only; numerically equal to exact erf in f32 practice.
    ax = jnp.abs(x)
    t = 1.0 / (1.0 + 0.3275911 * ax)
    poly = ((((1.061405429 * t - 1.453152027) * t + 1.421413741) * t
             - 0.284496736) * t + 0.254829592) * t
    y = 1.0 - poly * jnp.exp(-(ax * ax))
    return jnp.where(x < 0.0, -y, y)


def _gelu(x):
    if USE_TANH_GELU:
        return jax.nn.gelu(x, approximate=True)
    return 0.5 * x * (1.0 + _erf(x * SQRT1_2))          # torch's exact (erf) GELU


def _layernorm(x, g, b, eps=1e-5):
    mu = jnp.mean(x, axis=-1, keepdims=True)
    var = jnp.mean((x - mu) * (x - mu), axis=-1, keepdims=True)
    return (x - mu) * lax.rsqrt(var + eps) * g + b


# ----------------------------- in-kernel BiGRU layer --------------------------
def _bigru_layer(seq_in, ln_g, ln_b, wih_cat, bih_cat, whh_bd, bhh_cat):
    """LayerNorm -> GELU -> bidirectional GRU (eval-mode dropout = identity).

    seq_in : (T*B, d_in) time-major (row index t*B + b)
    wih_cat: (d_in, 6R) gate-major lane-concat columns [r_f r_b | z_f z_b | n_f n_b]
    whh_bd : (2R, 6R)  direction-block-diagonal recurrence weight (same column order)
    returns: (T*B, 2R) with features [fwd(t) | bwd(t)], as a VALUE (no scratch).
    """
    R, Tn, Bb = RNN_DIM, INPUT_LEN, B
    xn = _gelu(_layernorm(seq_in, ln_g, ln_b))

    # both directions' input-side gates in ONE (T*B, d_in)@(d_in, 6R) matmul
    gx = jnp.dot(xn, wih_cat, preferred_element_type=jnp.float32) + bih_cat      # (T*B, 6R)

    bhh = jnp.broadcast_to(bhh_cat, (Bb, 6 * R))                # hoisted bias broadcast
    col = lax.broadcasted_iota(jnp.int32, (Bb, 6 * R), 1)
    fwd_cols = jnp.bitwise_and(col, 2 * R - 1) < R              # forward-direction lanes

    h = jnp.zeros((Bb, 2 * R), jnp.float32)                     # [h_f | h_b]
    hs = []
    for s in range(Tn):                                         # fully unrolled (T static)
        tf, tb = s, Tn - 1 - s                                   # fwd time / bwd time
        # per-step x-gates: fwd lanes from time tf, bwd lanes from time tb (off critical path)
        gxt = jnp.where(fwd_cols,
                        gx[tf * Bb:(tf + 1) * Bb, :],
                        gx[tb * Bb:(tb + 1) * Bb, :])
        # ONE merged (B,2R)@(2R,6R) recurrence matmul for both directions
        gh = jnp.dot(h, whh_bd, preferred_element_type=jnp.float32) + bhh
        rz = jax.nn.sigmoid(gxt[:, 0:4 * R] + gh[:, 0:4 * R])
        r, z = rz[:, 0:2 * R], rz[:, 2 * R:4 * R]
        n = jnp.tanh(gxt[:, 4 * R:6 * R] + r * gh[:, 4 * R:6 * R])
        h = (1.0 - z) * n + z * h
        hs.append(h)

    # assemble (T*B, 2R): time t row-block = [h_f after step t | h_b after step T-1-t]
    blocks = [jnp.concatenate([hs[t][:, 0:R], hs[Tn - 1 - t][:, R:2 * R]], axis=-1)
              for t in range(Tn)]
    return jnp.concatenate(blocks, axis=0)


# ----------------------------- the fused kernel --------------------------------
def _toolmodule_kernel(a_ref, w_ref, out_ref):
    R, Tn, Bb = RNN_DIM, INPUT_LEN, B

    # stem: Conv2d(1,F,3,pad=1) + view + transpose + fc, pre-composed -> ONE matmul
    h0 = (jnp.dot(a_ref[...], w_ref[ROW_WCOMB:ROW_WCOMB + INPUT_H * 9, 0:R],
                  preferred_element_type=jnp.float32)
          + w_ref[BIAS_BCOMB:BIAS_BCOMB + 1, 0:R])                              # (T*B, R)

    # BiGRU stack (dropout = identity in eval mode)
    seq1 = _bigru_layer(
        h0,
        w_ref[BIAS_LN0G:BIAS_LN0G + 1, 0:R], w_ref[BIAS_LN0B:BIAS_LN0B + 1, 0:R],
        w_ref[ROW_WIH0:ROW_WIH0 + R, 0:6 * R],
        w_ref[BIAS_BIH0:BIAS_BIH0 + 1, 0:6 * R],
        w_ref[ROW_WHH0:ROW_WHH0 + 2 * R, 0:6 * R],
        w_ref[BIAS_BHH0:BIAS_BHH0 + 1, 0:6 * R])                                # (T*B, 2R)

    seq2 = _bigru_layer(
        seq1,
        w_ref[BIAS_LN1G:BIAS_LN1G + 1, 0:2 * R], w_ref[BIAS_LN1B:BIAS_LN1B + 1, 0:2 * R],
        w_ref[ROW_WIH1:ROW_WIH1 + 2 * R, 0:6 * R],
        w_ref[BIAS_BIH1:BIAS_BIH1 + 1, 0:6 * R],
        w_ref[ROW_WHH1:ROW_WHH1 + 2 * R, 0:6 * R],
        w_ref[BIAS_BHH1:BIAS_BHH1 + 1, 0:6 * R])                                # (T*B, 2R)

    # classifier: Linear(2R, R) + GELU (+ dropout identity)
    c = _gelu(jnp.dot(seq2, w_ref[ROW_CLSW:ROW_CLSW + 2 * R, 0:R],
                      preferred_element_type=jnp.float32)
              + w_ref[BIAS_CLSB:BIAS_CLSB + 1, 0:R])                            # (T*B, R)

    # view(B, T*R): lane-dense (B, 128) operand, then fc2: Linear(T*R, n_class)
    c_wide = jnp.concatenate([c[t * Bb:(t + 1) * Bb, :] for t in range(Tn)], axis=-1)
    out = (jnp.dot(c_wide, w_ref[ROW_F2W:ROW_F2W + Tn * R, 0:N_CLASS],
                   preferred_element_type=jnp.float32)
           + w_ref[BIAS_F2B:BIAS_F2B + 1, 0:N_CLASS])
    out_ref[...] = out.astype(out_ref.dtype)


# ----------------------------- parameters ------------------------------------
def init_params(key):
    """Natural-layout parameters (documented correspondence to the PyTorch module):
      cw_t[3*dh+dw, c]     == stemcnn.weight[c, 0, dh, dw]       (9, F)
      cb[0, c]             == stemcnn.bias[c]                    (1, F)
      fcw3[h, c, r]        == fc.weight[r, c*H + h]              (H, F, R)
      fcb[0, r]            == fc.bias[r]                         (1, R)
      rnn[i].wih_t[d]      == gru.weight_ih_l0{,_reverse}.T      (d_in, 3R), gates [r|z|n]
      rnn[i].whh_t[d]      == gru.weight_hh_l0{,_reverse}.T      (R, 3R)
      rnn[i].bih/bhh[d,0]  == gru.bias_ih/hh_l0{,_reverse}       (1, 3R)
      clsw_t               == classifier[0].weight.T             (2R, R)
      f2w_t                == fc2.weight.T                       (T*R, n_class)
    """
    def nrm(k, shape, scale=0.1):
        return scale * jax.random.normal(k, shape, jnp.float32)

    keys = iter(jax.random.split(key, 64))
    p = {
        "cw_t":   nrm(next(keys), (9, FEAT_DIM)),
        "cb":     nrm(next(keys), (1, FEAT_DIM)),
        "fcw3":   nrm(next(keys), (INPUT_H, FEAT_DIM, RNN_DIM)),
        "fcb":    nrm(next(keys), (1, RNN_DIM)),
        "clsw_t": nrm(next(keys), (2 * RNN_DIM, RNN_DIM)),
        "clsb":   nrm(next(keys), (1, RNN_DIM)),
        "f2w_t":  nrm(next(keys), (RNN_DIM * INPUT_LEN, N_CLASS)),
        "f2b":    nrm(next(keys), (1, N_CLASS)),
        "rnn":    [],
    }
    for i in range(RNN_LAYERS):
        d_in = RNN_DIM if i == 0 else 2 * RNN_DIM
        p["rnn"].append({
            "ln_g":  jnp.ones((1, d_in), jnp.float32),
            "ln_b":  jnp.zeros((1, d_in), jnp.float32),
            "wih_t": nrm(next(keys), (2, d_in, 3 * RNN_DIM)),
            "bih":   nrm(next(keys), (2, 1, 3 * RNN_DIM)),
            "whh_t": nrm(next(keys), (2, RNN_DIM, 3 * RNN_DIM)),
            "bhh":   nrm(next(keys), (2, 1, 3 * RNN_DIM)),
        })
    return p


def _merge_gate_cols(wf, wb):
    """[r|z|n] fwd + bwd (d,3R) -> gate-major lane-concat (d,6R): [r_f r_b z_f z_b n_f n_b]."""
    R = RNN_DIM
    cols = []
    for g in range(3):
        cols.append(wf[:, g * R:(g + 1) * R])
        cols.append(wb[:, g * R:(g + 1) * R])
    return jnp.concatenate(cols, axis=-1)


def _blockdiag_whh(whh_f, whh_b):
    """Direction-block-diagonal (2R,6R) recurrence weight in gate-major column order."""
    R = RNN_DIM
    zero = jnp.zeros((R, R), jnp.float32)
    cols = []
    for g in range(3):
        cols.append(jnp.concatenate([whh_f[:, g * R:(g + 1) * R], zero], axis=0))
        cols.append(jnp.concatenate([zero, whh_b[:, g * R:(g + 1) * R]], axis=0))
    return jnp.concatenate(cols, axis=-1)


def pack_params(p):
    """Pre-compose conv+fc and pack ALL weights into one lane-dense (N_ROWS,128) f32 slab."""
    R = RNN_DIM
    slab = jnp.zeros((N_ROWS, 128), jnp.float32)

    # conv (+view/transpose) + fc algebraic pre-composition
    wcomb = jnp.einsum("kc,hcr->hkr", p["cw_t"], p["fcw3"]).reshape(INPUT_H * 9, R)
    bcomb = p["fcb"] + jnp.einsum("oc,hcr->or", p["cb"], p["fcw3"])

    def put(s, row, m):
        return s.at[row:row + m.shape[0], 0:m.shape[1]].set(m.astype(jnp.float32))

    slab = put(slab, ROW_WCOMB, wcomb)
    slab = put(slab, BIAS_BCOMB, bcomb)

    l0, l1 = p["rnn"]
    slab = put(slab, BIAS_LN0G, l0["ln_g"]);  slab = put(slab, BIAS_LN0B, l0["ln_b"])
    slab = put(slab, BIAS_LN1G, l1["ln_g"]);  slab = put(slab, BIAS_LN1B, l1["ln_b"])
    slab = put(slab, BIAS_BIH0, _merge_gate_cols(l0["bih"][0], l0["bih"][1]))
    slab = put(slab, BIAS_BHH0, _merge_gate_cols(l0["bhh"][0], l0["bhh"][1]))
    slab = put(slab, BIAS_BIH1, _merge_gate_cols(l1["bih"][0], l1["bih"][1]))
    slab = put(slab, BIAS_BHH1, _merge_gate_cols(l1["bhh"][0], l1["bhh"][1]))
    slab = put(slab, ROW_WIH0, _merge_gate_cols(l0["wih_t"][0], l0["wih_t"][1]))
    slab = put(slab, ROW_WHH0, _blockdiag_whh(l0["whh_t"][0], l0["whh_t"][1]))
    slab = put(slab, ROW_WIH1, _merge_gate_cols(l1["wih_t"][0], l1["wih_t"][1]))
    slab = put(slab, ROW_WHH1, _blockdiag_whh(l1["whh_t"][0], l1["whh_t"][1]))
    slab = put(slab, ROW_CLSW, p["clsw_t"]);  slab = put(slab, BIAS_CLSB, p["clsb"])
    slab = put(slab, ROW_F2W, p["f2w_t"]);    slab = put(slab, BIAS_F2B, p["f2b"])
    return slab


# ----------------------------- forward ---------------------------------------
def forward(x, w_packed):
    """x: (B, 1, H, W) NCHW. w_packed: (N_ROWS, 128) slab from pack_params."""
    Bb, _, Hh, W = x.shape
    Tn = W
    # im2col patch build fused with the (T*B, 72) relayout (one tiny wrapper-side op chain):
    #   a[t*B+b, hi*9 + 3*dh+dw] = xpad[b, hi+dh, t+dw]
    xp = jnp.pad(x[:, 0], ((0, 0), (1, 1), (1, 1)))                            # (B, H+2, W+2)
    cols = [xp[:, hi + dh, dw:dw + W]
            for hi in range(Hh) for dh in range(3) for dw in range(3)]         # each (B, W)
    a = jnp.stack(cols, axis=-1).transpose(1, 0, 2).reshape(Tn * Bb, Hh * 9)   # (T*B, 72)
    # TODO(synk): the im2col could also be built in-kernel from raw x with static slices;
    #             kept as one wrapper-side fusion since it is <5 KB and the kernel now has
    #             only 2 input DMAs.

    return pl.pallas_call(
        _toolmodule_kernel,
        out_shape=jax.ShapeDtypeStruct((Bb, N_CLASS), jnp.float32),
        in_specs=[_vmem_spec(), _vmem_spec()],
        out_specs=_vmem_spec(),
    )(a, w_packed)


# ------------------------ pure-JAX reference (parity check) -------------------
def _bigru_reference(xseq, lp):
    Bb, W, _ = xseq.shape
    R = RNN_DIM
    mu = jnp.mean(xseq, axis=-1, keepdims=True)
    var = jnp.mean((xseq - mu) ** 2, axis=-1, keepdims=True)
    xn = _gelu((xseq - mu) / jnp.sqrt(var + 1e-5) * lp["ln_g"][0] + lp["ln_b"][0])
    outs = []
    for d in range(2):
        wih, whh = lp["wih_t"][d], lp["whh_t"][d]
        bih, bhh = lp["bih"][d][0], lp["bhh"][d][0]
        h = jnp.zeros((Bb, R), jnp.float32)
        seq = []
        times = range(W) if d == 0 else range(W - 1, -1, -1)
        for t in times:
            gx = xn[:, t] @ wih + bih
            gh = h @ whh + bhh
            r = jax.nn.sigmoid(gx[:, 0:R] + gh[:, 0:R])
            z = jax.nn.sigmoid(gx[:, R:2 * R] + gh[:, R:2 * R])
            n = jnp.tanh(gx[:, 2 * R:] + r * gh[:, 2 * R:])
            h = (1.0 - z) * n + z * h
            seq.append(h)
        if d == 1:
            seq = seq[::-1]
        outs.append(jnp.stack(seq, axis=1))
    return jnp.concatenate(outs, axis=-1)                          # (B, W, 2R)


def forward_reference(x, p):
    """Straightforward JAX re-implementation of ToolModule.forward (eval mode)."""
    Bb = x.shape[0]
    Hh, W, R, F = INPUT_H, INPUT_LEN, RNN_DIM, FEAT_DIM
    xp = jnp.pad(x[:, 0], ((0, 0), (1, 1), (1, 1)))
    conv = sum(p["cw_t"][3 * dh + dw][None, :, None, None] * xp[:, None, dh:dh + Hh, dw:dw + W]
               for dh in range(3) for dw in range(3)) + p["cb"][0][None, :, None, None]
    xr = conv.reshape(Bb, F * Hh, W).transpose(0, 2, 1)            # (B, W, F*H), feat = c*H+h
    fcwT = p["fcw3"].transpose(1, 0, 2).reshape(F * Hh, R)
    s = xr @ fcwT + p["fcb"][0]                                    # (B, W, R)
    for lp in p["rnn"]:
        s = _bigru_reference(s, lp)
    c = _gelu(s @ p["clsw_t"] + p["clsb"][0])                      # (B, W, R)
    return c.reshape(Bb, W * R) @ p["f2w_t"] + p["f2b"][0]


# ----------------------------- main -------------------------------------------
if __name__ == "__main__":
    key = jax.random.PRNGKey(0)
    k_x, k_p = jax.random.split(key)
    x = jax.random.normal(k_x, (B, 1, INPUT_H, INPUT_LEN), jnp.float32)        # NCHW
    params = init_params(k_p)
    w_packed = pack_params(params)

    fwd = jax.jit(forward)
    y = jax.block_until_ready(fwd(x, w_packed))

    assert y.shape == (B, N_CLASS), y.shape
    assert bool(jnp.all(jnp.isfinite(y)))

    # numeric parity check against a plain-JAX re-implementation of the torch module
    with jax.default_matmul_precision("float32"):
        y_ref = jax.block_until_ready(jax.jit(forward_reference)(x, params))
    err = float(jnp.max(jnp.abs(y - y_ref)))
    assert err < 5e-2, f"parity check failed, max abs err = {err}"

    print("KERNEL_OK")
</pallas_src>

<mosaic_0001>
module attributes {stable_mosaic.version = 11 : i64} {
  func.func @_toolmodule_kernel(%arg0: memref<16x72xf32, #tpu.memory_space<vmem>>, %arg1: memref<360x128xf32, #tpu.memory_space<vmem>>, %arg2: memref<2x5xf32, #tpu.memory_space<vmem>>) attributes {dimension_semantics = [], scalar_prefetch = 0 : i64, scratch_operands = 0 : i64, tpu.core_type = #tpu.core_type<tc>} {
    %c0 = arith.constant 0 : index
    %c0_0 = arith.constant 0 : index
    %0 = vector.load %arg0[%c0, %c0_0] : memref<16x72xf32, #tpu.memory_space<vmem>>, vector<16x72xf32>
    %c0_1 = arith.constant 0 : index
    %c0_2 = arith.constant 0 : index
    %1 = vector.load %arg1[%c0_1, %c0_2] : memref<360x128xf32, #tpu.memory_space<vmem>>, vector<72x16xf32>
    %cst = arith.constant dense<0.000000e+00> : vector<16x16xf32>
    %2 = tpu.matmul %0, %1, %cst {dimension_numbers = #tpu.dot_dimension_numbers<[1], [0], [0], [1], [0, 0, 1, 1], [], []>} : vector<16x72xf32>, vector<72x16xf32>, vector<16x16xf32> -> vector<16x16xf32>
    %c72 = arith.constant 72 : index
    %c0_3 = arith.constant 0 : index
    %3 = vector.load %arg1[%c72, %c0_3] : memref<360x128xf32, #tpu.memory_space<vmem>>, vector<1x16xf32>
    %4 = vector.broadcast %3 : vector<1x16xf32> to vector<16x16xf32>
    %5 = arith.addf %2, %4 : vector<16x16xf32>
    %c73 = arith.constant 73 : index
    %c0_4 = arith.constant 0 : index
    %6 = vector.load %arg1[%c73, %c0_4] : memref<360x128xf32, #tpu.memory_space<vmem>>, vector<1x16xf32>
    %c74 = arith.constant 74 : index
    %c0_5 = arith.constant 0 : index
    %7 = vector.load %arg1[%c74, %c0_5] : memref<360x128xf32, #tpu.memory_space<vmem>>, vector<1x16xf32>
    %c88 = arith.constant 88 : index
    %c0_6 = arith.constant 0 : index
    %8 = vector.load %arg1[%c88, %c0_6] : memref<360x128xf32, #tpu.memory_space<vmem>>, vector<16x96xf32>
    %c75 = arith.constant 75 : index
    %c0_7 = arith.constant 0 : index
    %9 = vector.load %arg1[%c75, %c0_7] : memref<360x128xf32, #tpu.memory_space<vmem>>, vector<1x96xf32>
    %c104 = arith.constant 104 : index
    %c0_8 = arith.constant 0 : index
    %10 = vector.load %arg1[%c104, %c0_8] : memref<360x128xf32, #tpu.memory_space<vmem>>, vector<32x96xf32>
    %c76 = arith.constant 76 : index
    %c0_9 = arith.constant 0 : index
    %11 = vector.load %arg1[%c76, %c0_9] : memref<360x128xf32, #tpu.memory_space<vmem>>, vector<1x96xf32>
    %cst_10 = arith.constant dense<0.000000e+00> : vector<16xf32>
    %12 = vector.multi_reduction <add>, %5, %cst_10 [1] : vector<16x16xf32> to vector<16xf32>
    %13 = vector.shape_cast %12 : vector<16xf32> to vector<16x1xf32>
    %cst_11 = arith.constant 1.600000e+01 : f32
    %14 = vector.broadcast %cst_11 : f32 to vector<16x1xf32>
    %15 = arith.divf %13, %14 : vector<16x1xf32>
    %16 = vector.broadcast %15 : vector<16x1xf32> to vector<16x16xf32>
    %17 = arith.subf %5, %16 : vector<16x16xf32>
    %18 = vector.broadcast %15 : vector<16x1xf32> to vector<16x16xf32>
    %19 = arith.subf %5, %18 : vector<16x16xf32>
    %20 = arith.mulf %17, %19 : vector<16x16xf32>
    %cst_12 = arith.constant dense<0.000000e+00> : vector<16xf32>
    %21 = vector.multi_reduction <add>, %20, %cst_12 [1] : vector<16x16xf32> to vector<16xf32>
    %22 = vector.shape_cast %21 : vector<16xf32> to vector<16x1xf32>
    %cst_13 = arith.constant 1.600000e+01 : f32
    %23 = vector.broadcast %cst_13 : f32 to vector<16x1xf32>
    %24 = arith.divf %22, %23 : vector<16x1xf32>
    %25 = vector.broadcast %15 : vector<16x1xf32> to vector<16x16xf32>
    %26 = arith.subf %5, %25 : vector<16x16xf32>
    %cst_14 = arith.constant 9.99999974E-6 : f32
    %27 = vector.broadcast %cst_14 : f32 to vector<16x1xf32>
    %28 = arith.addf %24, %27 : vector<16x1xf32>
    %29 = math.rsqrt %28 : vector<16x1xf32>
    %30 = vector.broadcast %29 : vector<16x1xf32> to vector<16x16xf32>
    %31 = arith.mulf %26, %30 : vector<16x16xf32>
    %32 = vector.broadcast %6 : vector<1x16xf32> to vector<16x16xf32>
    %33 = arith.mulf %31, %32 : vector<16x16xf32>
    %34 = vector.broadcast %7 : vector<1x16xf32> to vector<16x16xf32>
    %35 = arith.addf %33, %34 : vector<16x16xf32>
    %cst_15 = arith.constant 5.000000e-01 : f32
    %36 = vector.broadcast %cst_15 : f32 to vector<16x16xf32>
    %37 = arith.mulf %36, %35 : vector<16x16xf32>
    %cst_16 = arith.constant 0.707106769 : f32
    %38 = vector.broadcast %cst_16 : f32 to vector<16x16xf32>
    %39 = arith.mulf %35, %38 : vector<16x16xf32>
    %40 = math.absf %39 : vector<16x16xf32>
    %cst_17 = arith.constant 0.327591091 : f32
    %41 = vector.broadcast %cst_17 : f32 to vector<16x16xf32>
    %42 = arith.mulf %41, %40 : vector<16x16xf32>
    %cst_18 = arith.constant 1.000000e+00 : f32
    %43 = vector.broadcast %cst_18 : f32 to vector<16x16xf32>
    %44 = arith.addf %43, %42 : vector<16x16xf32>
    %cst_19 = arith.constant 1.000000e+00 : f32
    %45 = vector.broadcast %cst_19 : f32 to vector<16x16xf32>
    %46 = arith.divf %45, %44 : vector<16x16xf32>
    %cst_20 = arith.constant 1.06140542 : f32
    %47 = vector.broadcast %cst_20 : f32 to vector<16x16xf32>
    %48 = arith.mulf %47, %46 : vector<16x16xf32>
    %cst_21 = arith.constant 1.45315206 : f32
    %49 = vector.broadcast %cst_21 : f32 to vector<16x16xf32>
    %50 = arith.subf %48, %49 : vector<16x16xf32>
    %51 = arith.mulf %50, %46 : vector<16x16xf32>
    %cst_22 = arith.constant 1.42141378 : f32
    %52 = vector.broadcast %cst_22 : f32 to vector<16x16xf32>
    %53 = arith.addf %51, %52 : vector<16x16xf32>
    %54 = arith.mulf %53, %46 : vector<16x16xf32>
    %cst_23 = arith.constant 0.284496725 : f32
    %55 = vector.broadcast %cst_23 : f32 to vector<16x16xf32>
    %56 = arith.subf %54, %55 : vector<16x16xf32>
    %57 = arith.mulf %56, %46 : vector<16x16xf32>
    %cst_24 = arith.constant 0.254829586 : f32
    %58 = vector.broadcast %cst_24 : f32 to vector<16x16xf32>
    %59 = arith.addf %57, %58 : vector<16x16xf32>
    %60 = arith.mulf %59, %46 : vector<16x16xf32>
    %61 = arith.mulf %40, %40 : vector<16x16xf32>
    %cst_25 = arith.constant 0.000000e+00 : f32
    %62 = vector.broadcast %cst_25 : f32 to vector<16x16xf32>
    %63 = arith.subf %62, %61 : vector<16x16xf32>
    %64 = math.exp %63 : vector<16x16xf32>
    %65 = arith.mulf %60, %64 : vector<16x16xf32>
    %cst_26 = arith.constant 1.000000e+00 : f32
    %66 = vector.broadcast %cst_26 : f32 to vector<16x16xf32>
    %67 = arith.subf %66, %65 : vector<16x16xf32>
    %cst_27 = arith.constant 0.000000e+00 : f32
    %68 = vector.broadcast %cst_27 : f32 to vector<16x16xf32>
    %69 = arith.cmpf olt, %39, %68 : vector<16x16xf32>
    %cst_28 = arith.constant 0.000000e+00 : f32
    %70 = vector.broadcast %cst_28 : f32 to vector<16x16xf32>
    %71 = arith.subf %70, %67 : vector<16x16xf32>
    %72 = arith.select %69, %71, %67 : vector<16x16xi1>, vector<16x16xf32>
    %cst_29 = arith.constant 1.000000e+00 : f32
    %73 = vector.broadcast %cst_29 : f32 to vector<16x16xf32>
    %74 = arith.addf %73, %72 : vector<16x16xf32>
    %75 = arith.mulf %37, %74 : vector<16x16xf32>
    %cst_30 = arith.constant dense<0.000000e+00> : vector<16x96xf32>
    %76 = tpu.matmul %75, %8, %cst_30 {dimension_numbers = #tpu.dot_dimension_numbers<[1], [0], [0], [1], [0, 0, 1, 1], [], []>} : vector<16x16xf32>, vector<16x96xf32>, vector<16x96xf32> -> vector<16x96xf32>
    %77 = vector.broadcast %9 : vector<1x96xf32> to vector<16x96xf32>
    %78 = arith.addf %76, %77 : vector<16x96xf32>
    %79 = vector.shape_cast %11 : vector<1x96xf32> to vector<1x96xf32>
    %80 = vector.broadcast %79 : vector<1x96xf32> to vector<2x96xf32>
    %81 = tpu.iota {dimensions = array<i32: 1>} : vector<2x96xi32>
    %c31_i32 = arith.constant 31 : i32
    %82 = vector.broadcast %c31_i32 : i32 to vector<2x96xi32>
    %83 = arith.andi %81, %82 : vector<2x96xi32>
    %c16_i32 = arith.constant 16 : i32
    %84 = vector.broadcast %c16_i32 : i32 to vector<2x96xi32>
    %85 = arith.cmpi slt, %83, %84 : vector<2x96xi32>
    %cst_31 = arith.constant 0.000000e+00 : f32
    %86 = vector.broadcast %cst_31 : f32 to vector<2x32xf32>
    %87 = vector.extract_strided_slice %78 {offsets = [0, 0], sizes = [2, 96], strides = [1, 1]} : vector<16x96xf32> to vector<2x96xf32>
    %88 = vector.extract_strided_slice %78 {offsets = [14, 0], sizes = [2, 96], strides = [1, 1]} : vector<16x96xf32> to vector<2x96xf32>
    %89 = arith.select %85, %87, %88 : vector<2x96xi1>, vector<2x96xf32>
    %cst_32 = arith.constant dense<0.000000e+00> : vector<2x96xf32>
    %90 = tpu.matmul %86, %10, %cst_32 {dimension_numbers = #tpu.dot_dimension_numbers<[1], [0], [0], [1], [0, 0, 1, 1], [], []>} : vector<2x32xf32>, vector<32x96xf32>, vector<2x96xf32> -> vector<2x96xf32>
    %91 = arith.addf %90, %80 : vector<2x96xf32>
    %92 = vector.extract_strided_slice %89 {offsets = [0, 0], sizes = [2, 64], strides = [1, 1]} : vector<2x96xf32> to vector<2x64xf32>
    %93 = vector.extract_strided_slice %91 {offsets = [0, 0], sizes = [2, 64], strides = [1, 1]} : vector<2x96xf32> to vector<2x64xf32>
    %94 = arith.addf %92, %93 : vector<2x64xf32>
    %95 = arith.negf %94 : vector<2x64xf32>
    %96 = math.exp %95 : vector<2x64xf32>
    %cst_33 = arith.constant 1.000000e+00 : f32
    %97 = vector.broadcast %cst_33 : f32 to vector<2x64xf32>
    %98 = arith.addf %97, %96 : vector<2x64xf32>
    %99 = arith.divf %97, %98 : vector<2x64xf32>
    %100 = vector.extract_strided_slice %99 {offsets = [0, 0], sizes = [2, 32], strides = [1, 1]} : vector<2x64xf32> to vector<2x32xf32>
    %101 = vector.extract_strided_slice %99 {offsets = [0, 32], sizes = [2, 32], strides = [1, 1]} : vector<2x64xf32> to vector<2x32xf32>
    %102 = vector.extract_strided_slice %89 {offsets = [0, 64], sizes = [2, 32], strides = [1, 1]} : vector<2x96xf32> to vector<2x32xf32>
    %103 = vector.extract_strided_slice %91 {offsets = [0, 64], sizes = [2, 32], strides = [1, 1]} : vector<2x96xf32> to vector<2x32xf32>
    %104 = arith.mulf %100, %103 : vector<2x32xf32>
    %105 = arith.addf %102, %104 : vector<2x32xf32>
    %106 = math.tanh %105 : vector<2x32xf32>
    %cst_34 = arith.constant 1.000000e+00 : f32
    %107 = vector.broadcast %cst_34 : f32 to vector<2x32xf32>
    %108 = arith.subf %107, %101 : vector<2x32xf32>
    %109 = arith.mulf %108, %106 : vector<2x32xf32>
    %110 = arith.mulf %101, %86 : vector<2x32xf32>
    %111 = arith.addf %109, %110 : vector<2x32xf32>
    %112 = vector.extract_strided_slice %78 {offsets = [2, 0], sizes = [2, 96], strides = [1, 1]} : vector<16x96xf32> to vector<2x96xf32>
    %113 = vector.extract_strided_slice %78 {offsets = [12, 0], sizes = [2, 96], strides = [1, 1]} : vector<16x96xf32> to vector<2x96xf32>
    %114 = arith.select %85, %112, %113 : vector<2x96xi1>, vector<2x96xf32>
    %cst_35 = arith.constant dense<0.000000e+00> : vector<2x96xf32>
    %115 = tpu.matmul %111, %10, %cst_35 {dimension_numbers = #tpu.dot_dimension_numbers<[1], [0], [0], [1], [0, 0, 1, 1], [], []>} : vector<2x32xf32>, vector<32x96xf32>, vector<2x96xf32> -> vector<2x96xf32>
    %116 = arith.addf %115, %80 : vector<2x96xf32>
    %117 = vector.extract_strided_slice %114 {offsets = [0, 0], sizes = [2, 64], strides = [1, 1]} : vector<2x96xf32> to vector<2x64xf32>
    %118 = vector.extract_strided_slice %116 {offsets = [0, 0], sizes = [2, 64], strides = [1, 1]} : vector<2x96xf32> to vector<2x64xf32>
    %119 = arith.addf %117, %118 : vector<2x64xf32>
    %120 = arith.negf %119 : vector<2x64xf32>
    %121 = math.exp %120 : vector<2x64xf32>
    %cst_36 = arith.constant 1.000000e+00 : f32
    %122 = vector.broadcast %cst_36 : f32 to vector<2x64xf32>
    %123 = arith.addf %122, %121 : vector<2x64xf32>
    %124 = arith.divf %122, %123 : vector<2x64xf32>
    %125 = vector.extract_strided_slice %124 {offsets = [0, 0], sizes = [2, 32], strides = [1, 1]} : vector<2x64xf32> to vector<2x32xf32>
    %126 = vector.extract_strided_slice %124 {offsets = [0, 32], sizes = [2, 32], strides = [1, 1]} : vector<2x64xf32> to vector<2x32xf32>
    %127 = vector.extract_strided_slice %114 {offsets = [0, 64], sizes = [2, 32], strides = [1, 1]} : vector<2x96xf32> to vector<2x32xf32>
    %128 = vector.extract_strided_slice %116 {offsets = [0, 64], sizes = [2, 32], strides = [1, 1]} : vector<2x96xf32> to vector<2x32xf32>
    %129 = arith.mulf %125, %128 : vector<2x32xf32>
    %130 = arith.addf %127, %129 : vector<2x32xf32>
    %131 = math.tanh %130 : vector<2x32xf32>
    %cst_37 = arith.constant 1.000000e+00 : f32
    %132 = vector.broadcast %cst_37 : f32 to vector<2x32xf32>
    %133 = arith.subf %132, %126 : vector<2x32xf32>
    %134 = arith.mulf %133, %131 : vector<2x32xf32>
    %135 = arith.mulf %126, %111 : vector<2x32xf32>
    %136 = arith.addf %134, %135 : vector<2x32xf32>
    %137 = vector.extract_strided_slice %78 {offsets = [4, 0], sizes = [2, 96], strides = [1, 1]} : vector<16x96xf32> to vector<2x96xf32>
    %138 = vector.extract_strided_slice %78 {offsets = [10, 0], sizes = [2, 96], strides = [1, 1]} : vector<16x96xf32> to vector<2x96xf32>
    %139 = arith.select %85, %137, %138 : vector<2x96xi1>, vector<2x96xf32>
    %cst_38 = arith.constant dense<0.000000e+00> : vector<2x96xf32>
    %140 = tpu.matmul %136, %10, %cst_38 {dimension_numbers = #tpu.dot_dimension_numbers<[1], [0], [0], [1], [0, 0, 1, 1], [], []>} : vector<2x32xf32>, vector<32x96xf32>, vector<2x96xf32> -> vector<2x96xf32>
    %141 = arith.addf %140, %80 : vector<2x96xf32>
    %142 = vector.extract_strided_slice %139 {offsets = [0, 0], sizes = [2, 64], strides = [1, 1]} : vector<2x96xf32> to vector<2x64xf32>
    %143 = vector.extract_strided_slice %141 {offsets = [0, 0], sizes = [2, 64], strides = [1, 1]} : vector<2x96xf32> to vector<2x64xf32>
    %144 = arith.addf %142, %143 : vector<2x64xf32>
    %145 = arith.negf %144 : vector<2x64xf32>
    %146 = math.exp %145 : vector<2x64xf32>
    %cst_39 = arith.constant 1.000000e+00 : f32
    %147 = vector.broadcast %cst_39 : f32 to vector<2x64xf32>
    %148 = arith.addf %147, %146 : vector<2x64xf32>
    %149 = arith.divf %147, %148 : vector<2x64xf32>
    %150 = vector.extract_strided_slice %149 {offsets = [0, 0], sizes = [2, 32], strides = [1, 1]} : vector<2x64xf32> to vector<2x32xf32>
    %151 = vector.extract_strided_slice %149 {offsets = [0, 32], sizes = [2, 32], strides = [1, 1]} : vector<2x64xf32> to vector<2x32xf32>
    %152 = vector.extract_strided_slice %139 {offsets = [0, 64], sizes = [2, 32], strides = [1, 1]} : vector<2x96xf32> to vector<2x32xf32>
    %153 = vector.extract_strided_slice %141 {offsets = [0, 64], sizes = [2, 32], strides = [1, 1]} : vector<2x96xf32> to vector<2x32xf32>
    %154 = arith.mulf %150, %153 : vector<2x32xf32>
    %155 = arith.addf %152, %154 : vector<2x32xf32>
    %156 = math.tanh %155 : vector<2x32xf32>
    %cst_40 = arith.constant 1.000000e+00 : f32
    %157 = vector.broadcast %cst_40 : f32 to vector<2x32xf32>
    %158 = arith.subf %157, %151 : vector<2x32xf32>
    %159 = arith.mulf %158, %156 : vector<2x32xf32>
    %160 = arith.mulf %151, %136 : vector<2x32xf32>
    %161 = arith.addf %159, %160 : vector<2x32xf32>
    %162 = vector.extract_strided_slice %78 {offsets = [6, 0], sizes = [2, 96], strides = [1, 1]} : vector<16x96xf32> to vector<2x96xf32>
    %163 = vector.extract_strided_slice %78 {offsets = [8, 0], sizes = [2, 96], strides = [1, 1]} : vector<16x96xf32> to vector<2x96xf32>
    %164 = arith.select %85, %162, %163 : vector<2x96xi1>, vector<2x96xf32>
    %cst_41 = arith.constant dense<0.000000e+00> : vector<2x96xf32>
    %165 = tpu.matmul %161, %10, %cst_41 {dimension_numbers = #tpu.dot_dimension_numbers<[1], [0], [0], [1], [0, 0, 1, 1], [], []>} : vector<2x32xf32>, vector<32x96xf32>, vector<2x96xf32> -> vector<2x96xf32>
    %166 = arith.addf %165, %80 : vector<2x96xf32>
    %167 = vector.extract_strided_slice %164 {offsets = [0, 0], sizes = [2, 64], strides = [1, 1]} : vector<2x96xf32> to vector<2x64xf32>
    %168 = vector.extract_strided_slice %166 {offsets = [0, 0], sizes = [2, 64], strides = [1, 1]} : vector<2x96xf32> to vector<2x64xf32>
    %169 = arith.addf %167, %168 : vector<2x64xf32>
    %170 = arith.negf %169 : vector<2x64xf32>
    %171 = math.exp %170 : vector<2x64xf32>
    %cst_42 = arith.constant 1.000000e+00 : f32
    %172 = vector.broadcast %cst_42 : f32 to vector<2x64xf32>
    %173 = arith.addf %172, %171 : vector<2x64xf32>
    %174 = arith.divf %172, %173 : vector<2x64xf32>
    %175 = vector.extract_strided_slice %174 {offsets = [0, 0], sizes = [2, 32], strides = [1, 1]} : vector<2x64xf32> to vector<2x32xf32>
    %176 = vector.extract_strided_slice %174 {offsets = [0, 32], sizes = [2, 32], strides = [1, 1]} : vector<2x64xf32> to vector<2x32xf32>
    %177 = vector.extract_strided_slice %164 {offsets = [0, 64], sizes = [2, 32], strides = [1, 1]} : vector<2x96xf32> to vector<2x32xf32>
    %178 = vector.extract_strided_slice %166 {offsets = [0, 64], sizes = [2, 32], strides = [1, 1]} : vector<2x96xf32> to vector<2x32xf32>
    %179 = arith.mulf %175, %178 : vector<2x32xf32>
    %180 = arith.addf %177, %179 : vector<2x32xf32>
    %181 = math.tanh %180 : vector<2x32xf32>
    %cst_43 = arith.constant 1.000000e+00 : f32
    %182 = vector.broadcast %cst_43 : f32 to vector<2x32xf32>
    %183 = arith.subf %182, %176 : vector<2x32xf32>
    %184 = arith.mulf %183, %181 : vector<2x32xf32>
    %185 = arith.mulf %176, %161 : vector<2x32xf32>
    %186 = arith.addf %184, %185 : vector<2x32xf32>
    %187 = vector.extract_strided_slice %78 {offsets = [8, 0], sizes = [2, 96], strides = [1, 1]} : vector<16x96xf32> to vector<2x96xf32>
    %188 = vector.extract_strided_slice %78 {offsets = [6, 0], sizes = [2, 96], strides = [1, 1]} : vector<16x96xf32> to vector<2x96xf32>
    %189 = arith.select %85, %187, %188 : vector<2x96xi1>, vector<2x96xf32>
    %cst_44 = arith.constant dense<0.000000e+00> : vector<2x96xf32>
    %190 = tpu.matmul %186, %10, %cst_44 {dimension_numbers = #tpu.dot_dimension_numbers<[1], [0], [0], [1], [0, 0, 1, 1], [], []>} : vector<2x32xf32>, vector<32x96xf32>, vector<2x96xf32> -> vector<2x96xf32>
    %191 = arith.addf %190, %80 : vector<2x96xf32>
    %192 = vector.extract_strided_slice %189 {offsets = [0, 0], sizes = [2, 64], strides = [1, 1]} : vector<2x96xf32> to vector<2x64xf32>
    %193 = vector.extract_strided_slice %191 {offsets = [0, 0], sizes = [2, 64], strides = [1, 1]} : vector<2x96xf32> to vector<2x64xf32>
    %194 = arith.addf %192, %193 : vector<2x64xf32>
    %195 = arith.negf %194 : vector<2x64xf32>
    %196 = math.exp %195 : vector<2x64xf32>
    %cst_45 = arith.constant 1.000000e+00 : f32
    %197 = vector.broadcast %cst_45 : f32 to vector<2x64xf32>
    %198 = arith.addf %197, %196 : vector<2x64xf32>
    %199 = arith.divf %197, %198 : vector<2x64xf32>
    %200 = vector.extract_strided_slice %199 {offsets = [0, 0], sizes = [2, 32], strides = [1, 1]} : vector<2x64xf32> to vector<2x32xf32>
    %201 = vector.extract_strided_slice %199 {offsets = [0, 32], sizes = [2, 32], strides = [1, 1]} : vector<2x64xf32> to vector<2x32xf32>
    %202 = vector.extract_strided_slice %189 {offsets = [0, 64], sizes = [2, 32], strides = [1, 1]} : vector<2x96xf32> to vector<2x32xf32>
    %203 = vector.extract_strided_slice %191 {offsets = [0, 64], sizes = [2, 32], strides = [1, 1]} : vector<2x96xf32> to vector<2x32xf32>
    %204 = arith.mulf %200, %203 : vector<2x32xf32>
    %205 = arith.addf %202, %204 : vector<2x32xf32>
    %206 = math.tanh %205 : vector<2x32xf32>
    %cst_46 = arith.constant 1.000000e+00 : f32
    %207 = vector.broadcast %cst_46 : f32 to vector<2x32xf32>
    %208 = arith.subf %207, %201 : vector<2x32xf32>
    %209 = arith.mulf %208, %206 : vector<2x32xf32>
    %210 = arith.mulf %201, %186 : vector<2x32xf32>
    %211 = arith.addf %209, %210 : vector<2x32xf32>
    %212 = vector.extract_strided_slice %78 {offsets = [10, 0], sizes = [2, 96], strides = [1, 1]} : vector<16x96xf32> to vector<2x96xf32>
    %213 = vector.extract_strided_slice %78 {offsets = [4, 0], sizes = [2, 96], strides = [1, 1]} : vector<16x96xf32> to vector<2x96xf32>
    %214 = arith.select %85, %212, %213 : vector<2x96xi1>, vector<2x96xf32>
    %cst_47 = arith.constant dense<0.000000e+00> : vector<2x96xf32>
    %215 = tpu.matmul %211, %10, %cst_47 {dimension_numbers = #tpu.dot_dimension_numbers<[1], [0], [0], [1], [0, 0, 1, 1], [], []>} : vector<2x32xf32>, vector<32x96xf32>, vector<2x96xf32> -> vector<2x96xf32>
    %216 = arith.addf %215, %80 : vector<2x96xf32>
    %217 = vector.extract_strided_slice %214 {offsets = [0, 0], sizes = [2, 64], strides = [1, 1]} : vector<2x96xf32> to vector<2x64xf32>
    %218 = vector.extract_strided_slice %216 {offsets = [0, 0], sizes = [2, 64], strides = [1, 1]} : vector<2x96xf32> to vector<2x64xf32>
    %219 = arith.addf %217, %218 : vector<2x64xf32>
    %220 = arith.negf %219 : vector<2x64xf32>
    %221 = math.exp %220 : vector<2x64xf32>
    %cst_48 = arith.constant 1.000000e+00 : f32
    %222 = vector.broadcast %cst_48 : f32 to vector<2x64xf32>
    %223 = arith.addf %222, %221 : vector<2x64xf32>
    %224 = arith.divf %222, %223 : vector<2x64xf32>
    %225 = vector.extract_strided_slice %224 {offsets = [0, 0], sizes = [2, 32], strides = [1, 1]} : vector<2x64xf32> to vector<2x32xf32>
    %226 = vector.extract_strided_slice %224 {offsets = [0, 32], sizes = [2, 32], strides = [1, 1]} : vector<2x64xf32> to vector<2x32xf32>
    %227 = vector.extract_strided_slice %214 {offsets = [0, 64], sizes = [2, 32], strides = [1, 1]} : vector<2x96xf32> to vector<2x32xf32>
    %228 = vector.extract_strided_slice %216 {offsets = [0, 64], sizes = [2, 32], strides = [1, 1]} : vector<2x96xf32> to vector<2x32xf32>
    %229 = arith.mulf %225, %228 : vector<2x32xf32>
    %230 = arith.addf %227, %229 : vector<2x32xf32>
    %231 = math.tanh %230 : vector<2x32xf32>
    %cst_49 = arith.constant 1.000000e+00 : f32
    %232 = vector.broadcast %cst_49 : f32 to vector<2x32xf32>
    %233 = arith.subf %232, %226 : vector<2x32xf32>
    %234 = arith.mulf %233, %231 : vector<2x32xf32>
    %235 = arith.mulf %226, %211 : vector<2x32xf32>
    %236 = arith.addf %234, %235 : vector<2x32xf32>
    %237 = vector.extract_strided_slice %78 {offsets = [12, 0], sizes = [2, 96], strides = [1, 1]} : vector<16x96xf32> to vector<2x96xf32>
    %238 = vector.extract_strided_slice %78 {offsets = [2, 0], sizes = [2, 96], strides = [1, 1]} : vector<16x96xf32> to vector<2x96xf32>
    %239 = arith.select %85, %237, %238 : vector<2x96xi1>, vector<2x96xf32>
    %cst_50 = arith.constant dense<0.000000e+00> : vector<2x96xf32>
    %240 = tpu.matmul %236, %10, %cst_50 {dimension_numbers = #tpu.dot_dimension_numbers<[1], [0], [0], [1], [0, 0, 1, 1], [], []>} : vector<2x32xf32>, vector<32x96xf32>, vector<2x96xf32> -> vector<2x96xf32>
    %241 = arith.addf %240, %80 : vector<2x96xf32>
    %242 = vector.extract_strided_slice %239 {offsets = [0, 0], sizes = [2, 64], strides = [1, 1]} : vector<2x96xf32> to vector<2x64xf32>
    %243 = vector.extract_strided_slice %241 {offsets = [0, 0], sizes = [2, 64], strides = [1, 1]} : vector<2x96xf32> to vector<2x64xf32>
    %244 = arith.addf %242, %243 : vector<2x64xf32>
    %245 = arith.negf %244 : vector<2x64xf32>
    %246 = math.exp %245 : vector<2x64xf32>
    %cst_51 = arith.constant 1.000000e+00 : f32
    %247 = vector.broadcast %cst_51 : f32 to vector<2x64xf32>
    %248 = arith.addf %247, %246 : vector<2x64xf32>
    %249 = arith.divf %247, %248 : vector<2x64xf32>
    %250 = vector.extract_strided_slice %249 {offsets = [0, 0], sizes = [2, 32], strides = [1, 1]} : vector<2x64xf32> to vector<2x32xf32>
    %251 = vector.extract_strided_slice %249 {offsets = [0, 32], sizes = [2, 32], strides = [1, 1]} : vector<2x64xf32> to vector<2x32xf32>
    %252 = vector.extract_strided_slice %239 {offsets = [0, 64], sizes = [2, 32], strides = [1, 1]} : vector<2x96xf32> to vector<2x32xf32>
    %253 = vector.extract_strided_slice %241 {offsets = [0, 64], sizes = [2, 32], strides = [1, 1]} : vector<2x96xf32> to vector<2x32xf32>
    %254 = arith.mulf %250, %253 : vector<2x32xf32>
    %255 = arith.addf %252, %254 : vector<2x32xf32>
    %256 = math.tanh %255 : vector<2x32xf32>
    %cst_52 = arith.constant 1.000000e+00 : f32
    %257 = vector.broadcast %cst_52 : f32 to vector<2x32xf32>
    %258 = arith.subf %257, %251 : vector<2x32xf32>
    %259 = arith.mulf %258, %256 : vector<2x32xf32>
    %260 = arith.mulf %251, %236 : vector<2x32xf32>
    %261 = arith.addf %259, %260 : vector<2x32xf32>
    %262 = vector.extract_strided_slice %78 {offsets = [14, 0], sizes = [2, 96], strides = [1, 1]} : vector<16x96xf32> to vector<2x96xf32>
    %263 = vector.extract_strided_slice %78 {offsets = [0, 0], sizes = [2, 96], strides = [1, 1]} : vector<16x96xf32> to vector<2x96xf32>
    %264 = arith.select %85, %262, %263 : vector<2x96xi1>, vector<2x96xf32>
    %cst_53 = arith.constant dense<0.000000e+00> : vector<2x96xf32>
    %265 = tpu.matmul %261, %10, %cst_53 {dimension_numbers = #tpu.dot_dimension_numbers<[1], [0], [0], [1], [0, 0, 1, 1], [], []>} : vector<2x32xf32>, vector<32x96xf32>, vector<2x96xf32> -> vector<2x96xf32>
    %266 = arith.addf %265, %80 : vector<2x96xf32>
    %267 = vector.extract_strided_slice %264 {offsets = [0, 0], sizes = [2, 64], strides = [1, 1]} : vector<2x96xf32> to vector<2x64xf32>
    %268 = vector.extract_strided_slice %266 {offsets = [0, 0], sizes = [2, 64], strides = [1, 1]} : vector<2x96xf32> to vector<2x64xf32>
    %269 = arith.addf %267, %268 : vector<2x64xf32>
    %270 = arith.negf %269 : vector<2x64xf32>
    %271 = math.exp %270 : vector<2x64xf32>
    %cst_54 = arith.constant 1.000000e+00 : f32
    %272 = vector.broadcast %cst_54 : f32 to vector<2x64xf32>
    %273 = arith.addf %272, %271 : vector<2x64xf32>
    %274 = arith.divf %272, %273 : vector<2x64xf32>
    %275 = vector.extract_strided_slice %274 {offsets = [0, 0], sizes = [2, 32], strides = [1, 1]} : vector<2x64xf32> to vector<2x32xf32>
    %276 = vector.extract_strided_slice %274 {offsets = [0, 32], sizes = [2, 32], strides = [1, 1]} : vector<2x64xf32> to vector<2x32xf32>
    %277 = vector.extract_strided_slice %264 {offsets = [0, 64], sizes = [2, 32], strides = [1, 1]} : vector<2x96xf32> to vector<2x32xf32>
    %278 = vector.extract_strided_slice %266 {offsets = [0, 64], sizes = [2, 32], strides = [1, 1]} : vector<2x96xf32> to vector<2x32xf32>
    %279 = arith.mulf %275, %278 : vector<2x32xf32>
    %280 = arith.addf %277, %279 : vector<2x32xf32>
    %281 = math.tanh %280 : vector<2x32xf32>
    %cst_55 = arith.constant 1.000000e+00 : f32
    %282 = vector.broadcast %cst_55 : f32 to vector<2x32xf32>
    %283 = arith.subf %282, %276 : vector<2x32xf32>
    %284 = arith.mulf %283, %281 : vector<2x32xf32>
    %285 = arith.mulf %276, %261 : vector<2x32xf32>
    %286 = arith.addf %284, %285 : vector<2x32xf32>
    %287 = vector.extract_strided_slice %111 {offsets = [0, 0], sizes = [2, 16], strides = [1, 1]} : vector<2x32xf32> to vector<2x16xf32>
    %288 = vector.extract_strided_slice %286 {offsets = [0, 16], sizes = [2, 16], strides = [1, 1]} : vector<2x32xf32> to vector<2x16xf32>
    %289 = tpu.concatenate %287, %288 in 1 : vector<2x16xf32>, vector<2x16xf32> -> vector<2x32xf32>
    %290 = vector.extract_strided_slice %136 {offsets = [0, 0], sizes = [2, 16], strides = [1, 1]} : vector<2x32xf32> to vector<2x16xf32>
    %291 = vector.extract_strided_slice %261 {offsets = [0, 16], sizes = [2, 16], strides = [1, 1]} : vector<2x32xf32> to vector<2x16xf32>
    %292 = tpu.concatenate %290, %291 in 1 : vector<2x16xf32>, vector<2x16xf32> -> vector<2x32xf32>
    %293 = vector.extract_strided_slice %161 {offsets = [0, 0], sizes = [2, 16], strides = [1, 1]} : vector<2x32xf32> to vector<2x16xf32>
    %294 = vector.extract_strided_slice %236 {offsets = [0, 16], sizes = [2, 16], strides = [1, 1]} : vector<2x32xf32> to vector<2x16xf32>
    %295 = tpu.concatenate %293, %294 in 1 : vector<2x16xf32>, vector<2x16xf32> -> vector<2x32xf32>
    %296 = vector.extract_strided_slice %186 {offsets = [0, 0], sizes = [2, 16], strides = [1, 1]} : vector<2x32xf32> to vector<2x16xf32>
    %297 = vector.extract_strided_slice %211 {offsets = [0, 16], sizes = [2, 16], strides = [1, 1]} : vector<2x32xf32> to vector<2x16xf32>
    %298 = tpu.concatenate %296, %297 in 1 : vector<2x16xf32>, vector<2x16xf32> -> vector<2x32xf32>
    %299 = vector.extract_strided_slice %211 {offsets = [0, 0], sizes = [2, 16], strides = [1, 1]} : vector<2x32xf32> to vector<2x16xf32>
    %300 = vector.extract_strided_slice %186 {offsets = [0, 16], sizes = [2, 16], strides = [1, 1]} : vector<2x32xf32> to vector<2x16xf32>
    %301 = tpu.concatenate %299, %300 in 1 : vector<2x16xf32>, vector<2x16xf32> -> vector<2x32xf32>
    %302 = vector.extract_strided_slice %236 {offsets = [0, 0], sizes = [2, 16], strides = [1, 1]} : vector<2x32xf32> to vector<2x16xf32>
    %303 = vector.extract_strided_slice %161 {offsets = [0, 16], sizes = [2, 16], strides = [1, 1]} : vector<2x32xf32> to vector<2x16xf32>
    %304 = tpu.concatenate %302, %303 in 1 : vector<2x16xf32>, vector<2x16xf32> -> vector<2x32xf32>
    %305 = vector.extract_strided_slice %261 {offsets = [0, 0], sizes = [2, 16], strides = [1, 1]} : vector<2x32xf32> to vector<2x16xf32>
    %306 = vector.extract_strided_slice %136 {offsets = [0, 16], sizes = [2, 16], strides = [1, 1]} : vector<2x32xf32> to vector<2x16xf32>
    %307 = tpu.concatenate %305, %306 in 1 : vector<2x16xf32>, vector<2x16xf32> -> vector<2x32xf32>
    %308 = vector.extract_strided_slice %286 {offsets = [0, 0], sizes = [2, 16], strides = [1, 1]} : vector<2x32xf32> to vector<2x16xf32>
    %309 = vector.extract_strided_slice %111 {offsets = [0, 16], sizes = [2, 16], strides = [1, 1]} : vector<2x32xf32> to vector<2x16xf32>
    %310 = tpu.concatenate %308, %309 in 1 : vector<2x16xf32>, vector<2x16xf32> -> vector<2x32xf32>
    %311 = tpu.concatenate %289, %292, %295, %298, %301, %304, %307, %310 in 0 : vector<2x32xf32>, vector<2x32xf32>, vector<2x32xf32>, vector<2x32xf32>, vector<2x32xf32>, vector<2x32xf32>, vector<2x32xf32>, vector<2x32xf32> -> vector<16x32xf32>
    %c77 = arith.constant 77 : index
    %c0_56 = arith.constant 0 : index
    %312 = vector.load %arg1[%c77, %c0_56] : memref<360x128xf32, #tpu.memory_space<vmem>>, vector<1x32xf32>
    %c78 = arith.constant 78 : index
    %c0_57 = arith.constant 0 : index
    %313 = vector.load %arg1[%c78, %c0_57] : memref<360x128xf32, #tpu.memory_space<vmem>>, vector<1x32xf32>
    %c136 = arith.constant 136 : index
    %c0_58 = arith.constant 0 : index
    %314 = vector.load %arg1[%c136, %c0_58] : memref<360x128xf32, #tpu.memory_space<vmem>>, vector<32x96xf32>
    %c79 = arith.constant 79 : index
    %c0_59 = arith.constant 0 : index
    %315 = vector.load %arg1[%c79, %c0_59] : memref<360x128xf32, #tpu.memory_space<vmem>>, vector<1x96xf32>
    %c168 = arith.constant 168 : index
    %c0_60 = arith.constant 0 : index
    %316 = vector.load %arg1[%c168, %c0_60] : memref<360x128xf32, #tpu.memory_space<vmem>>, vector<32x96xf32>
    %c80 = arith.constant 80 : index
    %c0_61 = arith.constant 0 : index
    %317 = vector.load %arg1[%c80, %c0_61] : memref<360x128xf32, #tpu.memory_space<vmem>>, vector<1x96xf32>
    %cst_62 = arith.constant dense<0.000000e+00> : vector<16xf32>
    %318 = vector.multi_reduction <add>, %311, %cst_62 [1] : vector<16x32xf32> to vector<16xf32>
    %319 = vector.shape_cast %318 : vector<16xf32> to vector<16x1xf32>
    %cst_63 = arith.constant 3.200000e+01 : f32
    %320 = vector.broadcast %cst_63 : f32 to vector<16x1xf32>
    %321 = arith.divf %319, %320 : vector<16x1xf32>
    %322 = vector.broadcast %321 : vector<16x1xf32> to vector<16x32xf32>
    %323 = arith.subf %311, %322 : vector<16x32xf32>
    %324 = vector.broadcast %321 : vector<16x1xf32> to vector<16x32xf32>
    %325 = arith.subf %311, %324 : vector<16x32xf32>
    %326 = arith.mulf %323, %325 : vector<16x32xf32>
    %cst_64 = arith.constant dense<0.000000e+00> : vector<16xf32>
    %327 = vector.multi_reduction <add>, %326, %cst_64 [1] : vector<16x32xf32> to vector<16xf32>
    %328 = vector.shape_cast %327 : vector<16xf32> to vector<16x1xf32>
    %cst_65 = arith.constant 3.200000e+01 : f32
    %329 = vector.broadcast %cst_65 : f32 to vector<16x1xf32>
    %330 = arith.divf %328, %329 : vector<16x1xf32>
    %331 = vector.broadcast %321 : vector<16x1xf32> to vector<16x32xf32>
    %332 = arith.subf %311, %331 : vector<16x32xf32>
    %cst_66 = arith.constant 9.99999974E-6 : f32
    %333 = vector.broadcast %cst_66 : f32 to vector<16x1xf32>
    %334 = arith.addf %330, %333 : vector<16x1xf32>
    %335 = math.rsqrt %334 : vector<16x1xf32>
    %336 = vector.broadcast %335 : vector<16x1xf32> to vector<16x32xf32>
    %337 = arith.mulf %332, %336 : vector<16x32xf32>
    %338 = vector.broadcast %312 : vector<1x32xf32> to vector<16x32xf32>
    %339 = arith.mulf %337, %338 : vector<16x32xf32>
    %340 = vector.broadcast %313 : vector<1x32xf32> to vector<16x32xf32>
    %341 = arith.addf %339, %340 : vector<16x32xf32>
    %cst_67 = arith.constant 5.000000e-01 : f32
    %342 = vector.broadcast %cst_67 : f32 to vector<16x32xf32>
    %343 = arith.mulf %342, %341 : vector<16x32xf32>
    %cst_68 = arith.constant 0.707106769 : f32
    %344 = vector.broadcast %cst_68 : f32 to vector<16x32xf32>
    %345 = arith.mulf %341, %344 : vector<16x32xf32>
    %346 = math.absf %345 : vector<16x32xf32>
    %cst_69 = arith.constant 0.327591091 : f32
    %347 = vector.broadcast %cst_69 : f32 to vector<16x32xf32>
    %348 = arith.mulf %347, %346 : vector<16x32xf32>
    %cst_70 = arith.constant 1.000000e+00 : f32
    %349 = vector.broadcast %cst_70 : f32 to vector<16x32xf32>
    %350 = arith.addf %349, %348 : vector<16x32xf32>
    %cst_71 = arith.constant 1.000000e+00 : f32
    %351 = vector.broadcast %cst_71 : f32 to vector<16x32xf32>
    %352 = arith.divf %351, %350 : vector<16x32xf32>
    %cst_72 = arith.constant 1.06140542 : f32
    %353 = vector.broadcast %cst_72 : f32 to vector<16x32xf32>
    %354 = arith.mulf %353, %352 : vector<16x32xf32>
    %cst_73 = arith.constant 1.45315206 : f32
    %355 = vector.broadcast %cst_73 : f32 to vector<16x32xf32>
    %356 = arith.subf %354, %355 : vector<16x32xf32>
    %357 = arith.mulf %356, %352 : vector<16x32xf32>
    %cst_74 = arith.constant 1.42141378 : f32
    %358 = vector.broadcast %cst_74 : f32 to vector<16x32xf32>
    %359 = arith.addf %357, %358 : vector<16x32xf32>
    %360 = arith.mulf %359, %352 : vector<16x32xf32>
    %cst_75 = arith.constant 0.284496725 : f32
    %361 = vector.broadcast %cst_75 : f32 to vector<16x32xf32>
    %362 = arith.subf %360, %361 : vector<16x32xf32>
    %363 = arith.mulf %362, %352 : vector<16x32xf32>
    %cst_76 = arith.constant 0.254829586 : f32
    %364 = vector.broadcast %cst_76 : f32 to vector<16x32xf32>
    %365 = arith.addf %363, %364 : vector<16x32xf32>
    %366 = arith.mulf %365, %352 : vector<16x32xf32>
    %367 = arith.mulf %346, %346 : vector<16x32xf32>
    %cst_77 = arith.constant 0.000000e+00 : f32
    %368 = vector.broadcast %cst_77 : f32 to vector<16x32xf32>
    %369 = arith.subf %368, %367 : vector<16x32xf32>
    %370 = math.exp %369 : vector<16x32xf32>
    %371 = arith.mulf %366, %370 : vector<16x32xf32>
    %cst_78 = arith.constant 1.000000e+00 : f32
    %372 = vector.broadcast %cst_78 : f32 to vector<16x32xf32>
    %373 = arith.subf %372, %371 : vector<16x32xf32>
    %cst_79 = arith.constant 0.000000e+00 : f32
    %374 = vector.broadcast %cst_79 : f32 to vector<16x32xf32>
    %375 = arith.cmpf olt, %345, %374 : vector<16x32xf32>
    %cst_80 = arith.constant 0.000000e+00 : f32
    %376 = vector.broadcast %cst_80 : f32 to vector<16x32xf32>
    %377 = arith.subf %376, %373 : vector<16x32xf32>
    %378 = arith.select %375, %377, %373 : vector<16x32xi1>, vector<16x32xf32>
    %cst_81 = arith.constant 1.000000e+00 : f32
    %379 = vector.broadcast %cst_81 : f32 to vector<16x32xf32>
    %380 = arith.addf %379, %378 : vector<16x32xf32>
    %381 = arith.mulf %343, %380 : vector<16x32xf32>
    %cst_82 = arith.constant dense<0.000000e+00> : vector<16x96xf32>
    %382 = tpu.matmul %381, %314, %cst_82 {dimension_numbers = #tpu.dot_dimension_numbers<[1], [0], [0], [1], [0, 0, 1, 1], [], []>} : vector<16x32xf32>, vector<32x96xf32>, vector<16x96xf32> -> vector<16x96xf32>
    %383 = vector.broadcast %315 : vector<1x96xf32> to vector<16x96xf32>
    %384 = arith.addf %382, %383 : vector<16x96xf32>
    %385 = vector.shape_cast %317 : vector<1x96xf32> to vector<1x96xf32>
    %386 = vector.broadcast %385 : vector<1x96xf32> to vector<2x96xf32>
    %387 = tpu.iota {dimensions = array<i32: 1>} : vector<2x96xi32>
    %c31_i32_83 = arith.constant 31 : i32
    %388 = vector.broadcast %c31_i32_83 : i32 to vector<2x96xi32>
    %389 = arith.andi %387, %388 : vector<2x96xi32>
    %c16_i32_84 = arith.constant 16 : i32
    %390 = vector.broadcast %c16_i32_84 : i32 to vector<2x96xi32>
    %391 = arith.cmpi slt, %389, %390 : vector<2x96xi32>
    %cst_85 = arith.constant 0.000000e+00 : f32
    %392 = vector.broadcast %cst_85 : f32 to vector<2x32xf32>
    %393 = vector.extract_strided_slice %384 {offsets = [0, 0], sizes = [2, 96], strides = [1, 1]} : vector<16x96xf32> to vector<2x96xf32>
    %394 = vector.extract_strided_slice %384 {offsets = [14, 0], sizes = [2, 96], strides = [1, 1]} : vector<16x96xf32> to vector<2x96xf32>
    %395 = arith.select %391, %393, %394 : vector<2x96xi1>, vector<2x96xf32>
    %cst_86 = arith.constant dense<0.000000e+00> : vector<2x96xf32>
    %396 = tpu.matmul %392, %316, %cst_86 {dimension_numbers = #tpu.dot_dimension_numbers<[1], [0], [0], [1], [0, 0, 1, 1], [], []>} : vector<2x32xf32>, vector<32x96xf32>, vector<2x96xf32> -> vector<2x96xf32>
    %397 = arith.addf %396, %386 : vector<2x96xf32>
    %398 = vector.extract_strided_slice %395 {offsets = [0, 0], sizes = [2, 64], strides = [1, 1]} : vector<2x96xf32> to vector<2x64xf32>
    %399 = vector.extract_strided_slice %397 {offsets = [0, 0], sizes = [2, 64], strides = [1, 1]} : vector<2x96xf32> to vector<2x64xf32>
    %400 = arith.addf %398, %399 : vector<2x64xf32>
    %401 = arith.negf %400 : vector<2x64xf32>
    %402 = math.exp %401 : vector<2x64xf32>
    %cst_87 = arith.constant 1.000000e+00 : f32
    %403 = vector.broadcast %cst_87 : f32 to vector<2x64xf32>
    %404 = arith.addf %403, %402 : vector<2x64xf32>
    %405 = arith.divf %403, %404 : vector<2x64xf32>
    %406 = vector.extract_strided_slice %405 {offsets = [0, 0], sizes = [2, 32], strides = [1, 1]} : vector<2x64xf32> to vector<2x32xf32>
    %407 = vector.extract_strided_slice %405 {offsets = [0, 32], sizes = [2, 32], strides = [1, 1]} : vector<2x64xf32> to vector<2x32xf32>
    %408 = vector.extract_strided_slice %395 {offsets = [0, 64], sizes = [2, 32], strides = [1, 1]} : vector<2x96xf32> to vector<2x32xf32>
    %409 = vector.extract_strided_slice %397 {offsets = [0, 64], sizes = [2, 32], strides = [1, 1]} : vector<2x96xf32> to vector<2x32xf32>
    %410 = arith.mulf %406, %409 : vector<2x32xf32>
    %411 = arith.addf %408, %410 : vector<2x32xf32>
    %412 = math.tanh %411 : vector<2x32xf32>
    %cst_88 = arith.constant 1.000000e+00 : f32
    %413 = vector.broadcast %cst_88 : f32 to vector<2x32xf32>
    %414 = arith.subf %413, %407 : vector<2x32xf32>
    %415 = arith.mulf %414, %412 : vector<2x32xf32>
    %416 = arith.mulf %407, %392 : vector<2x32xf32>
    %417 = arith.addf %415, %416 : vector<2x32xf32>
    %418 = vector.extract_strided_slice %384 {offsets = [2, 0], sizes = [2, 96], strides = [1, 1]} : vector<16x96xf32> to vector<2x96xf32>
    %419 = vector.extract_strided_slice %384 {offsets = [12, 0], sizes = [2, 96], strides = [1, 1]} : vector<16x96xf32> to vector<2x96xf32>
    %420 = arith.select %391, %418, %419 : vector<2x96xi1>, vector<2x96xf32>
    %cst_89 = arith.constant dense<0.000000e+00> : vector<2x96xf32>
    %421 = tpu.matmul %417, %316, %cst_89 {dimension_numbers = #tpu.dot_dimension_numbers<[1], [0], [0], [1], [0, 0, 1, 1], [], []>} : vector<2x32xf32>, vector<32x96xf32>, vector<2x96xf32> -> vector<2x96xf32>
    %422 = arith.addf %421, %386 : vector<2x96xf32>
    %423 = vector.extract_strided_slice %420 {offsets = [0, 0], sizes = [2, 64], strides = [1, 1]} : vector<2x96xf32> to vector<2x64xf32>
    %424 = vector.extract_strided_slice %422 {offsets = [0, 0], sizes = [2, 64], strides = [1, 1]} : vector<2x96xf32> to vector<2x64xf32>
    %425 = arith.addf %423, %424 : vector<2x64xf32>
    %426 = arith.negf %425 : vector<2x64xf32>
    %427 = math.exp %426 : vector<2x64xf32>
    %cst_90 = arith.constant 1.000000e+00 : f32
    %428 = vector.broadcast %cst_90 : f32 to vector<2x64xf32>
    %429 = arith.addf %428, %427 : vector<2x64xf32>
    %430 = arith.divf %428, %429 : vector<2x64xf32>
    %431 = vector.extract_strided_slice %430 {offsets = [0, 0], sizes = [2, 32], strides = [1, 1]} : vector<2x64xf32> to vector<2x32xf32>
    %432 = vector.extract_strided_slice %430 {offsets = [0, 32], sizes = [2, 32], strides = [1, 1]} : vector<2x64xf32> to vector<2x32xf32>
    %433 = vector.extract_strided_slice %420 {offsets = [0, 64], sizes = [2, 32], strides = [1, 1]} : vector<2x96xf32> to vector<2x32xf32>
    %434 = vector.extract_strided_slice %422 {offsets = [0, 64], sizes = [2, 32], strides = [1, 1]} : vector<2x96xf32> to vector<2x32xf32>
    %435 = arith.mulf %431, %434 : vector<2x32xf32>
    %436 = arith.addf %433, %435 : vector<2x32xf32>
    %437 = math.tanh %436 : vector<2x32xf32>
    %cst_91 = arith.constant 1.000000e+00 : f32
    %438 = vector.broadcast %cst_91 : f32 to vector<2x32xf32>
    %439 = arith.subf %438, %432 : vector<2x32xf32>
    %440 = arith.mulf %439, %437 : vector<2x32xf32>
    %441 = arith.mulf %432, %417 : vector<2x32xf32>
    %442 = arith.addf %440, %441 : vector<2x32xf32>
    %443 = vector.extract_strided_slice %384 {offsets = [4, 0], sizes = [2, 96], strides = [1, 1]} : vector<16x96xf32> to vector<2x96xf32>
    %444 = vector.extract_strided_slice %384 {offsets = [10, 0], sizes = [2, 96], strides = [1, 1]} : vector<16x96xf32> to vector<2x96xf32>
    %445 = arith.select %391, %443, %444 : vector<2x96xi1>, vector<2x96xf32>
    %cst_92 = arith.constant dense<0.000000e+00> : vector<2x96xf32>
    %446 = tpu.matmul %442, %316, %cst_92 {dimension_numbers = #tpu.dot_dimension_numbers<[1], [0], [0], [1], [0, 0, 1, 1], [], []>} : vector<2x32xf32>, vector<32x96xf32>, vector<2x96xf32> -> vector<2x96xf32>
    %447 = arith.addf %446, %386 : vector<2x96xf32>
    %448 = vector.extract_strided_slice %445 {offsets = [0, 0], sizes = [2, 64], strides = [1, 1]} : vector<2x96xf32> to vector<2x64xf32>
    %449 = vector.extract_strided_slice %447 {offsets = [0, 0], sizes = [2, 64], strides = [1, 1]} : vector<2x96xf32> to vector<2x64xf32>
    %450 = arith.addf %448, %449 : vector<2x64xf32>
    %451 = arith.negf %450 : vector<2x64xf32>
    %452 = math.exp %451 : vector<2x64xf32>
    %cst_93 = arith.constant 1.000000e+00 : f32
    %453 = vector.broadcast %cst_93 : f32 to vector<2x64xf32>
    %454 = arith.addf %453, %452 : vector<2x64xf32>
    %455 = arith.divf %453, %454 : vector<2x64xf32>
    %456 = vector.extract_strided_slice %455 {offsets = [0, 0], sizes = [2, 32], strides = [1, 1]} : vector<2x64xf32> to vector<2x32xf32>
    %457 = vector.extract_strided_slice %455 {offsets = [0, 32], sizes = [2, 32], strides = [1, 1]} : vector<2x64xf32> to vector<2x32xf32>
    %458 = vector.extract_strided_slice %445 {offsets = [0, 64], sizes = [2, 32], strides = [1, 1]} : vector<2x96xf32> to vector<2x32xf32>
    %459 = vector.extract_strided_slice %447 {offsets = [0, 64], sizes = [2, 32], strides = [1, 1]} : vector<2x96xf32> to vector<2x32xf32>
    %460 = arith.mulf %456, %459 : vector<2x32xf32>
    %461 = arith.addf %458, %460 : vector<2x32xf32>
    %462 = math.tanh %461 : vector<2x32xf32>
    %cst_94 = arith.constant 1.000000e+00 : f32
    %463 = vector.broadcast %cst_94 : f32 to vector<2x32xf32>
    %464 = arith.subf %463, %457 : vector<2x32xf32>
    %465 = arith.mulf %464, %462 : vector<2x32xf32>
    %466 = arith.mulf %457, %442 : vector<2x32xf32>
    %467 = arith.addf %465, %466 : vector<2x32xf32>
    %468 = vector.extract_strided_slice %384 {offsets = [6, 0], sizes = [2, 96], strides = [1, 1]} : vector<16x96xf32> to vector<2x96xf32>
    %469 = vector.extract_strided_slice %384 {offsets = [8, 0], sizes = [2, 96], strides = [1, 1]} : vector<16x96xf32> to vector<2x96xf32>
    %470 = arith.select %391, %468, %469 : vector<2x96xi1>, vector<2x96xf32>
    %cst_95 = arith.constant dense<0.000000e+00> : vector<2x96xf32>
    %471 = tpu.matmul %467, %316, %cst_95 {dimension_numbers = #tpu.dot_dimension_numbers<[1], [0], [0], [1], [0, 0, 1, 1], [], []>} : vector<2x32xf32>, vector<32x96xf32>, vector<2x96xf32> -> vector<2x96xf32>
    %472 = arith.addf %471, %386 : vector<2x96xf32>
    %473 = vector.extract_strided_slice %470 {offsets = [0, 0], sizes = [2, 64], strides = [1, 1]} : vector<2x96xf32> to vector<2x64xf32>
    %474 = vector.extract_strided_slice %472 {offsets = [0, 0], sizes = [2, 64], strides = [1, 1]} : vector<2x96xf32> to vector<2x64xf32>
    %475 = arith.addf %473, %474 : vector<2x64xf32>
    %476 = arith.negf %475 : vector<2x64xf32>
    %477 = math.exp %476 : vector<2x64xf32>
    %cst_96 = arith.constant 1.000000e+00 : f32
    %478 = vector.broadcast %cst_96 : f32 to vector<2x64xf32>
    %479 = arith.addf %478, %477 : vector<2x64xf32>
    %480 = arith.divf %478, %479 : vector<2x64xf32>
    %481 = vector.extract_strided_slice %480 {offsets = [0, 0], sizes = [2, 32], strides = [1, 1]} : vector<2x64xf32> to vector<2x32xf32>
    %482 = vector.extract_strided_slice %480 {offsets = [0, 32], sizes = [2, 32], strides = [1, 1]} : vector<2x64xf32> to vector<2x32xf32>
    %483 = vector.extract_strided_slice %470 {offsets = [0, 64], sizes = [2, 32], strides = [1, 1]} : vector<2x96xf32> to vector<2x32xf32>
    %484 = vector.extract_strided_slice %472 {offsets = [0, 64], sizes = [2, 32], strides = [1, 1]} : vector<2x96xf32> to vector<2x32xf32>
    %485 = arith.mulf %481, %484 : vector<2x32xf32>
    %486 = arith.addf %483, %485 : vector<2x32xf32>
    %487 = math.tanh %486 : vector<2x32xf32>
    %cst_97 = arith.constant 1.000000e+00 : f32
    %488 = vector.broadcast %cst_97 : f32 to vector<2x32xf32>
    %489 = arith.subf %488, %482 : vector<2x32xf32>
    %490 = arith.mulf %489, %487 : vector<2x32xf32>
    %491 = arith.mulf %482, %467 : vector<2x32xf32>
    %492 = arith.addf %490, %491 : vector<2x32xf32>
    %493 = vector.extract_strided_slice %384 {offsets = [8, 0], sizes = [2, 96], strides = [1, 1]} : vector<16x96xf32> to vector<2x96xf32>
    %494 = vector.extract_strided_slice %384 {offsets = [6, 0], sizes = [2, 96], strides = [1, 1]} : vector<16x96xf32> to vector<2x96xf32>
    %495 = arith.select %391, %493, %494 : vector<2x96xi1>, vector<2x96xf32>
    %cst_98 = arith.constant dense<0.000000e+00> : vector<2x96xf32>
    %496 = tpu.matmul %492, %316, %cst_98 {dimension_numbers = #tpu.dot_dimension_numbers<[1], [0], [0], [1], [0, 0, 1, 1], [], []>} : vector<2x32xf32>, vector<32x96xf32>, vector<2x96xf32> -> vector<2x96xf32>
    %497 = arith.addf %496, %386 : vector<2x96xf32>
    %498 = vector.extract_strided_slice %495 {offsets = [0, 0], sizes = [2, 64], strides = [1, 1]} : vector<2x96xf32> to vector<2x64xf32>
    %499 = vector.extract_strided_slice %497 {offsets = [0, 0], sizes = [2, 64], strides = [1, 1]} : vector<2x96xf32> to vector<2x64xf32>
    %500 = arith.addf %498, %499 : vector<2x64xf32>
    %501 = arith.negf %500 : vector<2x64xf32>
    %502 = math.exp %501 : vector<2x64xf32>
    %cst_99 = arith.constant 1.000000e+00 : f32
    %503 = vector.broadcast %cst_99 : f32 to vector<2x64xf32>
    %504 = arith.addf %503, %502 : vector<2x64xf32>
    %505 = arith.divf %503, %504 : vector<2x64xf32>
    %506 = vector.extract_strided_slice %505 {offsets = [0, 0], sizes = [2, 32], strides = [1, 1]} : vector<2x64xf32> to vector<2x32xf32>
    %507 = vector.extract_strided_slice %505 {offsets = [0, 32], sizes = [2, 32], strides = [1, 1]} : vector<2x64xf32> to vector<2x32xf32>
    %508 = vector.extract_strided_slice %495 {offsets = [0, 64], sizes = [2, 32], strides = [1, 1]} : vector<2x96xf32> to vector<2x32xf32>
    %509 = vector.extract_strided_slice %497 {offsets = [0, 64], sizes = [2, 32], strides = [1, 1]} : vector<2x96xf32> to vector<2x32xf32>
    %510 = arith.mulf %506, %509 : vector<2x32xf32>
    %511 = arith.addf %508, %510 : vector<2x32xf32>
    %512 = math.tanh %511 : vector<2x32xf32>
    %cst_100 = arith.constant 1.000000e+00 : f32
    %513 = vector.broadcast %cst_100 : f32 to vector<2x32xf32>
    %514 = arith.subf %513, %507 : vector<2x32xf32>
    %515 = arith.mulf %514, %512 : vector<2x32xf32>
    %516 = arith.mulf %507, %492 : vector<2x32xf32>
    %517 = arith.addf %515, %516 : vector<2x32xf32>
    %518 = vector.extract_strided_slice %384 {offsets = [10, 0], sizes = [2, 96], strides = [1, 1]} : vector<16x96xf32> to vector<2x96xf32>
    %519 = vector.extract_strided_slice %384 {offsets = [4, 0], sizes = [2, 96], strides = [1, 1]} : vector<16x96xf32> to vector<2x96xf32>
    %520 = arith.select %391, %518, %519 : vector<2x96xi1>, vector<2x96xf32>
    %cst_101 = arith.constant dense<0.000000e+00> : vector<2x96xf32>
    %521 = tpu.matmul %517, %316, %cst_101 {dimension_numbers = #tpu.dot_dimension_numbers<[1], [0], [0], [1], [0, 0, 1, 1], [], []>} : vector<2x32xf32>, vector<32x96xf32>, vector<2x96xf32> -> vector<2x96xf32>
    %522 = arith.addf %521, %386 : vector<2x96xf32>
    %523 = vector.extract_strided_slice %520 {offsets = [0, 0], sizes = [2, 64], strides = [1, 1]} : vector<2x96xf32> to vector<2x64xf32>
    %524 = vector.extract_strided_slice %522 {offsets = [0, 0], sizes = [2, 64], strides = [1, 1]} : vector<2x96xf32> to vector<2x64xf32>
    %525 = arith.addf %523, %524 : vector<2x64xf32>
    %526 = arith.negf %525 : vector<2x64xf32>
    %527 = math.exp %526 : vector<2x64xf32>
    %cst_102 = arith.constant 1.000000e+00 : f32
    %528 = vector.broadcast %cst_102 : f32 to vector<2x64xf32>
    %529 = arith.addf %528, %527 : vector<2x64xf32>
    %530 = arith.divf %528, %529 : vector<2x64xf32>
    %531 = vector.extract_strided_slice %530 {offsets = [0, 0], sizes = [2, 32], strides = [1, 1]} : vector<2x64xf32> to vector<2x32xf32>
    %532 = vector.extract_strided_slice %530 {offsets = [0, 32], sizes = [2, 32], strides = [1, 1]} : vector<2x64xf32> to vector<2x32xf32>
    %533 = vector.extract_strided_slice %520 {offsets = [0, 64], sizes = [2, 32], strides = [1, 1]} : vector<2x96xf32> to vector<2x32xf32>
    %534 = vector.extract_strided_slice %522 {offsets = [0, 64], sizes = [2, 32], strides = [1, 1]} : vector<2x96xf32> to vector<2x32xf32>
    %535 = arith.mulf %531, %534 : vector<2x32xf32>
    %536 = arith.addf %533, %535 : vector<2x32xf32>
    %537 = math.tanh %536 : vector<2x32xf32>
    %cst_103 = arith.constant 1.000000e+00 : f32
    %538 = vector.broadcast %cst_103 : f32 to vector<2x32xf32>
    %539 = arith.subf %538, %532 : vector<2x32xf32>
    %540 = arith.mulf %539, %537 : vector<2x32xf32>
    %541 = arith.mulf %532, %517 : vector<2x32xf32>
    %542 = arith.addf %540, %541 : vector<2x32xf32>
    %543 = vector.extract_strided_slice %384 {offsets = [12, 0], sizes = [2, 96], strides = [1, 1]} : vector<16x96xf32> to vector<2x96xf32>
    %544 = vector.extract_strided_slice %384 {offsets = [2, 0], sizes = [2, 96], strides = [1, 1]} : vector<16x96xf32> to vector<2x96xf32>
    %545 = arith.select %391, %543, %544 : vector<2x96xi1>, vector<2x96xf32>
    %cst_104 = arith.constant dense<0.000000e+00> : vector<2x96xf32>
    %546 = tpu.matmul %542, %316, %cst_104 {dimension_numbers = #tpu.dot_dimension_numbers<[1], [0], [0], [1], [0, 0, 1, 1], [], []>} : vector<2x32xf32>, vector<32x96xf32>, vector<2x96xf32> -> vector<2x96xf32>
    %547 = arith.addf %546, %386 : vector<2x96xf32>
    %548 = vector.extract_strided_slice %545 {offsets = [0, 0], sizes = [2, 64], strides = [1, 1]} : vector<2x96xf32> to vector<2x64xf32>
    %549 = vector.extract_strided_slice %547 {offsets = [0, 0], sizes = [2, 64], strides = [1, 1]} : vector<2x96xf32> to vector<2x64xf32>
    %550 = arith.addf %548, %549 : vector<2x64xf32>
    %551 = arith.negf %550 : vector<2x64xf32>
    %552 = math.exp %551 : vector<2x64xf32>
    %cst_105 = arith.constant 1.000000e+00 : f32
    %553 = vector.broadcast %cst_105 : f32 to vector<2x64xf32>
    %554 = arith.addf %553, %552 : vector<2x64xf32>
    %555 = arith.divf %553, %554 : vector<2x64xf32>
    %556 = vector.extract_strided_slice %555 {offsets = [0, 0], sizes = [2, 32], strides = [1, 1]} : vector<2x64xf32> to vector<2x32xf32>
    %557 = vector.extract_strided_slice %555 {offsets = [0, 32], sizes = [2, 32], strides = [1, 1]} : vector<2x64xf32> to vector<2x32xf32>
    %558 = vector.extract_strided_slice %545 {offsets = [0, 64], sizes = [2, 32], strides = [1, 1]} : vector<2x96xf32> to vector<2x32xf32>
    %559 = vector.extract_strided_slice %547 {offsets = [0, 64], sizes = [2, 32], strides = [1, 1]} : vector<2x96xf32> to vector<2x32xf32>
    %560 = arith.mulf %556, %559 : vector<2x32xf32>
    %561 = arith.addf %558, %560 : vector<2x32xf32>
    %562 = math.tanh %561 : vector<2x32xf32>
    %cst_106 = arith.constant 1.000000e+00 : f32
    %563 = vector.broadcast %cst_106 : f32 to vector<2x32xf32>
    %564 = arith.subf %563, %557 : vector<2x32xf32>
    %565 = arith.mulf %564, %562 : vector<2x32xf32>
    %566 = arith.mulf %557, %542 : vector<2x32xf32>
    %567 = arith.addf %565, %566 : vector<2x32xf32>
    %568 = vector.extract_strided_slice %384 {offsets = [14, 0], sizes = [2, 96], strides = [1, 1]} : vector<16x96xf32> to vector<2x96xf32>
    %569 = vector.extract_strided_slice %384 {offsets = [0, 0], sizes = [2, 96], strides = [1, 1]} : vector<16x96xf32> to vector<2x96xf32>
    %570 = arith.select %391, %568, %569 : vector<2x96xi1>, vector<2x96xf32>
    %cst_107 = arith.constant dense<0.000000e+00> : vector<2x96xf32>
    %571 = tpu.matmul %567, %316, %cst_107 {dimension_numbers = #tpu.dot_dimension_numbers<[1], [0], [0], [1], [0, 0, 1, 1], [], []>} : vector<2x32xf32>, vector<32x96xf32>, vector<2x96xf32> -> vector<2x96xf32>
    %572 = arith.addf %571, %386 : vector<2x96xf32>
    %573 = vector.extract_strided_slice %570 {offsets = [0, 0], sizes = [2, 64], strides = [1, 1]} : vector<2x96xf32> to vector<2x64xf32>
    %574 = vector.extract_strided_slice %572 {offsets = [0, 0], sizes = [2, 64], strides = [1, 1]} : vector<2x96xf32> to vector<2x64xf32>
    %575 = arith.addf %573, %574 : vector<2x64xf32>
    %576 = arith.negf %575 : vector<2x64xf32>
    %577 = math.exp %576 : vector<2x64xf32>
    %cst_108 = arith.constant 1.000000e+00 : f32
    %578 = vector.broadcast %cst_108 : f32 to vector<2x64xf32>
    %579 = arith.addf %578, %577 : vector<2x64xf32>
    %580 = arith.divf %578, %579 : vector<2x64xf32>
    %581 = vector.extract_strided_slice %580 {offsets = [0, 0], sizes = [2, 32], strides = [1, 1]} : vector<2x64xf32> to vector<2x32xf32>
    %582 = vector.extract_strided_slice %580 {offsets = [0, 32], sizes = [2, 32], strides = [1, 1]} : vector<2x64xf32> to vector<2x32xf32>
    %583 = vector.extract_strided_slice %570 {offsets = [0, 64], sizes = [2, 32], strides = [1, 1]} : vector<2x96xf32> to vector<2x32xf32>
    %584 = vector.extract_strided_slice %572 {offsets = [0, 64], sizes = [2, 32], strides = [1, 1]} : vector<2x96xf32> to vector<2x32xf32>
    %585 = arith.mulf %581, %584 : vector<2x32xf32>
    %586 = arith.addf %583, %585 : vector<2x32xf32>
    %587 = math.tanh %586 : vector<2x32xf32>
    %cst_109 = arith.constant 1.000000e+00 : f32
    %588 = vector.broadcast %cst_109 : f32 to vector<2x32xf32>
    %589 = arith.subf %588, %582 : vector<2x32xf32>
    %590 = arith.mulf %589, %587 : vector<2x32xf32>
    %591 = arith.mulf %582, %567 : vector<2x32xf32>
    %592 = arith.addf %590, %591 : vector<2x32xf32>
    %593 = vector.extract_strided_slice %417 {offsets = [0, 0], sizes = [2, 16], strides = [1, 1]} : vector<2x32xf32> to vector<2x16xf32>
    %594 = vector.extract_strided_slice %592 {offsets = [0, 16], sizes = [2, 16], strides = [1, 1]} : vector<2x32xf32> to vector<2x16xf32>
    %595 = tpu.concatenate %593, %594 in 1 : vector<2x16xf32>, vector<2x16xf32> -> vector<2x32xf32>
    %596 = vector.extract_strided_slice %442 {offsets = [0, 0], sizes = [2, 16], strides = [1, 1]} : vector<2x32xf32> to vector<2x16xf32>
    %597 = vector.extract_strided_slice %567 {offsets = [0, 16], sizes = [2, 16], strides = [1, 1]} : vector<2x32xf32> to vector<2x16xf32>
    %598 = tpu.concatenate %596, %597 in 1 : vector<2x16xf32>, vector<2x16xf32> -> vector<2x32xf32>
    %599 = vector.extract_strided_slice %467 {offsets = [0, 0], sizes = [2, 16], strides = [1, 1]} : vector<2x32xf32> to vector<2x16xf32>
    %600 = vector.extract_strided_slice %542 {offsets = [0, 16], sizes = [2, 16], strides = [1, 1]} : vector<2x32xf32> to vector<2x16xf32>
    %601 = tpu.concatenate %599, %600 in 1 : vector<2x16xf32>, vector<2x16xf32> -> vector<2x32xf32>
    %602 = vector.extract_strided_slice %492 {offsets = [0, 0], sizes = [2, 16], strides = [1, 1]} : vector<2x32xf32> to vector<2x16xf32>
    %603 = vector.extract_strided_slice %517 {offsets = [0, 16], sizes = [2, 16], strides = [1, 1]} : vector<2x32xf32> to vector<2x16xf32>
    %604 = tpu.concatenate %602, %603 in 1 : vector<2x16xf32>, vector<2x16xf32> -> vector<2x32xf32>
    %605 = vector.extract_strided_slice %517 {offsets = [0, 0], sizes = [2, 16], strides = [1, 1]} : vector<2x32xf32> to vector<2x16xf32>
    %606 = vector.extract_strided_slice %492 {offsets = [0, 16], sizes = [2, 16], strides = [1, 1]} : vector<2x32xf32> to vector<2x16xf32>
    %607 = tpu.concatenate %605, %606 in 1 : vector<2x16xf32>, vector<2x16xf32> -> vector<2x32xf32>
    %608 = vector.extract_strided_slice %542 {offsets = [0, 0], sizes = [2, 16], strides = [1, 1]} : vector<2x32xf32> to vector<2x16xf32>
    %609 = vector.extract_strided_slice %467 {offsets = [0, 16], sizes = [2, 16], strides = [1, 1]} : vector<2x32xf32> to vector<2x16xf32>
    %610 = tpu.concatenate %608, %609 in 1 : vector<2x16xf32>, vector<2x16xf32> -> vector<2x32xf32>
    %611 = vector.extract_strided_slice %567 {offsets = [0, 0], sizes = [2, 16], strides = [1, 1]} : vector<2x32xf32> to vector<2x16xf32>
    %612 = vector.extract_strided_slice %442 {offsets = [0, 16], sizes = [2, 16], strides = [1, 1]} : vector<2x32xf32> to vector<2x16xf32>
    %613 = tpu.concatenate %611, %612 in 1 : vector<2x16xf32>, vector<2x16xf32> -> vector<2x32xf32>
    %614 = vector.extract_strided_slice %592 {offsets = [0, 0], sizes = [2, 16], strides = [1, 1]} : vector<2x32xf32> to vector<2x16xf32>
    %615 = vector.extract_strided_slice %417 {offsets = [0, 16], sizes = [2, 16], strides = [1, 1]} : vector<2x32xf32> to vector<2x16xf32>
    %616 = tpu.concatenate %614, %615 in 1 : vector<2x16xf32>, vector<2x16xf32> -> vector<2x32xf32>
    %617 = tpu.concatenate %595, %598, %601, %604, %607, %610, %613, %616 in 0 : vector<2x32xf32>, vector<2x32xf32>, vector<2x32xf32>, vector<2x32xf32>, vector<2x32xf32>, vector<2x32xf32>, vector<2x32xf32>, vector<2x32xf32> -> vector<16x32xf32>
    %c200 = arith.constant 200 : index
    %c0_110 = arith.constant 0 : index
    %618 = vector.load %arg1[%c200, %c0_110] : memref<360x128xf32, #tpu.memory_space<vmem>>, vector<32x16xf32>
    %cst_111 = arith.constant dense<0.000000e+00> : vector<16x16xf32>
    %619 = tpu.matmul %617, %618, %cst_111 {dimension_numbers = #tpu.dot_dimension_numbers<[1], [0], [0], [1], [0, 0, 1, 1], [], []>} : vector<16x32xf32>, vector<32x16xf32>, vector<16x16xf32> -> vector<16x16xf32>
    %c81 = arith.constant 81 : index
    %c0_112 = arith.constant 0 : index
    %620 = vector.load %arg1[%c81, %c0_112] : memref<360x128xf32, #tpu.memory_space<vmem>>, vector<1x16xf32>
    %621 = vector.broadcast %620 : vector<1x16xf32> to vector<16x16xf32>
    %622 = arith.addf %619, %621 : vector<16x16xf32>
    %cst_113 = arith.constant 5.000000e-01 : f32
    %623 = vector.broadcast %cst_113 : f32 to vector<16x16xf32>
    %624 = arith.mulf %623, %622 : vector<16x16xf32>
    %cst_114 = arith.constant 0.707106769 : f32
    %625 = vector.broadcast %cst_114 : f32 to vector<16x16xf32>
    %626 = arith.mulf %622, %625 : vector<16x16xf32>
    %627 = math.absf %626 : vector<16x16xf32>
    %cst_115 = arith.constant 0.327591091 : f32
    %628 = vector.broadcast %cst_115 : f32 to vector<16x16xf32>
    %629 = arith.mulf %628, %627 : vector<16x16xf32>
    %cst_116 = arith.constant 1.000000e+00 : f32
    %630 = vector.broadcast %cst_116 : f32 to vector<16x16xf32>
    %631 = arith.addf %630, %629 : vector<16x16xf32>
    %cst_117 = arith.constant 1.000000e+00 : f32
    %632 = vector.broadcast %cst_117 : f32 to vector<16x16xf32>
    %633 = arith.divf %632, %631 : vector<16x16xf32>
    %cst_118 = arith.constant 1.06140542 : f32
    %634 = vector.broadcast %cst_118 : f32 to vector<16x16xf32>
    %635 = arith.mulf %634, %633 : vector<16x16xf32>
    %cst_119 = arith.constant 1.45315206 : f32
    %636 = vector.broadcast %cst_119 : f32 to vector<16x16xf32>
    %637 = arith.subf %635, %636 : vector<16x16xf32>
    %638 = arith.mulf %637, %633 : vector<16x16xf32>
    %cst_120 = arith.constant 1.42141378 : f32
    %639 = vector.broadcast %cst_120 : f32 to vector<16x16xf32>
    %640 = arith.addf %638, %639 : vector<16x16xf32>
    %641 = arith.mulf %640, %633 : vector<16x16xf32>
    %cst_121 = arith.constant 0.284496725 : f32
    %642 = vector.broadcast %cst_121 : f32 to vector<16x16xf32>
    %643 = arith.subf %641, %642 : vector<16x16xf32>
    %644 = arith.mulf %643, %633 : vector<16x16xf32>
    %cst_122 = arith.constant 0.254829586 : f32
    %645 = vector.broadcast %cst_122 : f32 to vector<16x16xf32>
    %646 = arith.addf %644, %645 : vector<16x16xf32>
    %647 = arith.mulf %646, %633 : vector<16x16xf32>
    %648 = arith.mulf %627, %627 : vector<16x16xf32>
    %cst_123 = arith.constant 0.000000e+00 : f32
    %649 = vector.broadcast %cst_123 : f32 to vector<16x16xf32>
    %650 = arith.subf %649, %648 : vector<16x16xf32>
    %651 = math.exp %650 : vector<16x16xf32>
    %652 = arith.mulf %647, %651 : vector<16x16xf32>
    %cst_124 = arith.constant 1.000000e+00 : f32
    %653 = vector.broadcast %cst_124 : f32 to vector<16x16xf32>
    %654 = arith.subf %653, %652 : vector<16x16xf32>
    %cst_125 = arith.constant 0.000000e+00 : f32
    %655 = vector.broadcast %cst_125 : f32 to vector<16x16xf32>
    %656 = arith.cmpf olt, %626, %655 : vector<16x16xf32>
    %cst_126 = arith.constant 0.000000e+00 : f32
    %657 = vector.broadcast %cst_126 : f32 to vector<16x16xf32>
    %658 = arith.subf %657, %654 : vector<16x16xf32>
    %659 = arith.select %656, %658, %654 : vector<16x16xi1>, vector<16x16xf32>
    %cst_127 = arith.constant 1.000000e+00 : f32
    %660 = vector.broadcast %cst_127 : f32 to vector<16x16xf32>
    %661 = arith.addf %660, %659 : vector<16x16xf32>
    %662 = arith.mulf %624, %661 : vector<16x16xf32>
    %663 = vector.extract_strided_slice %662 {offsets = [0, 0], sizes = [2, 16], strides = [1, 1]} : vector<16x16xf32> to vector<2x16xf32>
    %664 = vector.extract_strided_slice %662 {offsets = [2, 0], sizes = [2, 16], strides = [1, 1]} : vector<16x16xf32> to vector<2x16xf32>
    %665 = vector.extract_strided_slice %662 {offsets = [4, 0], sizes = [2, 16], strides = [1, 1]} : vector<16x16xf32> to vector<2x16xf32>
    %666 = vector.extract_strided_slice %662 {offsets = [6, 0], sizes = [2, 16], strides = [1, 1]} : vector<16x16xf32> to vector<2x16xf32>
    %667 = vector.extract_strided_slice %662 {offsets = [8, 0], sizes = [2, 16], strides = [1, 1]} : vector<16x16xf32> to vector<2x16xf32>
    %668 = vector.extract_strided_slice %662 {offsets = [10, 0], sizes = [2, 16], strides = [1, 1]} : vector<16x16xf32> to vector<2x16xf32>
    %669 = vector.extract_strided_slice %662 {offsets = [12, 0], sizes = [2, 16], strides = [1, 1]} : vector<16x16xf32> to vector<2x16xf32>
    %670 = vector.extract_strided_slice %662 {offsets = [14, 0], sizes = [2, 16], strides = [1, 1]} : vector<16x16xf32> to vector<2x16xf32>
    %671 = tpu.concatenate %663, %664, %665, %666, %667, %668, %669, %670 in 1 : vector<2x16xf32>, vector<2x16xf32>, vector<2x16xf32>, vector<2x16xf32>, vector<2x16xf32>, vector<2x16xf32>, vector<2x16xf32>, vector<2x16xf32> -> vector<2x128xf32>
    %c232 = arith.constant 232 : index
    %c0_128 = arith.constant 0 : index
    %672 = vector.load %arg1[%c232, %c0_128] : memref<360x128xf32, #tpu.memory_space<vmem>>, vector<128x5xf32>
    %cst_129 = arith.constant dense<0.000000e+00> : vector<2x5xf32>
    %673 = tpu.matmul %671, %672, %cst_129 {dimension_numbers = #tpu.dot_dimension_numbers<[1], [0], [0], [1], [0, 0, 1, 1], [], []>} : vector<2x128xf32>, vector<128x5xf32>, vector<2x5xf32> -> vector<2x5xf32>
    %c82 = arith.constant 82 : index
    %c0_130 = arith.constant 0 : index
    %674 = vector.load %arg1[%c82, %c0_130] : memref<360x128xf32, #tpu.memory_space<vmem>>, vector<1x5xf32>
    %675 = vector.broadcast %674 : vector<1x5xf32> to vector<2x5xf32>
    %676 = arith.addf %673, %675 : vector<2x5xf32>
    %c0_131 = arith.constant 0 : index
    %c0_132 = arith.constant 0 : index
    %677 = vector.load %arg2[%c0_131, %c0_132] : memref<2x5xf32, #tpu.memory_space<vmem>>, vector<2x5xf32>
    tpu.vector_store %arg2[%c0_131, %c0_132], %676 {strides = array<i32>} : memref<2x5xf32, #tpu.memory_space<vmem>>, vector<2x5xf32>,
    return
  }
}

</mosaic_0001>

<bundles_post_ra>
// kernel: forward.1
= control target key start
LH: loop header
LB: loop body
LE: loop exit
PB: predicated region body
PF: predicated region fallthrough
CT: control target
= control target key end

     0   :  { %vm28_vm0 = vcmask 588800   ;;  %s4055_s0 = inlined_call_operand.vmem [shape: f32[16,72], index: 0, kind: input, shape index: {}]   ;;  %s4056_s1 = inlined_call_operand.vmem [shape: f32[360,128], index: 1, kind: input, shape index: {}]   ;;  %s4057_s2 = inlined_call_operand.hbm [shape: f32[2,5], index: 2, kind: output, shape index: {}]  }
   0x1   :  { %v14_v0 = vld [vmem:[%s4056_s1] sm:$0xff]  ;;  %v15_v1 = vld [vmem:[%s4056_s1 + $0x8] sm:$0xff]  ;;  %v16_v2 = vld [vmem:[%s4056_s1 + $0x10] sm:$0xff] }
   0x2   :  { %v3064_v3 = vpack.c.bf16 %v15_v1, %v14_v0  ;;  %v17_v4 = vld [vmem:[%s4056_s1 + $0x18] sm:$0xff]  ;;  %v18_v6 = vld [vmem:[%s4056_s1 + $0x20] sm:$0xff]  ;;  %v19_v7 = vld [vmem:[%s4056_s1 + $0x28] sm:$0xff] }
   0x3   :  { %v3068_v5 = vpack.c.bf16 %v17_v4, %v16_v2  ;;  %v12_v8 = vld [vmem:[%s4055_s0] sm:$0xff] }
   0x4   :  { %3065 = vmatprep.subr.bf16.mxu1 %v3064_v3 }
   0x5   :  { %7 = vsyncpa [#allocation3], 0  ;;  %3067 = vmatpush3.bf16.msra.mxu1 %v3064_v3  ;;  %2821 = vmatprep.mubr.msk.f32.mxu1 %vm28_vm0, %v12_v8  ;;  %v3072_v9 = vpack.c.bf16 %v19_v7, %v18_v6  ;;  %v20_v10 = vld [vmem:[%s4056_s1 + $0x30] sm:$0xff]  ;;  %v21_v11 = vld [vmem:[%s4056_s1 + $0x38] sm:$0xff]  ;;  %vm120_vm1 = vcmask 130048   ;;  %v3383_v25 = vmov 0.0|0.0  }
   0x6   :  { %3069 = vmatprep.subr.bf16.mxu1 %v3068_v5  ;;  %v3076_v12 = vpack.c.bf16 %v21_v11, %v20_v10  ;;  %v22_v13 = vld [vmem:[%s4056_s1 + $0x40] sm:$0xff]  ;;  %v13_v14 = vld [vmem:[%s4055_s0 + $0x8] sm:$0xff]  ;;  %v116_v23 = vld [vmem:[%s4056_s1 + $0x70] sm:$0xff]  ;;  %vm3384_vm2 = vmmov 0   ;;  %v3385_v28 = vmov 0.0   ;;  %s3386_s18 = smov 64  }
   0x7   :  { %v2618_v15 = vld [vmem:[%s4056_s1 + $0x48] ss:$0 sm:$0xff]  ;;  %v117_v24 = vld [vmem:[%s4056_s1 + $0x78] sm:$0xff]  ;;  %v118_v27 = vld [vmem:[%s4056_s1 + $0x80] sm:$0xff]  ;;  %s3387_s25 = smov 96   ;;  %vm311_vm6 = vcmask 261120  }
   0x8   :  { %v115_v22 = vld [vmem:[%s4056_s1 + $0x68] sm:$0xff]  ;;  %v3467_v29 = vpack.c.bf16 %v118_v27, %v117_v24  ;;  %v112_v40 = vld [vmem:[%s4056_s1 + $0x58] sm:$0xff]  ;;  %v113_v41 = vld [vmem:[%s4056_s1 + $0x60] sm:$0xff]  ;;  %vm1214_vm7 = vcmask 1041408   ;;  %vm1218_vm8 = vcmask 1045504   ;;  %vm1216_vm9 = vcmask 1043456  }
   0x9   :  { %3071 = vmatpush3.bf16.msra.mxu1 %v3068_v5  ;;  %v3459_v26 = vpack.c.bf16 %v116_v23, %v115_v22  ;;  %v3080_v42 = vpack.c.bf16 %v113_v41, %v112_v40  ;;  %v3491_v43 = vld [vmem:[%s4056_s1 + $0x4c] ss:$0 sm:$0xff]  ;;  %v2621_v54 = vld [vmem:[%s4056_s1 + $0x49] ss:$0 sm:$0xff]  ;;  %v2622_v56 = vld [vmem:[%s4056_s1 + $0x4a] ss:$0 sm:$0xff] }
   0xa   :  { %3073 = vmatprep.subr.bf16.mxu1 %v3072_v9  ;;  %s3388_s9 = smov 80   ;;  %s3389_s10 = smov 32   ;;  %vm2501_vm14 = vcmask 392192   ;;  %vm2503_vm15 = vcmask 523264  }
   0xb   :  { %3081 = vmatprep.subr.bf16.mxu0 %v3080_v42  ;;  %s3390_s11 = smov 16   ;;  %s3391_s12 = smov 48  }
   0xc   :  { %3083 = vmatpush3.bf16.msra.mxu0 %v3080_v42  ;;  %s3392_s13 = smov 112   ;;  %s3393_s14 = smov [#allocation2]  }
   0xd   :  { %3075 = vmatpush3.bf16.msra.mxu1 %v3072_v9  ;;  %3096 = vmatprep.subr.bf16.mxu0 %v3383_v25  ;;  %s2610_s15 = sshll.u32 %s3393_s14, 4  ;;  %s2611_s15 = int_to_ptr.vmem [resolvable:$true] %s2610_s15 }
   0xe   :  { %3077 = vmatprep.subr.bf16.mxu1 %v3076_v12  ;;  %s3359_s16 = scalar_lea.vmem %s2611_s15, 32  ;;  %p3364_p1 = scmp.lt.s32.totalorder %s2611_s15, %s2611_s15 }
   0xf   :  { %p3360_p0 = scmp.ne.s32.totalorder %s2611_s15, %s3359_s16  ;;  %p3365_p2 = scmp.lt.s32.totalorder %s3359_s16, %s3359_s16 }
  0x11   :  { %3079 = vmatpush3.bf16.msra.mxu1 %v3076_v12  ;;  %p3366_p3 = por %p3365_p2, %p3364_p1 }
  0x12   :  { %2819 = vmatprep.subr.mxu1 %v22_v13 }
  0x13   :  { %p3367_p4 = pnand %p3366_p3, %p3360_p0 }
  0x15   :  { %2820 = vmatpush3.msra.mxu1 %v22_v13 }
  0x16   :  { %2822 = vmatmul.mubr.msk.f32.vlgmr.msra.gmra.mrb[0].mxu1 %vm28_vm0, %v13_v14  ;;  %3084 = vmatprep.subr.bf16.mxu1 %v3383_v25  ;;  %vm2505_vm0 = vcmask 654336  }
  0x17   :  { %2839 = vmatprep.mubr.msk.f32.mxu1 %vm3384_vm2, %v3385_v28  ;;  %3086 = vmatpush3.bf16.msra.mxu1 %v3459_v26 }
  0x18   :  { %3087 = vmatprep.subr.bf16.mxu1 %v3383_v25 }
  0x1b   :  { %3089 = vmatpush3.bf16.msra.mxu1 %v3467_v29 }
  0x1c   :  { %3090 = vmatprep.subr.bf16.mxu1 %v3383_v25 }
  0x1e   :  { %2840 = vmatmul.mubr.f32.vlgmr.msra.gmra.mrb[2].mxu1 %v3385_v28 }
  0x1f   :  { %3092 = vmatpush3.bf16.msra.mxu1 %v3459_v26  ;;  %2850 = vmatprep.mubr.msk.f32.mxu1 %vm3384_vm2, %v3385_v28 }
  0x20   :  { %3093 = vmatprep.subr.bf16.mxu1 %v3383_v25 }
  0x23   :  { %3095 = vmatpush3.bf16.msra.mxu1 %v3467_v29 }
  0x24   :  { %3102 = vmatprep.subr.bf16.mxu1 %v3383_v25 }
  0xe9   :  { %v2823_v16 = vpop.f32.mrb[0].mxu1 }
  0xea   :  { %v101_v17 = vpop.f32.mrb[1].mxu1  ;;  %v107_v19 = vadd.f32 %v2823_v16, %v2618_v15 }
  0xeb   :  { %v102_v18 = vadd.f32 %v2618_v15, %v101_v17 }
  0xec   :  { %v124_v21 = vsel %vm120_vm1, %v107_v19, 0.0 }
  0xed   :  { %v121_v20 = vsel %vm120_vm1, %v102_v18, 0.0 }
  0xee   :  { %122 = vadd.xlane.f32.xlu0 %v121_v20 }
  0xf1   :  { %v381_v44 = vpop.f32.mrb[2].mxu1 }
  0xf2   :  { %125 = vadd.xlane.f32.xlu0 %v124_v21  ;;  %v3494_v45 = vadd.f32 %v3491_v43, %v381_v44  ;;  %v2841_v46 = vpop.f32.mrb[3].mxu1 }
 0x108   :  { %393 = vrot.lane.b32.xlu0 %v3494_v45, %s3386_s18 }
 0x17b   :  { %v123_v30 = vpop.xlane.xlu0 %122 }
 0x17c   :  { %v128_v31 = vmul.f32 0.0625, %v123_v30 }
 0x17e   :  { %v130_v32 = vsub.f32 %v102_v18, %v128_v31 }
 0x17f   :  { %v126_v33 = vpop.xlane.xlu0 %125 }
 0x180   :  { %v129_v34 = vmul.f32 0.0625, %v126_v33  ;;  %v132_v35 = vmul.f32 %v130_v32, %v130_v32 }
 0x182   :  { %v131_v36 = vsub.f32 %v107_v19, %v129_v34  ;;  %v134_v37 = vsel %vm120_vm1, %v132_v35, 0.0 }
 0x183   :  { %135 = vadd.xlane.f32.xlu1 %v134_v37 }
 0x184   :  { %v133_v38 = vmul.f32 %v131_v36, %v131_v36 }
 0x186   :  { %v137_v39 = vsel %vm120_vm1, %v133_v38, 0.0 }
 0x187   :  { %138 = vadd.xlane.f32.xlu1 %v137_v39 }
 0x210   :  { %v136_v47 = vpop.xlane.xlu1 %135 }
 0x211   :  { %v140_v48 = vmul.f32 0.0625, %v136_v47 }
 0x213   :  { %v142_v49 = vadd.f32 1e-05, %v140_v48 }
 0x214   :  { %v139_v50 = vpop.xlane.xlu1 %138 }
 0x215   :  { %3231 = vrsqrt.f32 %v142_v49  ;;  %v141_v51 = vmul.f32 0.0625, %v139_v50 }
 0x217   :  { %v143_v52 = vadd.f32 1e-05, %v141_v51 }
 0x219   :  { %3233 = vrsqrt.f32 %v143_v52 }
 0x21f   :  { %v3232_v53 = vpop.eup %3231 }
 0x220   :  { %v146_v55 = vmul.f32 %v3232_v53, %v130_v32 }
 0x222   :  { %v152_v57 = vmul.f32 %v2621_v54, %v146_v55  ;;  %v303_v55 = vlaneseq }
 0x223   :  { %v3234_v58 = vpop.eup %3233 }
 0x224   :  { %v147_v59 = vmul.f32 %v3234_v58, %v131_v36  ;;  %v158_v60 = vadd.f32 %v2622_v56, %v152_v57  ;;  %v2627_v57 = vld [vmem:[%s4056_s1 + $0x4b] ss:$0 sm:$0xff] }
 0x226   :  { %v153_v61 = vmul.f32 %v2621_v54, %v147_v59  ;;  %v162_v62 = vmul.f32 0.70710677, %v158_v60  ;;  %v160_v47 = vmul.f32 0.5, %v158_v60 }
 0x228   :  { %v159_v63 = vadd.f32 %v2622_v56, %v153_v61  ;;  %v164_v0 = vand.u32 2147483647, %v162_v62  ;;  %vm204_vm3 = vcmp.lt.f32.partialorder %v162_v62, 0.0  ;;  %v304_v56 = vand.u32 127, %v303_v55 }
 0x22a   :  { %v163_v1 = vmul.f32 0.70710677, %v159_v63  ;;  %v166_v2 = vmul.f32 0.3275911, %v164_v0  ;;  %v192_v7 = vmul.f32 %v164_v0, %v164_v0  ;;  %v161_v52 = vmul.f32 0.5, %v159_v63 }
 0x22b   :  { %v305_v58 = vand.u32 31, %v304_v56 }
 0x22c   :  { %v165_v3 = vand.u32 2147483647, %v163_v1  ;;  %v168_v4 = vadd.f32 1.0, %v166_v2  ;;  %v194_v10 = vsub.f32 0.0, %v192_v7  ;;  %vm205_vm4 = vcmp.lt.f32.partialorder %v163_v1, 0.0 }
 0x22d   :  { %vm3515_vm5 = vcmp.lt.s32.totalorder %v305_v58, 16 }
 0x22e   :  { %v167_v5 = vmul.f32 0.3275911, %v165_v3  ;;  %3235 = vrcp.f32 %v168_v4  ;;  %v193_v9 = vmul.f32 %v165_v3, %v165_v3  ;;  %v196_v15 = vmul.f32 1.442695, %v194_v10 }
 0x230   :  { %v169_v6 = vadd.f32 1.0, %v167_v5  ;;  %v195_v14 = vsub.f32 0.0, %v193_v9 }
 0x232   :  { %3237 = vrcp.f32 %v169_v6  ;;  %v198_v20 = vmul.f32 1.442695, %v195_v14 }
 0x233   :  { %3239 = vpow2.f32 %v196_v15 }
 0x234   :  { %3241 = vpow2.f32 %v198_v20 }
 0x238   :  { %v3236_v8 = vpop.eup %3235 }
 0x239   :  { %v174_v11 = vmul.f32 1.0614054, %v3236_v8 }
 0x23b   :  { %v2623_v12 = vadd.f32 -1.4531521, %v174_v11 }
 0x23c   :  { %v3238_v13 = vpop.eup %3237 }
 0x23d   :  { %v178_v16 = vmul.f32 %v3236_v8, %v2623_v12  ;;  %v175_v17 = vmul.f32 1.0614054, %v3238_v13  ;;  %v3240_v35 = vpop.eup %3239  ;;  %v394_v12 = vpop.permute.xlu0 %393 }
 0x23e   :  { %v3242_v40 = vpop.eup %3241 }
 0x23f   :  { %v180_v18 = vadd.f32 1.4214138, %v178_v16  ;;  %v2624_v19 = vadd.f32 -1.4531521, %v175_v17 }
 0x241   :  { %v182_v21 = vmul.f32 %v3236_v8, %v180_v18  ;;  %v179_v22 = vmul.f32 %v3238_v13, %v2624_v19 }
 0x243   :  { %v2625_v23 = vadd.f32 -0.28449672, %v182_v21  ;;  %v181_v24 = vadd.f32 1.4214138, %v179_v22 }
 0x245   :  { %v186_v27 = vmul.f32 %v3236_v8, %v2625_v23  ;;  %v183_v30 = vmul.f32 %v3238_v13, %v181_v24 }
 0x247   :  { %v188_v31 = vadd.f32 0.2548296, %v186_v27  ;;  %v2626_v32 = vadd.f32 -0.28449672, %v183_v30 }
 0x249   :  { %v190_v33 = vmul.f32 %v3236_v8, %v188_v31  ;;  %v187_v34 = vmul.f32 %v3238_v13, %v2626_v32 }
 0x24b   :  { %v200_v36 = vmul.f32 %v3240_v35, %v190_v33  ;;  %v189_v37 = vadd.f32 0.2548296, %v187_v34 }
 0x24d   :  { %v202_v38 = vsub.f32 1.0, %v200_v36  ;;  %v191_v39 = vmul.f32 %v3238_v13, %v189_v37 }
 0x24f   :  { %v206_v41 = vsub.f32 0.0, %v202_v38  ;;  %v201_v42 = vmul.f32 %v3242_v40, %v191_v39 }
 0x251   :  { %v208_v44 = vsel %vm204_vm3, %v206_v41, %v202_v38  ;;  %v203_v46 = vsub.f32 1.0, %v201_v42  ;;  %vm2509_vm3 = vcmask 916480  }
 0x252   :  { %v210_v48 = vadd.f32 1.0, %v208_v44 }
 0x253   :  { %v207_v49 = vsub.f32 0.0, %v203_v46 }
 0x254   :  { %v212_v50 = vmul.f32 %v210_v48, %v160_v47 }
 0x255   :  { %v209_v51 = vsel %vm205_vm4, %v207_v49, %v203_v46 }
 0x256   :  { %2828 = vmatprep.mubr.msk.f32.mxu0 %vm120_vm1, %v212_v50  ;;  %v211_v53 = vadd.f32 1.0, %v209_v51 }
 0x258   :  { %v213_v54 = vmul.f32 %v211_v53, %v161_v52 }
 0x25a   :  { %2829 = vmatmul.mubr.msk.f32.vlgmr.msra.gmra.mrb[0].mxu0 %vm120_vm1, %v213_v54 }
 0x25b   :  { %3098 = vmatpush3.bf16.msra.mxu0 %v3459_v26  ;;  %2861 = vmatprep.mubr.msk.f32.mxu0 %vm3384_vm2, %v3385_v28 }
 0x25c   :  { %3099 = vmatprep.subr.bf16.mxu0 %v3383_v25 }
 0x25f   :  { %3101 = vmatpush3.bf16.msra.mxu0 %v3467_v29 }
 0x260   :  { %3108 = vmatprep.subr.bf16.mxu0 %v3383_v25 }
 0x32d   :  { %v2830_v59 = vpop.f32.mrb[0].mxu0 }
 0x32e   :  { %v296_v60 = vadd.f32 %v2830_v59, %v2627_v57  ;;  %v290_v61 = vpop.f32.mrb[1].mxu0 }
 0x32f   :  { %v291_v62 = vadd.f32 %v2627_v57, %v290_v61 }
 0x330   :  { %v308_v0 = vrot.slane %v296_v60, 6  ;;  %v411_v1 = vrot.slane %v296_v60, 2 }
 0x331   :  { %v732_v2 = vrot.slane %v291_v62, 6  ;;  %v838_v3 = vrot.slane %v291_v62, 2 }
 0x332   :  { %v3521_v4 = vsel %vm3515_vm5, %v291_v62, %v308_v0  ;;  %v3525_v5 = vsel %vm3515_vm5, %v291_v62, %v411_v1 }
 0x333   :  { %v385_v6 = vadd.f32 %v3494_v45, %v3521_v4  ;;  %v3531_v7 = vsel %vm3515_vm5, %v296_v60, %v732_v2  ;;  %v3535_v8 = vsel %vm3515_vm5, %v296_v60, %v838_v3 }
 0x335   :  { %v2631_v9 = vmul.f32 -1.442695, %v385_v6 }
 0x337   :  { %3243 = vpow2.f32 %v2631_v9 }
 0x341   :  { %v3244_v10 = vpop.eup %3243 }
 0x342   :  { %v389_v11 = vadd.f32 1.0, %v3244_v10 }
 0x344   :  { %3245 = vrcp.f32 %v389_v11 }
 0x34e   :  { %v3246_v13 = vpop.eup %3245 }
 0x34f   :  { %v396_v14 = vmul.f32 %v3246_v13, %v394_v12  ;;  %v403_v17 = vsub.f32 1.0, %v3246_v13  ;;  %v409_v19 = vmul.f32 0.0, %v3246_v13 }
 0x351   :  { %398 = vrot.lane.b32.xlu1 %v396_v14, %s3386_s18 }
 0x3c3   :  { %v399_v15 = vpop.permute.xlu1 %398 }
 0x3c4   :  { %v401_v45 = vadd.f32 %v399_v15, %v3521_v4 }
 0x3c6   :  { %3247 = vtanh.f32 %v401_v45 }
 0x3d0   :  { %v3248_v16 = vpop.eup %3247 }
 0x3d1   :  { %405 = vrot.lane.b32.xlu1 %v3248_v16, %s3387_s25 }
 0x443   :  { %v406_v18 = vpop.permute.xlu1 %405 }
 0x444   :  { %v408_v20 = vmul.f32 %v406_v18, %v403_v17 }
 0x446   :  { %v3540_v21 = vadd.f32 %v409_v19, %v408_v20 }
 0x448   :  { %415 = vrot.lane.b32.xlu1 %v3540_v21, %s3387_s25  ;;  %v515_v42 = vrot.slane %v3540_v21, 6 }
 0x4ba   :  { %v3544_v22 = vpop.permute.xlu1 %415 }
 0x4bb   :  { %2851 = vmatmul.mubr.msk.f32.vlgmr.msra.gmra.mrb[4].mxu1 %vm311_vm6, %v3544_v22 }
 0x4bc   :  { %3104 = vmatpush3.bf16.msra.mxu1 %v3459_v26  ;;  %2872 = vmatprep.mubr.msk.f32.mxu1 %vm3384_vm2, %v3385_v28 }
 0x4bd   :  { %3105 = vmatprep.subr.bf16.mxu1 %v3383_v25 }
 0x4c0   :  { %3107 = vmatpush3.bf16.msra.mxu1 %v3467_v29 }
 0x4c1   :  { %3114 = vmatprep.subr.bf16.mxu1 %v3383_v25 }
 0x58e   :  { %v485_v23 = vpop.f32.mrb[4].mxu1 }
 0x58f   :  { %v486_v24 = vadd.f32 %v3491_v43, %v485_v23  ;;  %v2852_v27 = vpop.f32.mrb[5].mxu1 }
 0x591   :  { %v490_v30 = vrot.slane %v486_v24, 6 }
 0x593   :  { %499 = vrot.lane.b32.xlu0 %v490_v30, %s3386_s18  ;;  %v492_v31 = vadd.f32 %v490_v30, %v3525_v5 }
 0x595   :  { %v2633_v32 = vmul.f32 -1.442695, %v492_v31 }
 0x597   :  { %3249 = vpow2.f32 %v2633_v32 }
 0x5a1   :  { %v3250_v33 = vpop.eup %3249 }
 0x5a2   :  { %v496_v34 = vadd.f32 1.0, %v3250_v33 }
 0x5a4   :  { %3251 = vrcp.f32 %v496_v34 }
 0x5ae   :  { %v3252_v35 = vpop.eup %3251 }
 0x5af   :  { %v509_v41 = vsub.f32 1.0, %v3252_v35  ;;  %v517_v47 = vmul.f32 %v3252_v35, %v515_v42 }
 0x605   :  { %v500_v36 = vpop.permute.xlu0 %499 }
 0x606   :  { %v502_v37 = vmul.f32 %v3252_v35, %v500_v36 }
 0x608   :  { %504 = vrot.lane.b32.xlu1 %v502_v37, %s3386_s18 }
 0x67a   :  { %v505_v38 = vpop.permute.xlu1 %504 }
 0x67b   :  { %v507_v39 = vadd.f32 %v505_v38, %v3525_v5 }
 0x67d   :  { %3253 = vtanh.f32 %v507_v39 }
 0x687   :  { %v3254_v40 = vpop.eup %3253 }
 0x688   :  { %511 = vrot.lane.b32.xlu0 %v3254_v40, %s3387_s25 }
 0x6fa   :  { %v512_v44 = vpop.permute.xlu0 %511 }
 0x6fb   :  { %v514_v46 = vmul.f32 %v512_v44, %v509_v41 }
 0x6fd   :  { %v3561_v48 = vadd.f32 %v517_v47, %v514_v46 }
 0x6ff   :  { %v520_v49 = vrot.slane %v3561_v48, 2  ;;  %v621_v3 = vrot.slane %v3561_v48, 6 }
 0x701   :  { %521 = vrot.lane.b32.xlu1 %v520_v49, %s3387_s25 }
 0x773   :  { %v522_v50 = vpop.permute.xlu1 %521 }
 0x774   :  { %2862 = vmatmul.mubr.msk.f32.vlgmr.msra.gmra.mrb[2].mxu0 %vm311_vm6, %v522_v50 }
 0x775   :  { %3110 = vmatpush3.bf16.msra.mxu0 %v3459_v26  ;;  %2883 = vmatprep.mubr.msk.f32.mxu0 %vm3384_vm2, %v3385_v28 }
 0x776   :  { %3111 = vmatprep.subr.bf16.mxu0 %v3383_v25 }
 0x779   :  { %3113 = vmatpush3.bf16.msra.mxu0 %v3467_v29 }
 0x77a   :  { %3120 = vmatprep.subr.bf16.mxu0 %v3383_v25 }
 0x847   :  { %v591_v51 = vpop.f32.mrb[2].mxu0 }
 0x848   :  { %v592_v52 = vadd.f32 %v3491_v43, %v591_v51  ;;  %v2863_v53 = vpop.f32.mrb[3].mxu0 }
 0x84a   :  { %v596_v54 = vrot.slane %v592_v52, 4 }
 0x84c   :  { %605 = vrot.lane.b32.xlu0 %v596_v54, %s3386_s18  ;;  %v598_v55 = vadd.f32 %v596_v54, %v3521_v4 }
 0x84e   :  { %v2635_v56 = vmul.f32 -1.442695, %v598_v55 }
 0x850   :  { %3255 = vpow2.f32 %v2635_v56 }
 0x85a   :  { %v3256_v57 = vpop.eup %3255 }
 0x85b   :  { %v602_v58 = vadd.f32 1.0, %v3256_v57 }
 0x85d   :  { %3257 = vrcp.f32 %v602_v58 }
 0x867   :  { %v3258_v59 = vpop.eup %3257 }
 0x868   :  { %v615_v2 = vsub.f32 1.0, %v3258_v59  ;;  %v623_v9 = vmul.f32 %v3258_v59, %v621_v3 }
 0x8be   :  { %v606_v60 = vpop.permute.xlu0 %605 }
 0x8bf   :  { %v608_v61 = vmul.f32 %v3258_v59, %v606_v60 }
 0x8c1   :  { %610 = vrot.lane.b32.xlu1 %v608_v61, %s3386_s18 }
 0x933   :  { %v611_v62 = vpop.permute.xlu1 %610 }
 0x934   :  { %v613_v0 = vadd.f32 %v611_v62, %v3521_v4 }
 0x936   :  { %3259 = vtanh.f32 %v613_v0 }
 0x940   :  { %v3260_v1 = vpop.eup %3259 }
 0x941   :  { %617 = vrot.lane.b32.xlu0 %v3260_v1, %s3387_s25 }
 0x9b3   :  { %v618_v6 = vpop.permute.xlu0 %617 }
 0x9b4   :  { %v620_v10 = vmul.f32 %v618_v6, %v615_v2 }
 0x9b6   :  { %v3581_v11 = vadd.f32 %v623_v9, %v620_v10 }
 0x9b8   :  { %v626_v12 = vrot.slane %v3581_v11, 4  ;;  %v727_v33 = vrot.slane %v3581_v11, 6 }
 0x9ba   :  { %627 = vrot.lane.b32.xlu1 %v626_v12, %s3387_s25 }
 0xa2c   :  { %v628_v13 = vpop.permute.xlu1 %627 }
 0xa2d   :  { %2873 = vmatmul.mubr.msk.f32.vlgmr.msra.gmra.mrb[6].mxu1 %vm311_vm6, %v628_v13 }
 0xa2e   :  { %3116 = vmatpush3.bf16.msra.mxu1 %v3459_v26  ;;  %2894 = vmatprep.mubr.msk.f32.mxu1 %vm3384_vm2, %v3385_v28 }
 0xa2f   :  { %3117 = vmatprep.subr.bf16.mxu1 %v3383_v25 }
 0xa32   :  { %3119 = vmatpush3.bf16.msra.mxu1 %v3467_v29 }
 0xa33   :  { %3126 = vmatprep.subr.bf16.mxu1 %v3383_v25 }
 0xb00   :  { %v697_v4 = vpop.f32.mrb[6].mxu1 }
 0xb01   :  { %v698_v14 = vadd.f32 %v3491_v43, %v697_v4  ;;  %v2874_v15 = vpop.f32.mrb[7].mxu1 }
 0xb03   :  { %v702_v45 = vrot.slane %v698_v14, 2 }
 0xb05   :  { %711 = vrot.lane.b32.xlu0 %v702_v45, %s3386_s18  ;;  %v704_v16 = vadd.f32 %v702_v45, %v3525_v5 }
 0xb07   :  { %v2637_v17 = vmul.f32 -1.442695, %v704_v16 }
 0xb09   :  { %3261 = vpow2.f32 %v2637_v17 }
 0xb13   :  { %v3262_v18 = vpop.eup %3261 }
 0xb14   :  { %v708_v19 = vadd.f32 1.0, %v3262_v18 }
 0xb16   :  { %3263 = vrcp.f32 %v708_v19 }
 0xb20   :  { %v3264_v20 = vpop.eup %3263 }
 0xb21   :  { %v721_v32 = vsub.f32 1.0, %v3264_v20  ;;  %v729_v35 = vmul.f32 %v3264_v20, %v727_v33 }
 0xb77   :  { %v712_v23 = vpop.permute.xlu0 %711 }
 0xb78   :  { %v714_v24 = vmul.f32 %v3264_v20, %v712_v23 }
 0xb7a   :  { %716 = vrot.lane.b32.xlu1 %v714_v24, %s3386_s18 }
 0xbec   :  { %v717_v27 = vpop.permute.xlu1 %716 }
 0xbed   :  { %v719_v30 = vadd.f32 %v717_v27, %v3525_v5 }
 0xbef   :  { %3265 = vtanh.f32 %v719_v30 }
 0xbf9   :  { %v3266_v31 = vpop.eup %3265 }
 0xbfa   :  { %723 = vrot.lane.b32.xlu0 %v3266_v31, %s3387_s25 }
 0xc6c   :  { %v724_v34 = vpop.permute.xlu0 %723 }
 0xc6d   :  { %v726_v36 = vmul.f32 %v724_v34, %v721_v32 }
 0xc6f   :  { %v3599_v37 = vadd.f32 %v729_v35, %v726_v36 }
 0xc71   :  { %v736_v38 = vrot.slane %v3599_v37, 6 }
 0xc73   :  { %737 = vrot.lane.b32.xlu1 %v736_v38, %s3387_s25 }
 0xce5   :  { %v3603_v39 = vpop.permute.xlu1 %737 }
 0xce6   :  { %2884 = vmatmul.mubr.msk.f32.vlgmr.msra.gmra.mrb[4].mxu0 %vm311_vm6, %v3603_v39 }
 0xce7   :  { %3122 = vmatpush3.bf16.msra.mxu0 %v3459_v26  ;;  %2905 = vmatprep.mubr.msk.f32.mxu0 %vm3384_vm2, %v3385_v28 }
 0xce8   :  { %3123 = vmatprep.subr.bf16.mxu0 %v3383_v25 }
 0xceb   :  { %3125 = vmatpush3.bf16.msra.mxu0 %v3467_v29 }
 0xdb9   :  { %v807_v5 = vpop.f32.mrb[4].mxu0 }
 0xdba   :  { %v808_v40 = vadd.f32 %v3491_v43, %v807_v5  ;;  %v2885_v41 = vpop.f32.mrb[5].mxu0 }
 0xdbc   :  { %819 = vrot.lane.b32.xlu0 %v808_v40, %s3386_s18  ;;  %v811_v42 = vadd.f32 %v808_v40, %v3531_v7 }
 0xdbe   :  { %v2639_v44 = vmul.f32 -1.442695, %v811_v42 }
 0xdc0   :  { %3267 = vpow2.f32 %v2639_v44 }
 0xdca   :  { %v3268_v46 = vpop.eup %3267 }
 0xdcb   :  { %v815_v47 = vadd.f32 1.0, %v3268_v46 }
 0xdcd   :  { %3269 = vrcp.f32 %v815_v47 }
 0xdd7   :  { %v3270_v49 = vpop.eup %3269 }
 0xdd8   :  { %v829_v55 = vsub.f32 1.0, %v3270_v49  ;;  %v836_v57 = vmul.f32 %v3270_v49, %v736_v38 }
 0xe2e   :  { %v820_v50 = vpop.permute.xlu0 %819 }
 0xe2f   :  { %v822_v51 = vmul.f32 %v3270_v49, %v820_v50 }
 0xe31   :  { %824 = vrot.lane.b32.xlu1 %v822_v51, %s3386_s18 }
 0xea3   :  { %v825_v52 = vpop.permute.xlu1 %824 }
 0xea4   :  { %v827_v53 = vadd.f32 %v825_v52, %v3531_v7 }
 0xea6   :  { %3271 = vtanh.f32 %v827_v53 }
 0xeb0   :  { %v3272_v54 = vpop.eup %3271 }
 0xeb1   :  { %831 = vrot.lane.b32.xlu0 %v3272_v54, %s3387_s25 }
 0xf23   :  { %v832_v56 = vpop.permute.xlu0 %831 }
 0xf24   :  { %v834_v58 = vmul.f32 %v832_v56, %v829_v55 }
 0xf26   :  { %v3618_v59 = vadd.f32 %v836_v57, %v834_v58 }
 0xf28   :  { %842 = vrot.lane.b32.xlu1 %v3618_v59, %s3387_s25  ;;  %v942_v45 = vrot.slane %v3618_v59, 6 }
 0xf9a   :  { %v3622_v60 = vpop.permute.xlu1 %842 }
 0xf9b   :  { %2895 = vmatmul.mubr.msk.f32.vlgmr.msra.gmra.mrb[8].mxu1 %vm311_vm6, %v3622_v60 }
 0xf9c   :  { %3128 = vmatpush3.bf16.msra.mxu1 %v3459_v26  ;;  %2916 = vmatprep.mubr.msk.f32.mxu1 %vm3384_vm2, %v3385_v28 }
 0xf9d   :  { %3129 = vmatprep.subr.bf16.mxu1 %v3383_v25 }
 0xfa0   :  { %3131 = vmatpush3.bf16.msra.mxu1 %v3467_v29 }
 0xfa1   :  { %3140 = vmatprep.subr.bf16.mxu1 %v3383_v25 }
0x106e   :  { %v912_v61 = vpop.f32.mrb[8].mxu1 }
0x106f   :  { %v913_v62 = vadd.f32 %v3491_v43, %v912_v61  ;;  %v2896_v0 = vpop.f32.mrb[9].mxu1 }
0x1071   :  { %v917_v1 = vrot.slane %v913_v62, 6 }
0x1073   :  { %926 = vrot.lane.b32.xlu0 %v917_v1, %s3386_s18  ;;  %v919_v2 = vadd.f32 %v917_v1, %v3535_v8 }
0x1075   :  { %v2641_v6 = vmul.f32 -1.442695, %v919_v2 }
0x1077   :  { %3273 = vpow2.f32 %v2641_v6 }
0x1081   :  { %v3274_v26 = vpop.eup %3273 }
0x1082   :  { %v923_v9 = vadd.f32 1.0, %v3274_v26  ;;  %v1183_v26 = vrot.slane %v3618_v59, 2 }
0x1084   :  { %3275 = vrcp.f32 %v923_v9 }
0x108e   :  { %v3276_v10 = vpop.eup %3275 }
0x108f   :  { %v936_v15 = vsub.f32 1.0, %v3276_v10  ;;  %v944_v18 = vmul.f32 %v3276_v10, %v942_v45 }
0x10e5   :  { %v927_v12 = vpop.permute.xlu0 %926 }
0x10e6   :  { %v929_v13 = vmul.f32 %v3276_v10, %v927_v12 }
0x10e8   :  { %931 = vrot.lane.b32.xlu1 %v929_v13, %s3386_s18 }
0x115a   :  { %v932_v29 = vpop.permute.xlu1 %931 }
0x115b   :  { %v934_v4 = vadd.f32 %v932_v29, %v3535_v8 }
0x115d   :  { %3277 = vtanh.f32 %v934_v4 }
0x1167   :  { %v3278_v14 = vpop.eup %3277 }
0x1168   :  { %938 = vrot.lane.b32.xlu0 %v3278_v14, %s3387_s25 }
0x11da   :  { %v939_v16 = vpop.permute.xlu0 %938 }
0x11db   :  { %v941_v17 = vmul.f32 %v939_v16, %v936_v15 }
0x11dd   :  { %v3639_v19 = vadd.f32 %v944_v18, %v941_v17 }
0x11df   :  { %v947_v20 = vrot.slane %v3639_v19, 2  ;;  %v1048_v46 = vrot.slane %v3639_v19, 6 }
0x11e1   :  { %948 = vrot.lane.b32.xlu1 %v947_v20, %s3387_s25 }
0x1253   :  { %v949_v23 = vpop.permute.xlu1 %948 }
0x1254   :  { %2906 = vmatmul.mubr.msk.f32.vlgmr.msra.gmra.mrb[6].mxu0 %vm311_vm6, %v949_v23 }
0x1327   :  { %v1018_v24 = vpop.f32.mrb[6].mxu0 }
0x1328   :  { %v1019_v27 = vadd.f32 %v3491_v43, %v1018_v24  ;;  %v2907_v30 = vpop.f32.mrb[7].mxu0 }
0x132a   :  { %v1023_v31 = vrot.slane %v1019_v27, 4 }
0x132c   :  { %1032 = vrot.lane.b32.xlu0 %v1023_v31, %s3386_s18  ;;  %v1025_v32 = vadd.f32 %v1023_v31, %v3531_v7 }
0x132e   :  { %v2643_v33 = vmul.f32 -1.442695, %v1025_v32 }
0x1330   :  { %3279 = vpow2.f32 %v2643_v33 }
0x133a   :  { %v3280_v34 = vpop.eup %3279 }
0x133b   :  { %v1029_v35 = vadd.f32 1.0, %v3280_v34  ;;  %v1190_v34 = vsel %vm120_vm1, %v3622_v60, %v3603_v39  ;;  %v1230_v60 = vld [vmem:[%s4056_s1 + $0xa8] sm:$0xff] }
0x133d   :  { %3281 = vrcp.f32 %v1029_v35 }
0x1347   :  { %v3282_v36 = vpop.eup %3281 }
0x1348   :  { %v1042_v44 = vsub.f32 1.0, %v3282_v36  ;;  %v1050_v49 = vmul.f32 %v3282_v36, %v1048_v46 }
0x139e   :  { %v1033_v38 = vpop.permute.xlu0 %1032 }
0x139f   :  { %v1035_v5 = vmul.f32 %v3282_v36, %v1033_v38 }
0x13a1   :  { %1037 = vrot.lane.b32.xlu1 %v1035_v5, %s3386_s18 }
0x1413   :  { %v1038_v40 = vpop.permute.xlu1 %1037 }
0x1414   :  { %v1040_v41 = vadd.f32 %v1038_v40, %v3531_v7 }
0x1416   :  { %3283 = vtanh.f32 %v1040_v41 }
0x1420   :  { %v3284_v42 = vpop.eup %3283 }
0x1421   :  { %1044 = vrot.lane.b32.xlu0 %v3284_v42, %s3387_s25 }
0x1493   :  { %v1045_v47 = vpop.permute.xlu0 %1044 }
0x1494   :  { %v1047_v50 = vmul.f32 %v1045_v47, %v1042_v44  ;;  %v1231_v47 = vld [vmem:[%s4056_s1 + $0xb0] sm:$0xff] }
0x1496   :  { %v1051_v51 = vadd.f32 %v1050_v49, %v1047_v50  ;;  %v1232_v49 = vld [vmem:[%s4056_s1 + $0xb8] sm:$0xff]  ;;  %v3711_v50 = vpack.c.bf16 %v1231_v47, %v1230_v60 }
0x1498   :  { %v1053_v52 = vrot.slane %v1051_v51, 4  ;;  %v1168_v6 = vrot.slane %v1051_v51, 2 }
0x149a   :  { %1054 = vrot.lane.b32.xlu1 %v1053_v52, %s3387_s25 }
0x150c   :  { %v1055_v53 = vpop.permute.xlu1 %1054 }
0x150d   :  { %2917 = vmatmul.mubr.msk.f32.vlgmr.msra.gmra.mrb[10].mxu1 %vm311_vm6, %v1055_v53 }
0x150e   :  { %2938 = vmatprep.mubr.msk.f32.mxu1 %vm3384_vm2, %v3385_v28  ;;  %3142 = vmatpush3.bf16.msra.mxu1 %v3711_v50 }
0x150f   :  { %3143 = vmatprep.subr.bf16.mxu1 %v3383_v25 }
0x15e0   :  { %v1124_v7 = vpop.f32.mrb[10].mxu1 }
0x15e1   :  { %v1125_v54 = vadd.f32 %v3491_v43, %v1124_v7  ;;  %v2918_v55 = vpop.f32.mrb[11].mxu1  ;;  %v1194_v43 = vrot.slane %v3581_v11, 2 }
0x15e3   :  { %v1129_v56 = vrot.slane %v1125_v54, 2 }
0x15e5   :  { %1138 = vrot.lane.b32.xlu0 %v1129_v56, %s3386_s18  ;;  %v1131_v57 = vadd.f32 %v1129_v56, %v3535_v8 }
0x15e7   :  { %v2645_v58 = vmul.f32 -1.442695, %v1131_v57 }
0x15e9   :  { %3285 = vpow2.f32 %v2645_v58 }
0x15f3   :  { %v3286_v61 = vpop.eup %3285 }
0x15f4   :  { %v1135_v62 = vadd.f32 1.0, %v3286_v61 }
0x15f6   :  { %3287 = vrcp.f32 %v1135_v62 }
0x1600   :  { %v3288_v0 = vpop.eup %3287 }
0x1657   :  { %v1139_v1 = vpop.permute.xlu0 %1138 }
0x1658   :  { %v1141_v2 = vmul.f32 %v3288_v0, %v1139_v1  ;;  %v1225_v1 = vld [vmem:[%s4056_s1 + $0x88] sm:$0xff] }
0x165a   :  { %1143 = vrot.lane.b32.xlu1 %v1141_v2, %s3386_s18  ;;  %v1226_v2 = vld [vmem:[%s4056_s1 + $0x90] sm:$0xff] }
0x165e   :  { %1169 = vrot.lane.b32.xlu1 %v1168_v6, %s3387_s25  ;;  %v1227_v6 = vld [vmem:[%s4056_s1 + $0x98] sm:$0xff] }
0x1662   :  { %1176 = vrot.lane.b32.xlu1 %v1048_v46, %s3387_s25 }
0x1666   :  { %1195 = vrot.lane.b32.xlu1 %v1194_v43, %s3387_s25  ;;  %v3132_v43 = vpack.c.bf16 %v1226_v2, %v1225_v1 }
0x1668   :  { %3133 = vmatprep.subr.bf16.mxu0 %v3132_v43 }
0x1669   :  { %3135 = vmatpush3.bf16.msra.mxu0 %v3132_v43 }
0x166a   :  { %1184 = vrot.lane.b32.xlu1 %v1183_v26, %s3387_s25  ;;  %v1228_v26 = vld [vmem:[%s4056_s1 + $0xa0] sm:$0xff] }
0x166e   :  { %1202 = vrot.lane.b32.xlu1 %v621_v3, %s3387_s25  ;;  %v1148_v3 = vsub.f32 1.0, %v3288_v0 }
0x16cc   :  { %v1144_v9 = vpop.permute.xlu1 %1143 }
0x16cd   :  { %v1146_v10 = vadd.f32 %v1144_v9, %v3535_v8  ;;  %v1154_v8 = vrot.slane %v1051_v51, 6  ;;  %v3136_v9 = vpack.c.bf16 %v1228_v26, %v1227_v6 }
0x16cf   :  { %3289 = vtanh.f32 %v1146_v10  ;;  %v1156_v13 = vmul.f32 %v3288_v0, %v1154_v8  ;;  %3137 = vmatprep.subr.bf16.mxu0 %v3136_v9  ;;  %v3747_v10 = vld [vmem:[%s4056_s1 + $0x50] ss:$0 sm:$0xff] }
0x16d0   :  { %v1170_v14 = vpop.permute.xlu1 %1169  ;;  %3139 = vmatpush3.bf16.msra.mxu0 %v3136_v9 }
0x16d1   :  { %3146 = vmatprep.subr.bf16.mxu0 %v3383_v25 }
0x16d9   :  { %v3290_v12 = vpop.eup %3289 }
0x16da   :  { %1150 = vrot.lane.b32.xlu0 %v3290_v12, %s3387_s25 }
0x16de   :  { %1165 = vrot.lane.b32.xlu0 %v3561_v48, %s3387_s25 }
0x16e2   :  { %1173 = vrot.lane.b32.xlu0 %v3581_v11, %s3387_s25  ;;  %v1209_v11 = vrot.slane %v3540_v21, 2 }
0x16e6   :  { %1191 = vrot.lane.b32.xlu0 %v3639_v19, %s3387_s25 }
0x16ea   :  { %1180 = vrot.lane.b32.xlu0 %v3599_v37, %s3387_s25  ;;  %v1177_v37 = vpop.permute.xlu1 %1176 }
0x16ee   :  { %1199 = vrot.lane.b32.xlu0 %v1051_v51, %s3387_s25  ;;  %v1196_v16 = vpop.permute.xlu1 %1195  ;;  %v1233_v51 = vld [vmem:[%s4056_s1 + $0xc0] sm:$0xff] }
0x16ef   :  { %v3717_v52 = vpack.c.bf16 %v1233_v51, %v1232_v49 }
0x16f1   :  { %3145 = vmatpush3.bf16.msra.mxu1 %v3717_v52 }
0x16f2   :  { %v1185_v18 = vpop.permute.xlu1 %1184  ;;  %3152 = vmatprep.subr.bf16.mxu1 %v3383_v25 }
0x16f4   :  { %2939 = vmatmul.mubr.f32.vlgmr.msra.gmra.mrb[12].mxu1 %v3385_v28 }
0x16f5   :  { %3154 = vmatpush3.bf16.msra.mxu1 %v3711_v50  ;;  %2960 = vmatprep.mubr.msk.f32.mxu1 %vm3384_vm2, %v3385_v28 }
0x16f6   :  { %v1203_v20 = vpop.permute.xlu1 %1202  ;;  %3155 = vmatprep.subr.bf16.mxu1 %v3383_v25 }
0x16f9   :  { %3157 = vmatpush3.bf16.msra.mxu1 %v3717_v52 }
0x16fa   :  { %3164 = vmatprep.subr.bf16.mxu1 %v3383_v25 }
0x174c   :  { %v1151_v59 = vpop.permute.xlu0 %1150 }
0x174d   :  { %v1153_v29 = vmul.f32 %v1151_v59, %v1148_v3 }
0x174f   :  { %v1157_v4 = vadd.f32 %v1156_v13, %v1153_v29 }
0x1750   :  { %v1166_v15 = vpop.permute.xlu0 %1165 }
0x1751   :  { %1206 = vrot.lane.b32.xlu0 %v1157_v4, %s3387_s25  ;;  %v1160_v48 = vrot.slane %v1157_v4, 6  ;;  %v1172_v27 = vsel %vm120_vm1, %v1166_v15, %v1170_v14  ;;  %v2646_v15 = vld [vmem:[%s4056_s1 + $0x4d] ss:$0 sm:$0xff] }
0x1753   :  { %1161 = vrot.lane.b32.xlu1 %v1160_v48, %s3387_s25 }
0x1754   :  { %v1174_v45 = vpop.permute.xlu0 %1173 }
0x1755   :  { %v1179_v31 = vsel %vm120_vm1, %v1174_v45, %v1177_v37  ;;  %v2647_v45 = vld [vmem:[%s4056_s1 + $0x4e] ss:$0 sm:$0xff] }
0x1757   :  { %1210 = vrot.lane.b32.xlu1 %v1209_v11, %s3387_s25 }
0x1758   :  { %v1192_v17 = vpop.permute.xlu0 %1191 }
0x1759   :  { %v1198_v30 = vsel %vm120_vm1, %v1192_v17, %v1196_v16 }
0x175a   :  { %v1220_v38 = vsel %vm1214_vm7, %v1190_v34, %v1198_v30 }
0x175c   :  { %v1181_v19 = vpop.permute.xlu0 %1180 }
0x175d   :  { %v1187_v35 = vsel %vm120_vm1, %v1181_v19, %v1185_v18 }
0x1760   :  { %v1200_v23 = vpop.permute.xlu0 %1199 }
0x1761   :  { %v1205_v32 = vsel %vm120_vm1, %v1200_v23, %v1203_v20 }
0x1762   :  { %v1221_v44 = vsel %vm1216_vm9, %v1220_v38, %v1205_v32 }
0x17c3   :  { %v1207_v5 = vpop.permute.xlu0 %1206 }
0x17c5   :  { %v1162_v24 = vpop.permute.xlu1 %1161 }
0x17c6   :  { %v1164_v21 = vsel %vm120_vm1, %v3544_v22, %v1162_v24 }
0x17c7   :  { %v1215_v33 = vsel %vm1214_vm7, %v1164_v21, %v1172_v27  ;;  %v1487_v12 = vpop.f32.mrb[12].mxu1 }
0x17c8   :  { %v1217_v36 = vsel %vm1216_vm9, %v1215_v33, %v1179_v31  ;;  %v3750_v3 = vadd.f32 %v3747_v10, %v1487_v12  ;;  %v2940_v8 = vpop.f32.mrb[13].mxu1 }
0x17c9   :  { %v1211_v22 = vpop.permute.xlu1 %1210  ;;  %v1219_v40 = vsel %vm1218_vm8, %v1217_v36, %v1187_v35 }
0x17ca   :  { %v1213_v41 = vsel %vm120_vm1, %v1207_v5, %v1211_v22  ;;  %v1235_v42 = vsel %vm311_vm6, %v1219_v40, 0.0 }
0x17cb   :  { %1236 = vadd.xlane.f32.xlu0 %v1235_v42  ;;  %v1222_v46 = vsel %vm1218_vm8, %v1221_v44, %v1213_v41 }
0x17cc   :  { %v1238_v39 = vsel %vm311_vm6, %v1222_v46, 0.0 }
0x17cd   :  { %1239 = vadd.xlane.f32.xlu1 %v1238_v39 }
0x1858   :  { %v1237_v53 = vpop.xlane.xlu0 %1236 }
0x1859   :  { %v1242_v7 = vmul.f32 0.03125, %v1237_v53 }
0x185a   :  { %v1240_v54 = vpop.xlane.xlu1 %1239 }
0x185b   :  { %v1244_v55 = vsub.f32 %v1219_v40, %v1242_v7  ;;  %v1243_v56 = vmul.f32 0.03125, %v1240_v54 }
0x185d   :  { %v1245_v57 = vsub.f32 %v1222_v46, %v1243_v56  ;;  %v1246_v58 = vmul.f32 %v1244_v55, %v1244_v55 }
0x185f   :  { %v1248_v61 = vsel %vm311_vm6, %v1246_v58, 0.0  ;;  %v1247_v62 = vmul.f32 %v1245_v57, %v1245_v57 }
0x1860   :  { %1249 = vadd.xlane.f32.xlu0 %v1248_v61 }
0x1861   :  { %v1251_v0 = vsel %vm311_vm6, %v1247_v62, 0.0 }
0x1864   :  { %1252 = vadd.xlane.f32.xlu0 %v1251_v0 }
0x187a   :  { %1499 = vrot.lane.b32.xlu0 %v3750_v3, %s3386_s18 }
0x18ed   :  { %v1250_v59 = vpop.xlane.xlu0 %1249 }
0x18ee   :  { %v1254_v13 = vmul.f32 0.03125, %v1250_v59 }
0x18f0   :  { %v1256_v29 = vadd.f32 1e-05, %v1254_v13 }
0x18f1   :  { %v1253_v4 = vpop.xlane.xlu0 %1252 }
0x18f2   :  { %3291 = vrsqrt.f32 %v1256_v29  ;;  %v1255_v48 = vmul.f32 0.03125, %v1253_v4 }
0x18f4   :  { %v1257_v11 = vadd.f32 1e-05, %v1255_v48 }
0x18f6   :  { %3293 = vrsqrt.f32 %v1257_v11 }
0x18fc   :  { %v3292_v14 = vpop.eup %3291 }
0x18fd   :  { %v1260_v37 = vmul.f32 %v3292_v14, %v1244_v55 }
0x18ff   :  { %v1266_v16 = vmul.f32 %v2646_v15, %v1260_v37 }
0x1900   :  { %v3294_v17 = vpop.eup %3293 }
0x1901   :  { %v1261_v18 = vmul.f32 %v3294_v17, %v1245_v57  ;;  %v1272_v19 = vadd.f32 %v2647_v45, %v1266_v16 }
0x1903   :  { %v1267_v20 = vmul.f32 %v2646_v15, %v1261_v18  ;;  %v1276_v23 = vmul.f32 0.70710677, %v1272_v19  ;;  %v1274_v13 = vmul.f32 0.5, %v1272_v19 }
0x1905   :  { %v1273_v24 = vadd.f32 %v2647_v45, %v1267_v20  ;;  %v1278_v27 = vand.u32 2147483647, %v1276_v23  ;;  %vm1318_vm10 = vcmp.lt.f32.partialorder %v1276_v23, 0.0  ;;  %v2652_v45 = vld [vmem:[%s4056_s1 + $0x4f] ss:$0 sm:$0xff] }
0x1907   :  { %v1277_v30 = vmul.f32 0.70710677, %v1273_v24  ;;  %v1280_v21 = vmul.f32 0.3275911, %v1278_v27  ;;  %v1306_v35 = vmul.f32 %v1278_v27, %v1278_v27  ;;  %v1275_v14 = vmul.f32 0.5, %v1273_v24 }
0x1909   :  { %v1279_v31 = vand.u32 2147483647, %v1277_v30  ;;  %v1282_v32 = vadd.f32 1.0, %v1280_v21  ;;  %v1308_v5 = vsub.f32 0.0, %v1306_v35  ;;  %vm1319_vm11 = vcmp.lt.f32.partialorder %v1277_v30, 0.0 }
0x190b   :  { %v1281_v33 = vmul.f32 0.3275911, %v1279_v31  ;;  %3295 = vrcp.f32 %v1282_v32  ;;  %v1307_v38 = vmul.f32 %v1279_v31, %v1279_v31  ;;  %v1310_v44 = vmul.f32 1.442695, %v1308_v5 }
0x190d   :  { %v1283_v34 = vadd.f32 1.0, %v1281_v33  ;;  %v1309_v42 = vsub.f32 0.0, %v1307_v38  ;;  %v1500_v38 = vpop.permute.xlu0 %1499 }
0x190f   :  { %3297 = vrcp.f32 %v1283_v34  ;;  %v1312_v49 = vmul.f32 1.442695, %v1309_v42 }
0x1910   :  { %3299 = vpow2.f32 %v1310_v44 }
0x1911   :  { %3301 = vpow2.f32 %v1312_v49 }
0x1915   :  { %v3296_v36 = vpop.eup %3295 }
0x1916   :  { %v1288_v22 = vmul.f32 1.0614054, %v3296_v36 }
0x1918   :  { %v2648_v40 = vadd.f32 -1.4531521, %v1288_v22 }
0x1919   :  { %v3298_v41 = vpop.eup %3297 }
0x191a   :  { %v1292_v46 = vmul.f32 %v3296_v36, %v2648_v40  ;;  %v1289_v39 = vmul.f32 1.0614054, %v3298_v41  ;;  %v3300_v0 = vpop.eup %3299 }
0x191b   :  { %v3302_v26 = vpop.eup %3301 }
0x191c   :  { %v1294_v60 = vadd.f32 1.4214138, %v1292_v46  ;;  %v2649_v47 = vadd.f32 -1.4531521, %v1289_v39 }
0x191e   :  { %v1296_v51 = vmul.f32 %v3296_v36, %v1294_v60  ;;  %v1293_v53 = vmul.f32 %v3298_v41, %v2649_v47 }
0x1920   :  { %v2650_v7 = vadd.f32 -0.28449672, %v1296_v51  ;;  %v1295_v54 = vadd.f32 1.4214138, %v1293_v53 }
0x1922   :  { %v1300_v55 = vmul.f32 %v3296_v36, %v2650_v7  ;;  %v1297_v56 = vmul.f32 %v3298_v41, %v1295_v54 }
0x1924   :  { %v1302_v57 = vadd.f32 0.2548296, %v1300_v55  ;;  %v2651_v58 = vadd.f32 -0.28449672, %v1297_v56 }
0x1926   :  { %v1304_v61 = vmul.f32 %v3296_v36, %v1302_v57  ;;  %v1301_v62 = vmul.f32 %v3298_v41, %v2651_v58 }
0x1928   :  { %v1314_v1 = vmul.f32 %v3300_v0, %v1304_v61  ;;  %v1303_v2 = vadd.f32 0.2548296, %v1301_v62 }
0x192a   :  { %v1316_v6 = vsub.f32 1.0, %v1314_v1  ;;  %v1305_v43 = vmul.f32 %v3298_v41, %v1303_v2 }
0x192c   :  { %v1320_v9 = vsub.f32 0.0, %v1316_v6  ;;  %v1315_v12 = vmul.f32 %v3302_v26, %v1305_v43 }
0x192e   :  { %v1322_v8 = vsel %vm1318_vm10, %v1320_v9, %v1316_v6  ;;  %v1317_v59 = vsub.f32 1.0, %v1315_v12 }
0x192f   :  { %v1324_v29 = vadd.f32 1.0, %v1322_v8 }
0x1930   :  { %v1321_v4 = vsub.f32 0.0, %v1317_v59 }
0x1931   :  { %v1326_v48 = vmul.f32 %v1324_v29, %v1274_v13 }
0x1932   :  { %v1323_v11 = vsel %vm1319_vm11, %v1321_v4, %v1317_v59 }
0x1933   :  { %2927 = vmatprep.mubr.msk.f32.mxu0 %vm311_vm6, %v1326_v48  ;;  %v1325_v15 = vadd.f32 1.0, %v1323_v11 }
0x1935   :  { %v1327_v37 = vmul.f32 %v1325_v15, %v1275_v14 }
0x1937   :  { %2928 = vmatmul.mubr.msk.f32.vlgmr.msra.gmra.mrb[8].mxu0 %vm311_vm6, %v1327_v37 }
0x1938   :  { %3148 = vmatpush3.bf16.msra.mxu0 %v3711_v50  ;;  %2949 = vmatprep.mubr.msk.f32.mxu0 %vm3384_vm2, %v3385_v28 }
0x1939   :  { %3149 = vmatprep.subr.bf16.mxu0 %v3383_v25 }
0x193c   :  { %3151 = vmatpush3.bf16.msra.mxu0 %v3717_v52 }
0x193d   :  { %3158 = vmatprep.subr.bf16.mxu0 %v3383_v25 }
0x1a0a   :  { %v2929_v16 = vpop.f32.mrb[8].mxu0 }
0x1a0b   :  { %v1410_v17 = vadd.f32 %v2929_v16, %v2652_v45  ;;  %v1404_v18 = vpop.f32.mrb[9].mxu0 }
0x1a0c   :  { %v1405_v19 = vadd.f32 %v2652_v45, %v1404_v18 }
0x1a0d   :  { %v1418_v20 = vrot.slane %v1410_v17, 6  ;;  %v1517_v23 = vrot.slane %v1410_v17, 2 }
0x1a0e   :  { %v1838_v24 = vrot.slane %v1405_v19, 6  ;;  %v1944_v27 = vrot.slane %v1405_v19, 2 }
0x1a0f   :  { %v3773_v30 = vsel %vm3515_vm5, %v1405_v19, %v1418_v20  ;;  %v3777_v21 = vsel %vm3515_vm5, %v1405_v19, %v1517_v23 }
0x1a10   :  { %v1491_v31 = vadd.f32 %v3750_v3, %v3773_v30  ;;  %v3783_v32 = vsel %vm3515_vm5, %v1410_v17, %v1838_v24  ;;  %v3787_v33 = vsel %vm3515_vm5, %v1410_v17, %v1944_v27 }
0x1a12   :  { %v2656_v34 = vmul.f32 -1.442695, %v1491_v31 }
0x1a14   :  { %3303 = vpow2.f32 %v2656_v34 }
0x1a1e   :  { %v3304_v35 = vpop.eup %3303 }
0x1a1f   :  { %v1495_v36 = vadd.f32 1.0, %v3304_v35 }
0x1a21   :  { %3305 = vrcp.f32 %v1495_v36 }
0x1a2b   :  { %v3306_v5 = vpop.eup %3305 }
0x1a2c   :  { %v1502_v22 = vmul.f32 %v3306_v5, %v1500_v38  ;;  %v1509_v63 = vsub.f32 1.0, %v3306_v5  ;;  %v1515_v44 = vmul.f32 0.0, %v3306_v5 }
0x1a2e   :  { %1504 = vrot.lane.b32.xlu1 %v1502_v22, %s3386_s18 }
0x1aa0   :  { %v1505_v40 = vpop.permute.xlu1 %1504 }
0x1aa1   :  { %v1507_v3 = vadd.f32 %v1505_v40, %v3773_v30 }
0x1aa3   :  { %3307 = vtanh.f32 %v1507_v3 }
0x1aad   :  { %v3308_v41 = vpop.eup %3307 }
0x1aae   :  { %1511 = vrot.lane.b32.xlu1 %v3308_v41, %s3387_s25 }
0x1b20   :  { %v1512_v42 = vpop.permute.xlu1 %1511 }
0x1b21   :  { %v1514_v46 = vmul.f32 %v1512_v42, %v1509_v63 }
0x1b23   :  { %v3792_v39 = vadd.f32 %v1515_v44, %v1514_v46 }
0x1b25   :  { %1521 = vrot.lane.b32.xlu1 %v3792_v39, %s3387_s25  ;;  %v1621_v6 = vrot.slane %v3792_v39, 6 }
0x1b97   :  { %v3796_v60 = vpop.permute.xlu1 %1521 }
0x1b98   :  { %2950 = vmatmul.mubr.msk.f32.vlgmr.msra.gmra.mrb[10].mxu0 %vm311_vm6, %v3796_v60 }
0x1b99   :  { %3160 = vmatpush3.bf16.msra.mxu0 %v3711_v50  ;;  %2971 = vmatprep.mubr.msk.f32.mxu0 %vm3384_vm2, %v3385_v28 }
0x1b9a   :  { %3161 = vmatprep.subr.bf16.mxu0 %v3383_v25 }
0x1b9d   :  { %3163 = vmatpush3.bf16.msra.mxu0 %v3717_v52 }
0x1b9e   :  { %3170 = vmatprep.subr.bf16.mxu0 %v3383_v25 }
0x1c6b   :  { %v1591_v47 = vpop.f32.mrb[10].mxu0 }
0x1c6c   :  { %v1592_v49 = vadd.f32 %v3747_v10, %v1591_v47  ;;  %v2951_v51 = vpop.f32.mrb[11].mxu0 }
0x1c6e   :  { %v1596_v53 = vrot.slane %v1592_v49, 6 }
0x1c70   :  { %1605 = vrot.lane.b32.xlu0 %v1596_v53, %s3386_s18  ;;  %v1598_v7 = vadd.f32 %v1596_v53, %v3777_v21 }
0x1c72   :  { %v2658_v54 = vmul.f32 -1.442695, %v1598_v7 }
0x1c74   :  { %3309 = vpow2.f32 %v2658_v54 }
0x1c7e   :  { %v3310_v55 = vpop.eup %3309 }
0x1c7f   :  { %v1602_v56 = vadd.f32 1.0, %v3310_v55 }
0x1c81   :  { %3311 = vrcp.f32 %v1602_v56 }
0x1c8b   :  { %v3312_v57 = vpop.eup %3311 }
0x1c8c   :  { %v1615_v2 = vsub.f32 1.0, %v3312_v57  ;;  %v1623_v9 = vmul.f32 %v3312_v57, %v1621_v6 }
0x1ce2   :  { %v1606_v58 = vpop.permute.xlu0 %1605 }
0x1ce3   :  { %v1608_v61 = vmul.f32 %v3312_v57, %v1606_v58 }
0x1ce5   :  { %1610 = vrot.lane.b32.xlu1 %v1608_v61, %s3386_s18 }
0x1d57   :  { %v1611_v62 = vpop.permute.xlu1 %1610 }
0x1d58   :  { %v1613_v0 = vadd.f32 %v1611_v62, %v3777_v21 }
0x1d5a   :  { %3313 = vtanh.f32 %v1613_v0 }
0x1d64   :  { %v3314_v1 = vpop.eup %3313 }
0x1d65   :  { %1617 = vrot.lane.b32.xlu0 %v3314_v1, %s3387_s25 }
0x1dd7   :  { %v1618_v43 = vpop.permute.xlu0 %1617 }
0x1dd8   :  { %v1620_v26 = vmul.f32 %v1618_v43, %v1615_v2 }
0x1dda   :  { %v3813_v12 = vadd.f32 %v1623_v9, %v1620_v26 }
0x1ddc   :  { %v1626_v8 = vrot.slane %v3813_v12, 2  ;;  %v1727_v24 = vrot.slane %v3813_v12, 6 }
0x1dde   :  { %1627 = vrot.lane.b32.xlu1 %v1626_v8, %s3387_s25 }
0x1e50   :  { %v1628_v59 = vpop.permute.xlu1 %1627 }
0x1e51   :  { %2961 = vmatmul.mubr.msk.f32.vlgmr.msra.gmra.mrb[14].mxu1 %vm311_vm6, %v1628_v59 }
0x1e52   :  { %3166 = vmatpush3.bf16.msra.mxu1 %v3711_v50  ;;  %2982 = vmatprep.mubr.msk.f32.mxu1 %vm3384_vm2, %v3385_v28 }
0x1e53   :  { %3167 = vmatprep.subr.bf16.mxu1 %v3383_v25 }
0x1e56   :  { %3169 = vmatpush3.bf16.msra.mxu1 %v3717_v52 }
0x1e57   :  { %3176 = vmatprep.subr.bf16.mxu1 %v3383_v25 }
0x1f24   :  { %v1697_v13 = vpop.f32.mrb[14].mxu1 }
0x1f25   :  { %v1698_v29 = vadd.f32 %v3747_v10, %v1697_v13  ;;  %v2962_v4 = vpop.f32.mrb[15].mxu1 }
0x1f27   :  { %v1702_v48 = vrot.slane %v1698_v29, 4 }
0x1f29   :  { %1711 = vrot.lane.b32.xlu0 %v1702_v48, %s3386_s18  ;;  %v1704_v11 = vadd.f32 %v1702_v48, %v3773_v30 }
0x1f2b   :  { %v2660_v14 = vmul.f32 -1.442695, %v1704_v11 }
0x1f2d   :  { %3315 = vpow2.f32 %v2660_v14 }
0x1f37   :  { %v3316_v15 = vpop.eup %3315 }
0x1f38   :  { %v1708_v37 = vadd.f32 1.0, %v3316_v15 }
0x1f3a   :  { %3317 = vrcp.f32 %v1708_v37 }
0x1f44   :  { %v3318_v45 = vpop.eup %3317 }
0x1f45   :  { %v1721_v23 = vsub.f32 1.0, %v3318_v45  ;;  %v1729_v31 = vmul.f32 %v3318_v45, %v1727_v24 }
0x1f9b   :  { %v1712_v16 = vpop.permute.xlu0 %1711 }
0x1f9c   :  { %v1714_v17 = vmul.f32 %v3318_v45, %v1712_v16 }
0x1f9e   :  { %1716 = vrot.lane.b32.xlu1 %v1714_v17, %s3386_s18 }
0x2010   :  { %v1717_v18 = vpop.permute.xlu1 %1716 }
0x2011   :  { %v1719_v19 = vadd.f32 %v1717_v18, %v3773_v30 }
0x2013   :  { %3319 = vtanh.f32 %v1719_v19 }
0x201d   :  { %v3320_v20 = vpop.eup %3319 }
0x201e   :  { %1723 = vrot.lane.b32.xlu0 %v3320_v20, %s3387_s25 }
0x2090   :  { %v1724_v27 = vpop.permute.xlu0 %1723 }
0x2091   :  { %v1726_v34 = vmul.f32 %v1724_v27, %v1721_v23 }
0x2093   :  { %v3833_v35 = vadd.f32 %v1729_v31, %v1726_v34 }
0x2095   :  { %v1732_v36 = vrot.slane %v3833_v35, 4  ;;  %v1833_v54 = vrot.slane %v3833_v35, 6 }
0x2097   :  { %1733 = vrot.lane.b32.xlu1 %v1732_v36, %s3387_s25 }
0x2109   :  { %v1734_v38 = vpop.permute.xlu1 %1733 }
0x210a   :  { %2972 = vmatmul.mubr.msk.f32.vlgmr.msra.gmra.mrb[12].mxu0 %vm311_vm6, %v1734_v38 }
0x210b   :  { %3172 = vmatpush3.bf16.msra.mxu0 %v3711_v50  ;;  %2993 = vmatprep.mubr.msk.f32.mxu0 %vm3384_vm2, %v3385_v28 }
0x210c   :  { %3173 = vmatprep.subr.bf16.mxu0 %v3383_v25 }
0x210f   :  { %3175 = vmatpush3.bf16.msra.mxu0 %v3717_v52 }
0x2110   :  { %3182 = vmatprep.subr.bf16.mxu0 %v3383_v25 }
0x21dd   :  { %v1803_v30 = vpop.f32.mrb[12].mxu0 }
0x21de   :  { %v1804_v5 = vadd.f32 %v3747_v10, %v1803_v30  ;;  %v2973_v22 = vpop.f32.mrb[13].mxu0 }
0x21e0   :  { %v1808_v40 = vrot.slane %v1804_v5, 2 }
0x21e2   :  { %1817 = vrot.lane.b32.xlu0 %v1808_v40, %s3386_s18  ;;  %v1810_v3 = vadd.f32 %v1808_v40, %v3777_v21 }
0x21e4   :  { %v2662_v41 = vmul.f32 -1.442695, %v1810_v3 }
0x21e6   :  { %3321 = vpow2.f32 %v2662_v41 }
0x21f0   :  { %v3322_v63 = vpop.eup %3321 }
0x21f1   :  { %v1814_v42 = vadd.f32 1.0, %v3322_v63 }
0x21f3   :  { %3323 = vrcp.f32 %v1814_v42 }
0x21fd   :  { %v3324_v44 = vpop.eup %3323 }
0x21fe   :  { %v1827_v7 = vsub.f32 1.0, %v3324_v44  ;;  %v1835_v56 = vmul.f32 %v3324_v44, %v1833_v54 }
0x2254   :  { %v1818_v46 = vpop.permute.xlu0 %1817 }
0x2255   :  { %v1820_v47 = vmul.f32 %v3324_v44, %v1818_v46 }
0x2257   :  { %1822 = vrot.lane.b32.xlu1 %v1820_v47, %s3386_s18 }
0x22c9   :  { %v1823_v49 = vpop.permute.xlu1 %1822 }
0x22ca   :  { %v1825_v51 = vadd.f32 %v1823_v49, %v3777_v21 }
0x22cc   :  { %3325 = vtanh.f32 %v1825_v51 }
0x22d6   :  { %v3326_v53 = vpop.eup %3325 }
0x22d7   :  { %1829 = vrot.lane.b32.xlu0 %v3326_v53, %s3387_s25 }
0x2349   :  { %v1830_v55 = vpop.permute.xlu0 %1829 }
0x234a   :  { %v1832_v57 = vmul.f32 %v1830_v55, %v1827_v7 }
0x234c   :  { %v3851_v58 = vadd.f32 %v1835_v56, %v1832_v57 }
0x234e   :  { %v1842_v61 = vrot.slane %v3851_v58, 6 }
0x2350   :  { %1843 = vrot.lane.b32.xlu1 %v1842_v61, %s3387_s25 }
0x23c2   :  { %v3855_v62 = vpop.permute.xlu1 %1843 }
0x23c3   :  { %2983 = vmatmul.mubr.msk.f32.vlgmr.msra.gmra.mrb[16].mxu1 %vm311_vm6, %v3855_v62 }
0x23c4   :  { %3178 = vmatpush3.bf16.msra.mxu1 %v3711_v50  ;;  %3004 = vmatprep.mubr.msk.f32.mxu1 %vm3384_vm2, %v3385_v28 }
0x23c5   :  { %3179 = vmatprep.subr.bf16.mxu1 %v3383_v25 }
0x23c8   :  { %3181 = vmatpush3.bf16.msra.mxu1 %v3717_v52 }
0x2496   :  { %v1913_v21 = vpop.f32.mrb[16].mxu1 }
0x2497   :  { %v1914_v0 = vadd.f32 %v3747_v10, %v1913_v21  ;;  %v2984_v1 = vpop.f32.mrb[17].mxu1 }
0x2499   :  { %1925 = vrot.lane.b32.xlu0 %v1914_v0, %s3386_s18  ;;  %v1917_v2 = vadd.f32 %v1914_v0, %v3783_v32 }
0x249b   :  { %v2664_v6 = vmul.f32 -1.442695, %v1917_v2 }
0x249d   :  { %3327 = vpow2.f32 %v2664_v6 }
0x24a7   :  { %v3328_v43 = vpop.eup %3327 }
0x24a8   :  { %v1921_v26 = vadd.f32 1.0, %v3328_v43 }
0x24aa   :  { %3329 = vrcp.f32 %v1921_v26 }
0x24b4   :  { %v3330_v9 = vpop.eup %3329 }
0x24b5   :  { %v1935_v48 = vsub.f32 1.0, %v3330_v9  ;;  %v1942_v14 = vmul.f32 %v3330_v9, %v1842_v61 }
0x250b   :  { %v1926_v8 = vpop.permute.xlu0 %1925 }
0x250c   :  { %v1928_v59 = vmul.f32 %v3330_v9, %v1926_v8 }
0x250e   :  { %1930 = vrot.lane.b32.xlu1 %v1928_v59, %s3386_s18 }
0x2580   :  { %v1931_v13 = vpop.permute.xlu1 %1930 }
0x2581   :  { %v1933_v29 = vadd.f32 %v1931_v13, %v3783_v32 }
0x2583   :  { %3331 = vtanh.f32 %v1933_v29 }
0x258d   :  { %v3332_v4 = vpop.eup %3331 }
0x258e   :  { %1937 = vrot.lane.b32.xlu0 %v3332_v4, %s3387_s25 }
0x2600   :  { %v1938_v11 = vpop.permute.xlu0 %1937 }
0x2601   :  { %v1940_v15 = vmul.f32 %v1938_v11, %v1935_v48 }
0x2603   :  { %v3870_v37 = vadd.f32 %v1942_v14, %v1940_v15 }
0x2605   :  { %1948 = vrot.lane.b32.xlu1 %v3870_v37, %s3387_s25  ;;  %v2048_v22 = vrot.slane %v3870_v37, 6 }
0x2677   :  { %v3874_v45 = vpop.permute.xlu1 %1948 }
0x2678   :  { %2994 = vmatmul.mubr.msk.f32.vlgmr.msra.gmra.mrb[14].mxu0 %vm311_vm6, %v3874_v45 }
0x2679   :  { %3184 = vmatpush3.bf16.msra.mxu0 %v3711_v50  ;;  %3015 = vmatprep.mubr.msk.f32.mxu0 %vm3384_vm2, %v3385_v28 }
0x267a   :  { %3185 = vmatprep.subr.bf16.mxu0 %v3383_v25 }
0x267d   :  { %3187 = vmatpush3.bf16.msra.mxu0 %v3717_v52 }
0x267e   :  { %3196 = vmatprep.subr.bf16.mxu0 %v3383_v25 }
0x274b   :  { %v2018_v16 = vpop.f32.mrb[14].mxu0 }
0x274c   :  { %v2019_v17 = vadd.f32 %v3747_v10, %v2018_v16  ;;  %v2995_v18 = vpop.f32.mrb[15].mxu0 }
0x274e   :  { %v2023_v19 = vrot.slane %v2019_v17, 6 }
0x2750   :  { %2032 = vrot.lane.b32.xlu0 %v2023_v19, %s3386_s18  ;;  %v2025_v20 = vadd.f32 %v2023_v19, %v3787_v33 }
0x2752   :  { %v2666_v23 = vmul.f32 -1.442695, %v2025_v20  ;;  %v2289_v20 = vrot.slane %v3870_v37, 2 }
0x2754   :  { %3333 = vpow2.f32 %v2666_v23 }
0x275e   :  { %v3334_v50 = vpop.eup %3333 }
0x275f   :  { %v2029_v27 = vadd.f32 1.0, %v3334_v50 }
0x2761   :  { %3335 = vrcp.f32 %v2029_v27 }
0x276b   :  { %v3336_v31 = vpop.eup %3335 }
0x276c   :  { %v2042_v5 = vsub.f32 1.0, %v3336_v31  ;;  %v2050_v41 = vmul.f32 %v3336_v31, %v2048_v22  ;;  %v2315_v22 = vrot.slane %v3792_v39, 2 }
0x27c2   :  { %v2033_v34 = vpop.permute.xlu0 %2032 }
0x27c3   :  { %v2035_v36 = vmul.f32 %v3336_v31, %v2033_v34 }
0x27c5   :  { %2037 = vrot.lane.b32.xlu1 %v2035_v36, %s3386_s18 }
0x2837   :  { %v2038_v52 = vpop.permute.xlu1 %2037 }
0x2838   :  { %v2040_v38 = vadd.f32 %v2038_v52, %v3787_v33 }
0x283a   :  { %3337 = vtanh.f32 %v2040_v38 }
0x2844   :  { %v3338_v30 = vpop.eup %3337 }
0x2845   :  { %2044 = vrot.lane.b32.xlu0 %v3338_v30, %s3387_s25 }
0x28b7   :  { %v2045_v40 = vpop.permute.xlu0 %2044 }
0x28b8   :  { %v2047_v3 = vmul.f32 %v2045_v40, %v2042_v5 }
0x28ba   :  { %v3891_v63 = vadd.f32 %v2050_v41, %v2047_v3 }
0x28bc   :  { %v2053_v42 = vrot.slane %v3891_v63, 2  ;;  %v2154_v6 = vrot.slane %v3891_v63, 6 }
0x28be   :  { %2054 = vrot.lane.b32.xlu1 %v2053_v42, %s3387_s25 }
0x2930   :  { %v2055_v44 = vpop.permute.xlu1 %2054 }
0x2931   :  { %3005 = vmatmul.mubr.msk.f32.vlgmr.msra.gmra.mrb[18].mxu1 %vm311_vm6, %v2055_v44 }
0x2a04   :  { %v2124_v46 = vpop.f32.mrb[18].mxu1 }
0x2a05   :  { %v2125_v47 = vadd.f32 %v3747_v10, %v2124_v46  ;;  %v3006_v49 = vpop.f32.mrb[19].mxu1 }
0x2a07   :  { %v2129_v51 = vrot.slane %v2125_v47, 4 }
0x2a09   :  { %2138 = vrot.lane.b32.xlu0 %v2129_v51, %s3386_s18  ;;  %v2131_v53 = vadd.f32 %v2129_v51, %v3783_v32 }
0x2a0b   :  { %v2668_v7 = vmul.f32 -1.442695, %v2131_v53 }
0x2a0d   :  { %3339 = vpow2.f32 %v2668_v7 }
0x2a17   :  { %v3340_v54 = vpop.eup %3339 }
0x2a18   :  { %v2135_v55 = vadd.f32 1.0, %v3340_v54 }
0x2a1a   :  { %3341 = vrcp.f32 %v2135_v55 }
0x2a24   :  { %v3342_v56 = vpop.eup %3341 }
0x2a25   :  { %v2148_v2 = vsub.f32 1.0, %v3342_v56  ;;  %v2156_v26 = vmul.f32 %v3342_v56, %v2154_v6 }
0x2a7b   :  { %v2139_v57 = vpop.permute.xlu0 %2138 }
0x2a7c   :  { %v2141_v61 = vmul.f32 %v3342_v56, %v2139_v57 }
0x2a7e   :  { %2143 = vrot.lane.b32.xlu1 %v2141_v61, %s3386_s18  ;;  %v2296_v61 = vsel %vm120_vm1, %v3874_v45, %v3855_v62  ;;  %v2511_v62 = vld [vmem:[%s4056_s1 + $0xe8] sm:$0xff]  ;;  %v2512_v45 = vld [vmem:[%s4056_s1 + $0xf0] sm:$0xff] }
0x2af0   :  { %v2144_v21 = vpop.permute.xlu1 %2143 }
0x2af1   :  { %v2146_v0 = vadd.f32 %v2144_v21, %v3783_v32 }
0x2af3   :  { %3343 = vtanh.f32 %v2146_v0 }
0x2afd   :  { %v3344_v1 = vpop.eup %3343 }
0x2afe   :  { %2150 = vrot.lane.b32.xlu0 %v3344_v1, %s3387_s25 }
0x2b70   :  { %v2151_v43 = vpop.permute.xlu0 %2150 }
0x2b71   :  { %v2153_v9 = vmul.f32 %v2151_v43, %v2148_v2 }
0x2b73   :  { %v2157_v8 = vadd.f32 %v2156_v26, %v2153_v9 }
0x2b75   :  { %v2159_v59 = vrot.slane %v2157_v8, 4  ;;  %v2260_v34 = vrot.slane %v2157_v8, 6 }
0x2b77   :  { %2160 = vrot.lane.b32.xlu1 %v2159_v59, %s3387_s25  ;;  %v3197_v59 = vpack.c.bf16 %v2512_v45, %v2511_v62  ;;  %v2523_v62 = vld [vmem:[%s4056_s1 + $0x148] sm:$0xff]  ;;  %v2524_v45 = vld [vmem:[%s4056_s1 + $0x150] sm:$0xff] }
0x2be9   :  { %v2161_v13 = vpop.permute.xlu1 %2160 }
0x2bea   :  { %3016 = vmatmul.mubr.msk.f32.vlgmr.msra.gmra.mrb[16].mxu0 %vm311_vm6, %v2161_v13  ;;  %v2514_v13 = vld [vmem:[%s4056_s1 + $0x100] sm:$0xff] }
0x2beb   :  { %3061 = vmatprep.mubr.msk.f32.mxu0 %vm3384_vm2, %v3385_v28  ;;  %v2274_v28 = vrot.slane %v2157_v8, 2  ;;  %3198 = vmatpush3.bf16.msra.mxu0 %v3197_v59  ;;  %v3215_v59 = vpack.c.bf16 %v2524_v45, %v2523_v62  ;;  %vm2507_vm2 = vcmask 785408  }
0x2bec   :  { %3199 = vmatprep.subr.bf16.mxu0 %v3383_v25 }
0x2cbd   :  { %v2230_v32 = vpop.f32.mrb[16].mxu0 }
0x2cbe   :  { %v2231_v29 = vadd.f32 %v3747_v10, %v2230_v32  ;;  %v3017_v4 = vpop.f32.mrb[17].mxu0  ;;  %v2300_v10 = vrot.slane %v3833_v35, 2 }
0x2cbf   :  { %v2516_v4 = vld [vmem:[%s4056_s1 + $0x110] sm:$0xff] }
0x2cc0   :  { %v2235_v48 = vrot.slane %v2231_v29, 2  ;;  %v2515_v29 = vld [vmem:[%s4056_s1 + $0x108] sm:$0xff] }
0x2cc2   :  { %2244 = vrot.lane.b32.xlu0 %v2235_v48, %s3386_s18  ;;  %v2237_v11 = vadd.f32 %v2235_v48, %v3787_v33  ;;  %v3203_v48 = vpack.c.bf16 %v2516_v4, %v2515_v29 }
0x2cc4   :  { %v2670_v14 = vmul.f32 -1.442695, %v2237_v11  ;;  %v2517_v11 = vld [vmem:[%s4056_s1 + $0x118] sm:$0xff] }
0x2cc6   :  { %3345 = vpow2.f32 %v2670_v14  ;;  %v2518_v14 = vld [vmem:[%s4056_s1 + $0x120] sm:$0xff] }
0x2cd0   :  { %v3346_v15 = vpop.eup %3345 }
0x2cd1   :  { %v2241_v16 = vadd.f32 1.0, %v3346_v15  ;;  %v3206_v15 = vpack.c.bf16 %v2518_v14, %v2517_v11  ;;  %v2525_v11 = vld [vmem:[%s4056_s1 + $0x158] sm:$0xff]  ;;  %v2526_v14 = vld [vmem:[%s4056_s1 + $0x160] sm:$0xff] }
0x2cd3   :  { %3347 = vrcp.f32 %v2241_v16  ;;  %v2671_v16 = vld [vmem:[%s4056_s1 + $0x51] ss:$0 sm:$0xff] }
0x2cdd   :  { %v3348_v17 = vpop.eup %3347 }
0x2cde   :  { %v2254_v31 = vsub.f32 1.0, %v3348_v17  ;;  %v2262_v52 = vmul.f32 %v3348_v17, %v2260_v34 }
0x2d34   :  { %v2245_v18 = vpop.permute.xlu0 %2244 }
0x2d35   :  { %v2247_v19 = vmul.f32 %v3348_v17, %v2245_v18 }
0x2d37   :  { %2249 = vrot.lane.b32.xlu1 %v2247_v19, %s3386_s18 }
0x2d3b   :  { %2275 = vrot.lane.b32.xlu1 %v2274_v28, %s3387_s25 }
0x2d3f   :  { %2282 = vrot.lane.b32.xlu1 %v2154_v6, %s3387_s25 }
0x2d43   :  { %2301 = vrot.lane.b32.xlu1 %v2300_v10, %s3387_s25 }
0x2d47   :  { %2290 = vrot.lane.b32.xlu1 %v2289_v20, %s3387_s25 }
0x2d4b   :  { %2308 = vrot.lane.b32.xlu1 %v1727_v24, %s3387_s25  ;;  %v2327_v24 = vld [vmem:[%s4056_s1 + $0xd0] sm:$0xff] }
0x2da9   :  { %v2250_v23 = vpop.permute.xlu1 %2249 }
0x2daa   :  { %v2252_v50 = vadd.f32 %v2250_v23, %v3787_v33  ;;  %v2326_v33 = vld [vmem:[%s4056_s1 + $0xc8] sm:$0xff] }
0x2dac   :  { %3349 = vtanh.f32 %v2252_v50 }
0x2dad   :  { %v2276_v40 = vpop.permute.xlu1 %2275 }
0x2db1   :  { %v2283_v41 = vpop.permute.xlu1 %2282 }
0x2db5   :  { %v2302_v42 = vpop.permute.xlu1 %2301 }
0x2db6   :  { %v3350_v27 = vpop.eup %3349 }
0x2db7   :  { %2256 = vrot.lane.b32.xlu0 %v3350_v27, %s3387_s25 }
0x2db9   :  { %v2291_v46 = vpop.permute.xlu1 %2290 }
0x2dbb   :  { %2271 = vrot.lane.b32.xlu0 %v3813_v12, %s3387_s25  ;;  %v3188_v12 = vpack.c.bf16 %v2327_v24, %v2326_v33 }
0x2dbd   :  { %3189 = vmatprep.subr.bf16.mxu1 %v3188_v12  ;;  %v2309_v49 = vpop.permute.xlu1 %2308 }
0x2dbe   :  { %3191 = vmatpush3.bf16.msra.mxu1 %v3188_v12 }
0x2dbf   :  { %2279 = vrot.lane.b32.xlu0 %v3833_v35, %s3387_s25  ;;  %v2328_v35 = vld [vmem:[%s4056_s1 + $0xd8] sm:$0xff] }
0x2dc3   :  { %2297 = vrot.lane.b32.xlu0 %v3891_v63, %s3387_s25 }
0x2dc7   :  { %2286 = vrot.lane.b32.xlu0 %v3851_v58, %s3387_s25  ;;  %v2329_v58 = vld [vmem:[%s4056_s1 + $0xe0] sm:$0xff] }
0x2dc8   :  { %v3192_v37 = vpack.c.bf16 %v2329_v58, %v2328_v35 }
0x2dca   :  { %3193 = vmatprep.subr.bf16.mxu1 %v3192_v37 }
0x2dcb   :  { %2305 = vrot.lane.b32.xlu0 %v2157_v8, %s3387_s25  ;;  %3195 = vmatpush3.bf16.msra.mxu1 %v3192_v37  ;;  %v2513_v8 = vld [vmem:[%s4056_s1 + $0xf8] sm:$0xff] }
0x2dcc   :  { %v3200_v32 = vpack.c.bf16 %v2514_v13, %v2513_v8 }
0x2dce   :  { %3201 = vmatpush3.bf16.msra.mxu0 %v3200_v32 }
0x2dcf   :  { %3202 = vmatprep.subr.bf16.mxu0 %v3383_v25 }
0x2dd2   :  { %3204 = vmatpush3.bf16.msra.mxu0 %v3203_v48 }
0x2dd3   :  { %3205 = vmatprep.subr.bf16.mxu0 %v3383_v25 }
0x2dd6   :  { %3207 = vmatpush3.bf16.msra.mxu0 %v3206_v15 }
0x2dd7   :  { %3208 = vmatprep.subr.bf16.mxu0 %v3383_v25 }
0x2e29   :  { %v2257_v36 = vpop.permute.xlu0 %2256 }
0x2e2a   :  { %v2259_v38 = vmul.f32 %v2257_v36, %v2254_v31 }
0x2e2c   :  { %v2263_v30 = vadd.f32 %v2262_v52, %v2259_v38 }
0x2e2d   :  { %v2272_v3 = vpop.permute.xlu0 %2271 }
0x2e2e   :  { %2312 = vrot.lane.b32.xlu0 %v2263_v30, %s3387_s25  ;;  %v2266_v5 = vrot.slane %v2263_v30, 6  ;;  %v2278_v7 = vsel %vm120_vm1, %v2272_v3, %v2276_v40 }
0x2e30   :  { %2267 = vrot.lane.b32.xlu1 %v2266_v5, %s3387_s25 }
0x2e31   :  { %v2280_v63 = vpop.permute.xlu0 %2279 }
0x2e32   :  { %v2285_v55 = vsel %vm120_vm1, %v2280_v63, %v2283_v41 }
0x2e34   :  { %2316 = vrot.lane.b32.xlu1 %v2315_v22, %s3387_s25 }
0x2e35   :  { %v2298_v44 = vpop.permute.xlu0 %2297 }
0x2e36   :  { %v2304_v54 = vsel %vm120_vm1, %v2298_v44, %v2302_v42 }
0x2e37   :  { %v2323_v1 = vsel %vm1214_vm7, %v2296_v61, %v2304_v54  ;;  %v2520_v54 = vld [vmem:[%s4056_s1 + $0x130] sm:$0xff] }
0x2e39   :  { %v2287_v47 = vpop.permute.xlu0 %2286 }
0x2e3a   :  { %v2293_v21 = vsel %vm120_vm1, %v2287_v47, %v2291_v46 }
0x2e3d   :  { %v2306_v51 = vpop.permute.xlu0 %2305 }
0x2e3e   :  { %v2311_v56 = vsel %vm120_vm1, %v2306_v51, %v2309_v49 }
0x2e3f   :  { %v2324_v43 = vsel %vm1216_vm9, %v2323_v1, %v2311_v56  ;;  %v2522_v1 = vld [vmem:[%s4056_s1 + $0x140] sm:$0xff] }
0x2ea0   :  { %v2313_v2 = vpop.permute.xlu0 %2312 }
0x2ea2   :  { %v2268_v53 = vpop.permute.xlu1 %2267 }
0x2ea3   :  { %v2270_v39 = vsel %vm120_vm1, %v3796_v60, %v2268_v53 }
0x2ea4   :  { %v2320_v57 = vsel %vm1214_vm7, %v2270_v39, %v2278_v7  ;;  %v2519_v7 = vld [vmem:[%s4056_s1 + $0x128] sm:$0xff] }
0x2ea5   :  { %v2321_v0 = vsel %vm1216_vm9, %v2320_v57, %v2285_v55  ;;  %v3209_v55 = vpack.c.bf16 %v2520_v54, %v2519_v7 }
0x2ea6   :  { %v2317_v6 = vpop.permute.xlu1 %2316  ;;  %v2322_v60 = vsel %vm1218_vm8, %v2321_v0, %v2293_v21  ;;  %v2521_v0 = vld [vmem:[%s4056_s1 + $0x138] sm:$0xff] }
0x2ea7   :  { %v2319_v26 = vsel %vm120_vm1, %v2313_v2, %v2317_v6  ;;  %3026 = vmatprep.mubr.msk.f32.mxu1 %vm311_vm6, %v2322_v60  ;;  %3210 = vmatpush3.bf16.msra.mxu0 %v3209_v55  ;;  %v3212_v60 = vpack.c.bf16 %v2522_v1, %v2521_v0 }
0x2ea8   :  { %v2325_v9 = vsel %vm1218_vm8, %v2324_v43, %v2319_v26  ;;  %3211 = vmatprep.subr.bf16.mxu0 %v3383_v25 }
0x2ea9   :  { %3027 = vmatmul.mubr.msk.f32.vlgmr.msra.gmra.mrb[20].mxu1 %vm311_vm6, %v2325_v9 }
0x2eab   :  { %3213 = vmatpush3.bf16.msra.mxu0 %v3212_v60 }
0x2eac   :  { %3214 = vmatprep.subr.bf16.mxu0 %v3383_v25 }
0x2eaf   :  { %3216 = vmatpush3.bf16.msra.mxu0 %v3215_v59 }
0x2eb0   :  { %3217 = vmatprep.subr.bf16.mxu0 %v3383_v25 }
0x2f7c   :  { %v3028_v17 = vpop.f32.mrb[20].mxu1 }
0x2f7d   :  { %v3997_v18 = vadd.f32 %v3028_v17, %v2671_v16  ;;  %v2407_v19 = vpop.f32.mrb[21].mxu1  ;;  %v3218_v17 = vpack.c.bf16 %v2526_v14, %v2525_v11 }
0x2f7e   :  { %v3999_v28 = vadd.f32 %v2671_v16, %v2407_v19 }
0x2f7f   :  { %v2419_v10 = vmul.f32 0.70710677, %v3997_v18  ;;  %v2417_v29 = vmul.f32 0.5, %v3997_v18  ;;  %3219 = vmatpush3.bf16.msra.mxu0 %v3218_v17 }
0x2f80   :  { %v4003_v20 = vmul.f32 0.70710677, %v3999_v28  ;;  %v2416_v15 = vmul.f32 0.5, %v3999_v28 }
0x2f81   :  { %v2421_v23 = vand.u32 2147483647, %v2419_v10  ;;  %vm2461_vm12 = vcmp.lt.f32.partialorder %v2419_v10, 0.0 }
0x2f82   :  { %v2420_v50 = vand.u32 2147483647, %v4003_v20  ;;  %vm2460_vm13 = vcmp.lt.f32.partialorder %v4003_v20, 0.0 }
0x2f83   :  { %v2423_v27 = vmul.f32 0.3275911, %v2421_v23  ;;  %v2449_v35 = vmul.f32 %v2421_v23, %v2421_v23 }
0x2f84   :  { %v2422_v33 = vmul.f32 0.3275911, %v2420_v50  ;;  %v2448_v58 = vmul.f32 %v2420_v50, %v2420_v50 }
0x2f85   :  { %v2425_v24 = vadd.f32 1.0, %v2423_v27  ;;  %v2451_v31 = vsub.f32 0.0, %v2449_v35 }
0x2f86   :  { %v2424_v12 = vadd.f32 1.0, %v2422_v33  ;;  %v2450_v52 = vsub.f32 0.0, %v2448_v58 }
0x2f87   :  { %3351 = vrcp.f32 %v2425_v24  ;;  %v2454_v5 = vmul.f32 1.442695, %v2451_v31 }
0x2f88   :  { %3353 = vrcp.f32 %v2424_v12  ;;  %v2452_v3 = vmul.f32 1.442695, %v2450_v52 }
0x2f89   :  { %3355 = vpow2.f32 %v2454_v5 }
0x2f8a   :  { %3357 = vpow2.f32 %v2452_v3 }
0x2f91   :  { %v3352_v37 = vpop.eup %3351 }
0x2f92   :  { %v3354_v34 = vpop.eup %3353  ;;  %v2431_v36 = vmul.f32 1.0614054, %v3352_v37 }
0x2f93   :  { %v2430_v38 = vmul.f32 1.0614054, %v3354_v34  ;;  %v3356_v61 = vpop.eup %3355 }
0x2f94   :  { %v2675_v30 = vadd.f32 -1.4531521, %v2431_v36  ;;  %v3358_v2 = vpop.eup %3357 }
0x2f95   :  { %v2674_v22 = vadd.f32 -1.4531521, %v2430_v38 }
0x2f96   :  { %v2435_v40 = vmul.f32 %v3352_v37, %v2675_v30 }
0x2f97   :  { %v2434_v41 = vmul.f32 %v3354_v34, %v2674_v22  ;;  %v2678_v22 = vld [vmem:[%s4056_s1 + $0x52] ss:$0 sm:$0xff] }
0x2f98   :  { %v2437_v63 = vadd.f32 1.4214138, %v2435_v40 }
0x2f99   :  { %v2436_v42 = vadd.f32 1.4214138, %v2434_v41 }
0x2f9a   :  { %v2439_v44 = vmul.f32 %v3352_v37, %v2437_v63 }
0x2f9b   :  { %v2438_v46 = vmul.f32 %v3354_v34, %v2436_v42 }
0x2f9c   :  { %v2677_v47 = vadd.f32 -0.28449672, %v2439_v44 }
0x2f9d   :  { %v2676_v49 = vadd.f32 -0.28449672, %v2438_v46 }
0x2f9e   :  { %v2443_v51 = vmul.f32 %v3352_v37, %v2677_v47 }
0x2f9f   :  { %v2442_v53 = vmul.f32 %v3354_v34, %v2676_v49 }
0x2fa0   :  { %v2445_v39 = vadd.f32 0.2548296, %v2443_v51 }
0x2fa1   :  { %v2444_v56 = vadd.f32 0.2548296, %v2442_v53 }
0x2fa2   :  { %v2447_v57 = vmul.f32 %v3352_v37, %v2445_v39 }
0x2fa3   :  { %v2446_v21 = vmul.f32 %v3354_v34, %v2444_v56 }
0x2fa4   :  { %v2457_v6 = vmul.f32 %v3356_v61, %v2447_v57 }
0x2fa5   :  { %v2456_v43 = vmul.f32 %v3358_v2, %v2446_v21 }
0x2fa6   :  { %v2459_v26 = vsub.f32 1.0, %v2457_v6 }
0x2fa7   :  { %v2458_v9 = vsub.f32 1.0, %v2456_v43 }
0x2fa8   :  { %v2463_v8 = vsub.f32 0.0, %v2459_v26 }
0x2fa9   :  { %v2462_v13 = vsub.f32 0.0, %v2458_v9 }
0x2faa   :  { %v2465_v32 = vsel %vm2461_vm12, %v2463_v8, %v2459_v26 }
0x2fab   :  { %v2467_v4 = vadd.f32 1.0, %v2465_v32  ;;  %v2464_v48 = vsel %vm2460_vm13, %v2462_v13, %v2458_v9 }
0x2fac   :  { %v2466_v16 = vadd.f32 1.0, %v2464_v48 }
0x2fad   :  { %v2469_v19 = vmul.f32 %v2467_v4, %v2417_v29 }
0x2fae   :  { %v2468_v10 = vmul.f32 %v2466_v16, %v2416_v15 }
0x2faf   :  { %2484 = vrot.lane.b32.xlu1 %v2469_v19, %s3386_s18  ;;  %v2487_v18 = vrot.slane %v2469_v19, 2  ;;  %v2491_v23 = vrot.slane %v2469_v19, 4  ;;  %v2495_v50 = vrot.slane %v2469_v19, 6 }
0x2fb0   :  { %v2475_v20 = vrot.slane %v2468_v10, 4  ;;  %v2471_v25 = vrot.slane %v2468_v10, 2  ;;  %v2479_v28 = vrot.slane %v2468_v10, 6 }
0x2fb1   :  { %2488 = vrot.lane.b32.xlu0 %v2487_v18, %s3388_s9 }
0x2fb3   :  { %2476 = vrot.lane.b32.xlu1 %v2475_v20, %s3389_s10 }
0x2fb5   :  { %2472 = vrot.lane.b32.xlu0 %v2471_v25, %s3390_s11 }
0x2fb7   :  { %2492 = vrot.lane.b32.xlu1 %v2491_v23, %s3387_s25 }
0x2fb9   :  { %2480 = vrot.lane.b32.xlu0 %v2479_v28, %s3391_s12 }
0x2fbd   :  { %2496 = vrot.lane.b32.xlu0 %v2495_v50, %s3392_s13 }
0x3021   :  { %v2485_v27 = vpop.permute.xlu1 %2484 }
0x3023   :  { %v2489_v33 = vpop.permute.xlu0 %2488 }
0x3025   :  { %v2477_v12 = vpop.permute.xlu1 %2476 }
0x3027   :  { %v2473_v24 = vpop.permute.xlu0 %2472 }
0x3028   :  { %v2499_v35 = vsel %vm120_vm1, %v2468_v10, %v2473_v24  ;;  %vm2602_vm1 = vcmask 33792  }
0x3029   :  { %v2500_v58 = vsel %vm311_vm6, %v2499_v35, %v2477_v12  ;;  %v2493_v36 = vpop.permute.xlu1 %2492 }
0x302b   :  { %v2481_v37 = vpop.permute.xlu0 %2480 }
0x302c   :  { %v2502_v31 = vsel %vm2501_vm14, %v2500_v58, %v2481_v37 }
0x302d   :  { %v2504_v34 = vsel %vm2503_vm15, %v2502_v31, %v2485_v27 }
0x302e   :  { %v2506_v52 = vsel %vm2505_vm0, %v2504_v34, %v2489_v33 }
0x302f   :  { %v2508_v38 = vsel %vm2507_vm2, %v2506_v52, %v2493_v36  ;;  %v2497_v30 = vpop.permute.xlu0 %2496 }
0x3030   :  { %v2510_v5 = vsel %vm2509_vm3, %v2508_v38, %v2497_v30 }
0x3031   :  { %3062 = vmatmul.mubr.f32.vlgmr.msra.gmra.mrb[18].mxu0 %v2510_v5 }
0x3104   :  { %v2598_v40 = vpop.f32.mrb[18].mxu0 }
0x3105   :  { %v2599_v3 = vadd.f32 %v2678_v22, %v2598_v40  ;;  %v3063_v41 = vpop.f32.mrb[19].mxu0 }
0x3107   :  { %2603 = vst.msk [vmem:[#allocation2] sm:$0x3] %vm2602_vm1, %v2599_v3 }
0x3108   :  { %3370 = shalt.err (!%p3367_p4)
}
0x3109   :  { %s3371_s20 = scalar_lea.hbm %s4057_s2, 32 }
0x310a   :  { %p3372_p5 = scmp.ne.s32.totalorder %s4057_s2, %s3371_s20  ;;  %p3375_p6 = scmp.lt.u32.totalorder %s3371_s20, %s4057_s2 }
0x310c   :  { %p3377_p7 = pnand %p3375_p6, %p3372_p5 }
0x310e   :  { %3380 = shalt.err (!%p3377_p7)
}
0x310f   :  { %2613 = dma.vmem_to_hbm [thread:$0]  %s2611_s15, 32, %s4057_s2, [#allocation3]  }
0x3110   :  { %3381 = dma.done.wait [#allocation3], 32  }
0x3111   :  { %3382 = vsyncadd [#allocation3], 4294967264 }
0x3112   :  { %2617 = vsyncpa [#allocation3], 1 }

</bundles_post_ra>
